<compile_context>
chip_gen: v5e
topology: v5e:2x2
jax: 0.10.0
libtpu: 0.0.40
codegen_flags: <defaults>
</compile_context>

<pallas_src>
import jax
import jax.numpy as jnp
from jax import lax
from jax.experimental import pallas as pl
from jax.experimental.pallas import tpu as pltpu
import numpy as np


def _pad_value(dtype):
    """-inf for floats (matches torch MaxPool2d padding), dtype-min for ints."""
    if jnp.issubdtype(dtype, jnp.floating):
        return jnp.array(-jnp.inf, dtype=dtype)
    return jnp.array(jnp.iinfo(dtype).min, dtype=dtype)


def _nchw_to_flat_nhwc(x):
    """(C, H, W) in-register -> lane-dense (H, W*C) NHWC slab."""
    C, H, W = x.shape
    return jnp.transpose(x, (1, 2, 0)).reshape(H, W * C)


def _fused_kernel(hm_ref, paf_ref, paf_out_ref, hm_out_ref, mp_out_ref):
    # ---- PAF: pure layout; permuted copy straight from the VMEM-resident block.
    paf_out_ref[0] = _nchw_to_flat_nhwc(paf_ref[0])

    # ---- Heatmap: 3x3 stride-1 max pool with -inf padding, then fused permute.
    x = hm_ref[0]                                  # (C, H, W)
    C, H, W = x.shape
    neg = _pad_value(x.dtype)

    # 1-D boundary masks, broadcast against (C, H, W).
    h_idx = lax.broadcasted_iota(jnp.int32, (1, H, 1), 1)
    w_idx = lax.broadcasted_iota(jnp.int32, (1, 1, W), 2)

    # 3-tap max along H (sublane rolls; non-negative shifts only).
    x_up = jnp.where(h_idx == 0,     neg, pltpu.roll(x, shift=1,     axis=1))
    x_dn = jnp.where(h_idx == H - 1, neg, pltpu.roll(x, shift=H - 1, axis=1))
    m = jnp.maximum(jnp.maximum(x, x_up), x_dn)

    # 3-tap max along W (lane rolls).
    m_l = jnp.where(w_idx == 0,     neg, pltpu.roll(m, shift=1,     axis=2))
    m_r = jnp.where(w_idx == W - 1, neg, pltpu.roll(m, shift=W - 1, axis=2))
    m = jnp.maximum(jnp.maximum(m, m_l), m_r)

    # ---- Fused NCHW -> NHWC stores (lane-dense flattened layout).
    hm_out_ref[0] = _nchw_to_flat_nhwc(x)
    mp_out_ref[0] = _nchw_to_flat_nhwc(m)


def heatmap_maxpool_and_permute(x):
    """x = (heatmap NCHW, paf NCHW) -> [paf NHWC, heatmap NHWC, maxpool_heatmap NHWC]."""
    heatmap, paf = x
    N, C, H, W = heatmap.shape
    Np, Cp, Hp, Wp = paf.shape
    assert N == Np, "heatmap and PAF must share the batch dimension"

    flat_paf, flat_hm, flat_mp = pl.pallas_call(
        _fused_kernel,
        out_shape=(
            jax.ShapeDtypeStruct((Np, Hp, Wp * Cp), paf.dtype),
            jax.ShapeDtypeStruct((N, H, W * C), heatmap.dtype),
            jax.ShapeDtypeStruct((N, H, W * C), heatmap.dtype),
        ),
        grid_spec=pltpu.PrefetchScalarGridSpec(
            num_scalar_prefetch=0,
            grid=(N,),
            in_specs=[
                pl.BlockSpec((1, C, H, W), lambda n: (n, 0, 0, 0)),
                pl.BlockSpec((1, Cp, Hp, Wp), lambda n: (n, 0, 0, 0)),
            ],
            out_specs=(
                pl.BlockSpec((1, Hp, Wp * Cp), lambda n: (n, 0, 0)),
                pl.BlockSpec((1, H, W * C), lambda n: (n, 0, 0)),
                pl.BlockSpec((1, H, W * C), lambda n: (n, 0, 0)),
            ),
        ),
        compiler_params=pltpu.CompilerParams(
            dimension_semantics=("parallel",),   # megacore-shard over batch
            vmem_limit_bytes=64 * 1024 * 1024,   # explicit cap; blocks here are tiny
        ),
    )(heatmap, paf)

    # Free (metadata-only) reshapes of contiguous trailing dims back to NHWC.
    paf_nhwc = flat_paf.reshape(Np, Hp, Wp, Cp)
    hm_nhwc = flat_hm.reshape(N, H, W, C)
    mp_nhwc = flat_mp.reshape(N, H, W, C)
    return [paf_nhwc, hm_nhwc, mp_nhwc]


def _reference_maxpool3x3(heatmap):
    """Pure-JAX reference: 3x3, stride 1, -inf padding of 1 (NCHW)."""
    pad = jnp.pad(heatmap, ((0, 0), (0, 0), (1, 1), (1, 1)),
                  constant_values=-jnp.inf)
    out = jnp.full_like(heatmap, -jnp.inf)
    H, W = heatmap.shape[2], heatmap.shape[3]
    for dh in range(3):
        for dw in range(3):
            out = jnp.maximum(out, pad[:, :, dh:dh + H, dw:dw + W])
    return out


if __name__ == "__main__":
    key = jax.random.PRNGKey(0)
    k1, k2 = jax.random.split(key)
    # heatmap: (N, C_hm, H, W); PAF: (N, C_paf, H, W)
    heatmap = jax.random.normal(k1, (2, 4, 16, 16), dtype=jnp.float32)
    paf = jax.random.normal(k2, (2, 8, 16, 16), dtype=jnp.float32)

    outputs = heatmap_maxpool_and_permute((heatmap, paf))
    outputs = [jax.block_until_ready(o) for o in outputs]
    paf_out, hm_out, mp_out = outputs

    # correctness checks against pure-JAX reference
    np.testing.assert_allclose(np.asarray(paf_out),
                               np.transpose(np.asarray(paf), (0, 2, 3, 1)))
    np.testing.assert_allclose(np.asarray(hm_out),
                               np.transpose(np.asarray(heatmap), (0, 2, 3, 1)))
    ref_mp = jnp.transpose(_reference_maxpool3x3(heatmap), (0, 2, 3, 1))
    np.testing.assert_allclose(np.asarray(mp_out), np.asarray(ref_mp), rtol=0, atol=0)

    assert paf_out.shape == (2, 16, 16, 8)
    assert hm_out.shape == (2, 16, 16, 4)
    assert mp_out.shape == (2, 16, 16, 4)

    print("KERNEL_OK")
</pallas_src>

<mosaic_0001>
module attributes {stable_mosaic.version = 11 : i64} {
  func.func @_fused_kernel(%arg0: i32, %arg1: memref<1x4x16x16xf32, #tpu.memory_space<vmem>>, %arg2: memref<1x8x16x16xf32, #tpu.memory_space<vmem>>, %arg3: memref<1x16x128xf32, #tpu.memory_space<vmem>>, %arg4: memref<1x16x64xf32, #tpu.memory_space<vmem>>, %arg5: memref<1x16x64xf32, #tpu.memory_space<vmem>>) attributes {dimension_semantics = [#tpu.dimension_semantics<parallel>], iteration_bounds = array<i64: 2>, scalar_prefetch = 0 : i64, scratch_operands = 0 : i64, tpu.core_type = #tpu.core_type<tc>, window_params = [{transform_indices = @transform_0, window_bounds = array<i64: 1, 4, 16, 16>}, {transform_indices = @transform_1, window_bounds = array<i64: 1, 8, 16, 16>}, {transform_indices = @transform_2, window_bounds = array<i64: 1, 16, 128>}, {transform_indices = @transform_3, window_bounds = array<i64: 1, 16, 64>}, {transform_indices = @transform_4, window_bounds = array<i64: 1, 16, 64>}]} {
    %c0 = arith.constant 0 : index
    %c0_0 = arith.constant 0 : index
    %c0_1 = arith.constant 0 : index
    %c0_2 = arith.constant 0 : index
    %0 = vector.load %arg2[%c0, %c0_0, %c0_1, %c0_2] : memref<1x8x16x16xf32, #tpu.memory_space<vmem>>, vector<1x8x16x16xf32>
    %1 = vector.shape_cast %0 : vector<1x8x16x16xf32> to vector<8x16x16xf32>
    %2 = tpu.transpose %1, [1, 2, 0] : vector<8x16x16xf32> -> vector<16x16x8xf32>
    %3 = vector.shape_cast %2 : vector<16x16x8xf32> to vector<16x128xf32>
    %c0_3 = arith.constant 0 : index
    %c0_4 = arith.constant 0 : index
    %c0_5 = arith.constant 0 : index
    %4 = vector.load %arg3[%c0_3, %c0_4, %c0_5] : memref<1x16x128xf32, #tpu.memory_space<vmem>>, vector<1x16x128xf32>
    %5 = vector.shape_cast %4 : vector<1x16x128xf32> to vector<16x128xf32>
    %6 = vector.shape_cast %3 : vector<16x128xf32> to vector<1x16x128xf32>
    tpu.vector_store %arg3[%c0_3, %c0_4, %c0_5], %6 {strides = array<i32>} : memref<1x16x128xf32, #tpu.memory_space<vmem>>, vector<1x16x128xf32>,
    %c0_6 = arith.constant 0 : index
    %c0_7 = arith.constant 0 : index
    %c0_8 = arith.constant 0 : index
    %c0_9 = arith.constant 0 : index
    %7 = vector.load %arg1[%c0_6, %c0_7, %c0_8, %c0_9] : memref<1x4x16x16xf32, #tpu.memory_space<vmem>>, vector<1x4x16x16xf32>
    %8 = vector.shape_cast %7 : vector<1x4x16x16xf32> to vector<4x16x16xf32>
    %9 = tpu.iota {dimensions = array<i32: 1>} : vector<1x16x1xi32>
    %10 = tpu.iota {dimensions = array<i32: 2>} : vector<1x1x16xi32>
    %c0_i32 = arith.constant 0 : i32
    %11 = vector.broadcast %c0_i32 : i32 to vector<1x16x1xi32>
    %12 = arith.cmpi eq, %9, %11 : vector<1x16x1xi32>
    %c1_i32 = arith.constant 1 : i32
    %13 = tpu.dynamic_rotate %8 by %c1_i32 dim 1 : vector<4x16x16xf32>, i32 -> vector<4x16x16xf32>
    %cst = arith.constant 0xFF800000 : f32
    %14 = vector.shape_cast %12 : vector<1x16x1xi1> to vector<1x16x1xi1>
    %15 = vector.broadcast %14 : vector<1x16x1xi1> to vector<4x16x16xi1>
    %16 = vector.broadcast %cst : f32 to vector<4x16x16xf32>
    %17 = arith.select %15, %16, %13 : vector<4x16x16xi1>, vector<4x16x16xf32>
    %c15_i32 = arith.constant 15 : i32
    %18 = vector.broadcast %c15_i32 : i32 to vector<1x16x1xi32>
    %19 = arith.cmpi eq, %9, %18 : vector<1x16x1xi32>
    %c15_i32_10 = arith.constant 15 : i32
    %20 = tpu.dynamic_rotate %8 by %c15_i32_10 dim 1 : vector<4x16x16xf32>, i32 -> vector<4x16x16xf32>
    %cst_11 = arith.constant 0xFF800000 : f32
    %21 = vector.shape_cast %19 : vector<1x16x1xi1> to vector<1x16x1xi1>
    %22 = vector.broadcast %21 : vector<1x16x1xi1> to vector<4x16x16xi1>
    %23 = vector.broadcast %cst_11 : f32 to vector<4x16x16xf32>
    %24 = arith.select %22, %23, %20 : vector<4x16x16xi1>, vector<4x16x16xf32>
    %25 = arith.maximumf %8, %17 : vector<4x16x16xf32>
    %26 = arith.maximumf %25, %24 : vector<4x16x16xf32>
    %c0_i32_12 = arith.constant 0 : i32
    %27 = vector.broadcast %c0_i32_12 : i32 to vector<1x1x16xi32>
    %28 = arith.cmpi eq, %10, %27 : vector<1x1x16xi32>
    %c1_i32_13 = arith.constant 1 : i32
    %29 = tpu.dynamic_rotate %26 by %c1_i32_13 dim 2 : vector<4x16x16xf32>, i32 -> vector<4x16x16xf32>
    %cst_14 = arith.constant 0xFF800000 : f32
    %30 = vector.shape_cast %28 : vector<1x1x16xi1> to vector<1x1x16xi1>
    %31 = vector.broadcast %30 : vector<1x1x16xi1> to vector<4x16x16xi1>
    %32 = vector.broadcast %cst_14 : f32 to vector<4x16x16xf32>
    %33 = arith.select %31, %32, %29 : vector<4x16x16xi1>, vector<4x16x16xf32>
    %c15_i32_15 = arith.constant 15 : i32
    %34 = vector.broadcast %c15_i32_15 : i32 to vector<1x1x16xi32>
    %35 = arith.cmpi eq, %10, %34 : vector<1x1x16xi32>
    %c15_i32_16 = arith.constant 15 : i32
    %36 = tpu.dynamic_rotate %26 by %c15_i32_16 dim 2 : vector<4x16x16xf32>, i32 -> vector<4x16x16xf32>
    %cst_17 = arith.constant 0xFF800000 : f32
    %37 = vector.shape_cast %35 : vector<1x1x16xi1> to vector<1x1x16xi1>
    %38 = vector.broadcast %37 : vector<1x1x16xi1> to vector<4x16x16xi1>
    %39 = vector.broadcast %cst_17 : f32 to vector<4x16x16xf32>
    %40 = arith.select %38, %39, %36 : vector<4x16x16xi1>, vector<4x16x16xf32>
    %41 = arith.maximumf %26, %33 : vector<4x16x16xf32>
    %42 = arith.maximumf %41, %40 : vector<4x16x16xf32>
    %43 = tpu.transpose %8, [1, 2, 0] : vector<4x16x16xf32> -> vector<16x16x4xf32>
    %44 = vector.shape_cast %43 : vector<16x16x4xf32> to vector<16x64xf32>
    %c0_18 = arith.constant 0 : index
    %c0_19 = arith.constant 0 : index
    %c0_20 = arith.constant 0 : index
    %45 = vector.load %arg4[%c0_18, %c0_19, %c0_20] : memref<1x16x64xf32, #tpu.memory_space<vmem>>, vector<1x16x64xf32>
    %46 = vector.shape_cast %45 : vector<1x16x64xf32> to vector<16x64xf32>
    %47 = vector.shape_cast %44 : vector<16x64xf32> to vector<1x16x64xf32>
    tpu.vector_store %arg4[%c0_18, %c0_19, %c0_20], %47 {strides = array<i32>} : memref<1x16x64xf32, #tpu.memory_space<vmem>>, vector<1x16x64xf32>,
    %48 = tpu.transpose %42, [1, 2, 0] : vector<4x16x16xf32> -> vector<16x16x4xf32>
    %49 = vector.shape_cast %48 : vector<16x16x4xf32> to vector<16x64xf32>
    %c0_21 = arith.constant 0 : index
    %c0_22 = arith.constant 0 : index
    %c0_23 = arith.constant 0 : index
    %50 = vector.load %arg5[%c0_21, %c0_22, %c0_23] : memref<1x16x64xf32, #tpu.memory_space<vmem>>, vector<1x16x64xf32>
    %51 = vector.shape_cast %50 : vector<1x16x64xf32> to vector<16x64xf32>
    %52 = vector.shape_cast %49 : vector<16x64xf32> to vector<1x16x64xf32>
    tpu.vector_store %arg5[%c0_21, %c0_22, %c0_23], %52 {strides = array<i32>} : memref<1x16x64xf32, #tpu.memory_space<vmem>>, vector<1x16x64xf32>,
    return
  }
  func.func @transform_0(%arg0: i32) -> (i32, i32, i32, i32) {
    %c0_i32 = arith.constant 0 : i32
    %c0_i32_0 = arith.constant 0 : i32
    %c0_i32_1 = arith.constant 0 : i32
    %c0_i32_2 = arith.constant 0 : i32
    return %arg0, %c0_i32, %c0_i32_0, %c0_i32_1 : i32, i32, i32, i32
  }
  func.func @transform_1(%arg0: i32) -> (i32, i32, i32, i32) {
    %c0_i32 = arith.constant 0 : i32
    %c0_i32_0 = arith.constant 0 : i32
    %c0_i32_1 = arith.constant 0 : i32
    %c0_i32_2 = arith.constant 0 : i32
    return %arg0, %c0_i32, %c0_i32_0, %c0_i32_1 : i32, i32, i32, i32
  }
  func.func @transform_2(%arg0: i32) -> (i32, i32, i32) {
    %c0_i32 = arith.constant 0 : i32
    %c0_i32_0 = arith.constant 0 : i32
    %c0_i32_1 = arith.constant 0 : i32
    return %arg0, %c0_i32, %c0_i32_0 : i32, i32, i32
  }
  func.func @transform_3(%arg0: i32) -> (i32, i32, i32) {
    %c0_i32 = arith.constant 0 : i32
    %c0_i32_0 = arith.constant 0 : i32
    %c0_i32_1 = arith.constant 0 : i32
    return %arg0, %c0_i32, %c0_i32_0 : i32, i32, i32
  }
  func.func @transform_4(%arg0: i32) -> (i32, i32, i32) {
    %c0_i32 = arith.constant 0 : i32
    %c0_i32_0 = arith.constant 0 : i32
    %c0_i32_1 = arith.constant 0 : i32
    return %arg0, %c0_i32, %c0_i32_0 : i32, i32, i32
  }
}

</mosaic_0001>

<bundles_post_ra>
// kernel: tpu_custom_call.1
= control target key start
LH: loop header
LB: loop body
LE: loop exit
PB: predicated region body
PF: predicated region fallthrough
CT: control target
= control target key end

     0   :  { %s10083_s0 = inlined_call_operand.hbm [shape: f32[2,4,16,16], index: 0, kind: input, shape index: {}]   ;;  %s10084_s1 = inlined_call_operand.hbm [shape: f32[2,8,16,16], index: 1, kind: input, shape index: {}]   ;;  %s10085_s2 = inlined_call_operand.hbm [shape: f32[2,16,128], index: 2, kind: output, shape index: {0}]   ;;  %s10086_s3 = inlined_call_operand.hbm [shape: f32[2,16,64], index: 3, kind: output, shape index: {1}]   ;;  %s10087_s4 = inlined_call_operand.hbm [shape: f32[2,16,64], index: 4, kind: output, shape index: {2}]  }
   0x1   :  { %10092 = sst [smem:[#allocation18_spill]] %s10083_s0 }
   0x2   :  { %10 = vsyncpa [#allocation3], 0 }
   0x3   :  { %12 = vsyncpa [#allocation3 + $0x1], 0 }
   0x4   :  { %13 = vsyncpa [#allocation6], 0 }
   0x5   :  { %15 = vsyncpa [#allocation6 + $0x1], 0 }
   0x6   :  { %16 = vsyncpa [#allocation4], 0 }
   0x7   :  { %18 = vsyncpa [#allocation4 + $0x1], 0 }
   0x8   :  { %19 = vsyncpa [#allocation9], 0 }
   0x9   :  { %21 = vsyncpa [#allocation9 + $0x1], 0  ;;  %s6781_s15 = smov 0   ;;  %s6783_s16 = smov 0  }
   0xa   :  { %s6785_s17 = smov 0   ;;  %s6787_s18 = smov 0  }
   0xb LB: > { %10093 = sst [smem:[#allocation15_spill]] %s6720_s17  ;;  %s6802_s19 = sadd.s32 4294967295, %s6724_s18   ;;  %s6724_s18 = sphi %s6787_s18, %s10145_s18   ;;  %s6720_s17 = sphi %s6785_s17, %s10142_s17   ;;  %s6716_s16 = sphi %s6783_s16, %s10144_s16   ;;  %s6712_s15 = sphi %s6781_s15, %s10143_s15  }
   0xc   : > { %s10088_s20 = sadd.s32 4294967294, %s6724_s18   ;;  %s6806_s21 = sadd.s32 1, %s6724_s18  }
   0xd   : > { %s34_s22 = sadd.s32 1, %s6720_s17  ;;  %s31_s23 = ssub.s32 %s6724_s18, %s6806_s21 }
   0xe   : > { %p41_p0 = scmp.ne.s32.totalorder %s6720_s17, %s6716_s16  ;;  %p32_p1 = scmp.eq.s32.totalorder %s31_s23, 0 }
   0xf   : > { %p42_p2 = scmp.eq.s32.totalorder %s6724_s18, 0  ;;  %p47_p3 = scmp.ne.s32.totalorder %s6716_s16, %s6712_s15 }
  0x10   : > { %p48_p4 = scmp.eq.s32.totalorder %s6802_s19, 0  ;;  %p97_p7 = scmp.eq.s32.totalorder %s6802_s19, 1 }
  0x11   : > { %s6818_s24 = scalar_select %p32_p1, %s6720_s17, %s34_s22  }
  0x12   : > { %p6820_p5 = por %p42_p2, %p41_p0  ;;  %p6824_p6 = por %p48_p4, %p47_p3 }
  0x13   : > { %10094 = sst [smem:[#allocation16_spill]] %s6818_s24  ;;  %p103_p8 = scmp.eq.s32.totalorder %s10088_s20, 1 }
  0x14   : > { %p6469_p10 = scmp.lt.s32.totalorder %s6724_s18, 2  ;;  %p6833_p11 = por %p97_p7, %p41_p0 }
  0x15   : > { %p6837_p12 = por %p103_p8, %p47_p3  ;;  %s6842_s29 = sand.u32 1, %s6720_s17  }
  0x16   : > { %s6437_s30 = sshll.u32 %s6724_s18, 6  ;;  %s6414_s5 = sshll.u32 %s6842_s29, 6 }
  0x17   : > { %s10099_s0 = sld [smem:[#allocation18_spill]]  ;;  %s179_s10 = scalar_lea.vmem [#allocation2], %s6414_s5 }
  0x18   : > { %s187_s11 = sshll.u32 %s179_s10, 4  ;;  %p6851_p13 = pnand %p6469_p10, %p6820_p5  ;;  %s188_s11 = int_to_ptr.vmem [resolvable:$true] %s187_s11 }
  0x19   : > { %p6420_p0 = scmp.ge.s32.totalorder %s6724_s18, 1  ;;  %p217_p1 = scmp.lt.s32.totalorder %s6724_s18, 3 }
  0x1a   : > { %s176_s13 = scalar_lea.sflag [#allocation3], %s6842_s29  ;;  %p6538_p3 = pneg %p6851_p13 }
  0x1d   : > { %s184_s8 = scalar_lea.hbm %s10099_s0, %s6437_s30  ;;  %s6541_s30 = scalar_lea.hbm %s10099_s0, 128 }
  0x1e   : > { %s185_s9 = sshll.u32 %s184_s8, 4  ;;  %s186_s9 = int_to_ptr.hbm [resolvable:$true] %s185_s9 }
  0x1f   : > { %s6534_s14 = sshra.s32 %s186_s9, 4  ;;  %s6535_s14 = int_to_ptr.hbm [resolvable:$true] %s6534_s14 }
  0x20   : > { %s6536_s22 = scalar_lea.hbm %s6535_s14, 64  ;;  %p6542_p5 = scmp.lt.s32.totalorder %s6535_s14, %s10099_s0 }
  0x21   : > { %p6537_p2 = scmp.ne.s32.totalorder %s6535_s14, %s6536_s22  ;;  %p6543_p8 = scmp.lt.s32.totalorder %s6541_s30, %s6536_s22 }
  0x23   : > { %p6539_p4 = pnand %p6538_p3, %p6537_p2  ;;  %p6544_p10 = por %p6543_p8, %p6542_p5 }
  0x25   : > { %p6540_p7 = pneg %p6539_p4 }
  0x27   : > { %p6545_p9 = pnand %p6544_p10, %p6540_p7 }
  0x29   : > { %6548 = shalt.err (!%p6545_p9)
}
  0x2a   : > { %s6726_s7 = smov 128   ;;  %s6727_s8 = smov 8  }
  0x2b   : > { %6455 = dma.hbm_to_vmem [thread:$0]  (!%p6851_p13), %s186_s9, 1024, %s188_s11, %s176_s13, %s6726_s7, %s6726_s7, %s6727_s8  }
  0x2c   : > { %p6875_p2 = pnand %p6420_p0, %p217_p1  ;;  %s6417_s14 = sshll.u32 %s6842_s29, 7 }
  0x2d   : > { %s6438_s22 = sshll.u32 %s6724_s18, 7  ;;  %s201_s6 = scalar_lea.vmem [#allocation5], %s6417_s14 }
  0x2e   : > { %s206_s30 = scalar_lea.hbm %s10084_s1, %s6438_s22  ;;  %s209_s20 = sshll.u32 %s201_s6, 4  ;;  %s210_s20 = int_to_ptr.vmem [resolvable:$true] %s209_s20 }
  0x2f   : > { %s207_s5 = sshll.u32 %s206_s30, 4  ;;  %s198_s0 = scalar_lea.sflag [#allocation6], %s6842_s29  ;;  %s208_s5 = int_to_ptr.hbm [resolvable:$true] %s207_s5 }
  0x30   : > { %s6564_s24 = sshra.s32 %s208_s5, 4  ;;  %s6571_s17 = scalar_lea.hbm %s10084_s1, 256  ;;  %s6565_s24 = int_to_ptr.hbm [resolvable:$true] %s6564_s24 }
  0x31   : > { %s6566_s9 = scalar_lea.hbm %s6565_s24, 128  ;;  %p6572_p4 = scmp.lt.s32.totalorder %s6565_s24, %s10084_s1 }
  0x32   : > { %p6567_p9 = scmp.ne.s32.totalorder %s6565_s24, %s6566_s9  ;;  %p6573_p7 = scmp.lt.s32.totalorder %s6571_s17, %s6566_s9 }
  0x34   : > { %p6569_p0 = pnand %p6567_p9, %p6538_p3  ;;  %p6574_p5 = por %p6573_p7, %p6572_p4 }
  0x36   : > { %p6570_p1 = pneg %p6569_p0 }
  0x38   : > { %p6575_p8 = pnand %p6574_p5, %p6570_p1 }
  0x3a   : > { %6578 = shalt.err (!%p6575_p8)
}
  0x3b   : > { %6458 = dma.hbm_to_vmem [thread:$0]  (!%p6851_p13), %s208_s5, 2048, %s210_s20, %s198_s0, %s6726_s7, %s6726_s7, %s6727_s8  }
  0x3c   : > { %221 = sbr.rel (%p6875_p2) target bundleno = 1850 (0x73a), region = 28 }
  0x41   : > { %s6899_s29 = sand.u32 1, %s6716_s16  }
  0x42   : > { %s6421_s14 = sshll.u32 %s6899_s29, 6  ;;  %s224_s25 = scalar_lea.sflag [#allocation3], %s6899_s29 }
  0x43   : > { %s6903_s30 = scalar_lea.vmem [#allocation2], %s6421_s14 }
  0x44   : > { %6695 = dma.done.wait (%p6824_p6), %s224_s25, 1024  }
  0x45   : > { %6697 = vsyncadd (%p6824_p6), %s224_s25, 4294966272  ;;  %s6422_s0 = sshll.u32 %s6899_s29, 7  ;;  %s234_s17 = scalar_lea.sflag [#allocation6], %s6899_s29 }
  0x46   : > { %s6911_s20 = scalar_lea.vmem [#allocation5], %s6422_s0 }
  0x47   : > { %6699 = dma.done.wait (%p6824_p6), %s234_s17, 2048  }
  0x48   : > { %6701 = vsyncadd (%p6824_p6), %s234_s17, 4294965248  ;;  %v280_v0 = vld [vmem:[%s6911_s20 + $0x10] sm:$0xff]  ;;  %v278_v1 = vld [vmem:[%s6911_s20] sm:$0xff]  ;;  %vm551_vm0 = vcmask 1047556   ;;  %v6728_v24 = vmov 1983009808  }
  0x49   : > { %326 = vxpose.xlu1.b32.start [1/2] (short) (narrow) %v280_v0, 16  ;;  %294 = vxpose.xlu0.b32.start [1/2] (short) (narrow) %v278_v1, 16  ;;  %v282_v2 = vld [vmem:[%s6911_s20 + $0x20] sm:$0xff]  ;;  %v281_v3 = vld [vmem:[%s6911_s20 + $0x18] sm:$0xff]  ;;  %v279_v4 = vld [vmem:[%s6911_s20 + $0x8] sm:$0xff]  ;;  %v556_v25 = vunpack.c.l.s4 %v6728_v24  ;;  %s6730_s24 = smov 8  }
  0x4a   : > { %358 = vxpose.xlu2.b32.start [1/2] (short) (narrow) %v282_v2, 16  ;;  %v283_v5 = vld [vmem:[%s6911_s20 + $0x28] sm:$0xff]  ;;  %v286_v6 = vld [vmem:[%s6911_s20 + $0x40] sm:$0xff]  ;;  %v284_v7 = vld [vmem:[%s6911_s20 + $0x30] sm:$0xff]  ;;  %v6729_v50 = vmov 1934713408  }
  0x4b   : > { %v288_v8 = vld [vmem:[%s6911_s20 + $0x50] sm:$0xff]  ;;  %v287_v9 = vld [vmem:[%s6911_s20 + $0x48] sm:$0xff]  ;;  %v285_v10 = vld [vmem:[%s6911_s20 + $0x38] sm:$0xff]  ;;  %v6948_v28 = vunpack.c.0.s8 %v556_v25  ;;  %v604_v51 = vunpack.c.l.s4 %v6729_v50  ;;  %s6731_s26 = smov 16   ;;  %s6732_s12 = smov 32   ;;  %vm2303_vm5 = vcmask 64512  }
  0x4c   : > { %v289_v11 = vld [vmem:[%s6911_s20 + $0x58] sm:$0xff]  ;;  %v292_v12 = vld [vmem:[%s6911_s20 + $0x70] sm:$0xff]  ;;  %v290_v13 = vld [vmem:[%s6911_s20 + $0x60] sm:$0xff]  ;;  %s6733_s7 = smov 24   ;;  %s6734_s8 = smov 40   ;;  %vm2306_vm6 = vcmask 130048  }
  0x4d   : > { %v293_v14 = vld [vmem:[%s6911_s20 + $0x78] sm:$0xff]  ;;  %v291_v15 = vld [vmem:[%s6911_s20 + $0x68] sm:$0xff]  ;;  %v6976_v61 = vunpack.c.0.s8 %v604_v51  ;;  %s6735_s10 = smov 48   ;;  %s6736_s5 = smov 56   ;;  %vm2309_vm7 = vcmask 195584   ;;  %vm2312_vm8 = vcmask 261120  }
  0x4e   : > { %s6737_s6 = smov 72   ;;  %s6738_s9 = smov 64   ;;  %vm2315_vm9 = vcmask 326656   ;;  %vm2442_vm10 = vcmask 1047680   ;;  %vm2318_vm11 = vcmask 392192   ;;  %vm10090_vm12 = vcmask 457728  }
  0x4f   : > { %s6739_s11 = smov 80   ;;  %s6740_s13 = smov 96   ;;  %vm2324_vm13 = vcmask 523264   ;;  %vm2327_vm14 = vcmask 588800   ;;  %vm2330_vm15 = vcmask 654336  }
  0x50   : > { %s6741_s23 = smov 88   ;;  %s6742_s22 = smov 104  }
  0x51   : > { %327 = vxpose.xlu1.b32.end [2/2] (short) (narrow) %v281_v3, 16  ;;  %295 = vxpose.xlu0.b32.end [2/2] (short) (narrow) %v279_v4, 16  ;;  %s6743_s14 = smov 120   ;;  %s6744_s25 = smov 112  }
  0x52   : > { %359 = vxpose.xlu2.b32.end [2/2] (short) (narrow) %v283_v5, 16  ;;  %s6745_s17 = smov 113   ;;  %s6746_s20 = smov 127  }
  0x59   : > { %422 = vxpose.xlu1.b32.start [1/2] (short) (narrow) %v286_v6, 16  ;;  %390 = vxpose.xlu0.b32.start [1/2] (short) (narrow) %v284_v7, 16 }
  0x5a   : > { %454 = vxpose.xlu2.b32.start [1/2] (short) (narrow) %v288_v8, 16 }
  0x61   : > { %423 = vxpose.xlu1.b32.end [2/2] (short) (narrow) %v287_v9, 16  ;;  %391 = vxpose.xlu0.b32.end [2/2] (short) (narrow) %v285_v10, 16 }
  0x62   : > { %455 = vxpose.xlu2.b32.end [2/2] (short) (narrow) %v289_v11, 16 }
  0x69   : > { %518 = vxpose.xlu1.b32.start [1/2] (short) (narrow) %v292_v12, 16  ;;  %486 = vxpose.xlu0.b32.start [1/2] (short) (narrow) %v290_v13, 16 }
  0x71   : > { %519 = vxpose.xlu1.b32.end [2/2] (short) (narrow) %v293_v14, 16  ;;  %487 = vxpose.xlu0.b32.end [2/2] (short) (narrow) %v291_v15, 16 }
  0xe3   : > { %v6933_v16 = vpop.trf.xlu2 }
  0xe4   : > { %v550_v30 = vrot.slane %v6933_v16, 4 }
  0xeb   : > { %v6942_v22 = vpop.trf.xlu2 }
  0xed   : > { %v342_v17 = vpop.trf.xlu1  ;;  %v6935_v18 = vpop.trf.xlu0 }
  0xee   : > { %v552_v39 = vsel %vm551_vm0, %v550_v30, %v6935_v18  ;;  %v565_v63 = vrot.slane %v342_v17, 4  ;;  %v553_v4 = vrot.slane %v6935_v18, 4 }
  0xef   : > { %v558_v43 = vperm.slane %v552_v39, %v6948_v28 }
  0xf1   : > { %v601_v52 = vrot.slane %v558_v43, 4 }
  0xf3   : > { %v470_v32 = vpop.trf.xlu2 }
  0xf4   : > { %v589_v59 = vrot.slane %v470_v32, 4 }
  0xf5   : > { %v6937_v19 = vpop.trf.xlu1  ;;  %v6939_v20 = vpop.trf.xlu0 }
  0xf6   : > { %v665_v21 = vrot.slane %v6939_v20, 4  ;;  %v677_v31 = vrot.slane %v6937_v19, 4 }
  0xf8   : > { %v666_v23 = vsel %vm551_vm0, %v6942_v22, %v665_v21 }
  0xf9   : > { %v674_v29 = vperm.slane %v666_v23, %v6948_v28 }
  0xfb   : > { %v725_v37 = vrot.slane %v674_v29, 4  ;;  %v6967_v53 = vpop.trf.xlu2 }
  0xfc   : > { %v701_v60 = vrot.slane %v6967_v53, 4 }
  0xfd   : > { %v6946_v26 = vpop.trf.xlu1  ;;  %v406_v27 = vpop.trf.xlu0 }
  0xfe   : > { %v563_v35 = vrot.slane %v406_v27, 4  ;;  %v566_v5 = vsel %vm551_vm0, %v406_v27, %v565_v63  ;;  %v577_v21 = vrot.slane %v6946_v26, 4 }
  0xff   : > { %v6994_v23 = vperm.slane %v566_v5, %v6948_v28 }
 0x100   : > { %v564_v42 = vsel %vm551_vm0, %v563_v35, %v342_v17 }
 0x101   : > { %v570_v45 = vperm.slane %v564_v42, %v6948_v28  ;;  %v611_v39 = vrot.slane %v6994_v23, 4 }
 0x103   : > { %v602_v58 = vsel %vm551_vm0, %v570_v45, %v601_v52  ;;  %v599_v62 = vrot.slane %v570_v45, 4 }
 0x104   : > { %v610_v3 = vperm.slane %v602_v58, %v6976_v61 }
 0x105   : > { %v6953_v33 = vpop.trf.xlu1  ;;  %v6955_v34 = vpop.trf.xlu0  ;;  %v600_v13 = vsel %vm551_vm0, %v599_v62, %v558_v43 }
 0x106   : > { %v678_v36 = vsel %vm551_vm0, %v6955_v34, %v677_v31  ;;  %v689_v2 = vrot.slane %v6953_v33, 4  ;;  %v653_v24 = vrot.slane %v610_v3, 4 }
 0x107   : > { %v686_v38 = vperm.slane %v678_v36, %v6948_v28 }
 0x109   : > { %v723_v40 = vrot.slane %v686_v38, 4  ;;  %v726_v41 = vsel %vm551_vm0, %v686_v38, %v725_v37  ;;  %v554_v37 = vsel %vm551_vm0, %v6933_v16, %v553_v4 }
 0x10a   : > { %v734_v30 = vperm.slane %v726_v41, %v6976_v61  ;;  %v562_v16 = vperm.slane %v554_v37, %v6948_v28 }
 0x10b   : > { %v724_v44 = vsel %vm551_vm0, %v723_v40, %v674_v29  ;;  %v606_v29 = vperm.slane %v600_v13, %v6976_v61 }
 0x10c   : > { %v730_v38 = vperm.slane %v724_v44, %v6976_v61 }
 0x10d   : > { %v534_v46 = vpop.trf.xlu1  ;;  %v502_v47 = vpop.trf.xlu0 }
 0x10e   : > { %v587_v48 = vrot.slane %v534_v46, 4  ;;  %v575_v49 = vrot.slane %v502_v47, 4  ;;  %v590_v10 = vsel %vm551_vm0, %v534_v46, %v589_v59  ;;  %v773_v46 = vrot.slane %v734_v30, 4 }
 0x10f   : > { %v598_v25 = vperm.slane %v590_v10, %v6948_v28  ;;  %v769_v50 = vrot.slane %v730_v38, 4  ;;  %v663_v10 = vrot.slane %v6942_v22, 4 }
 0x110   : > { %v588_v54 = vsel %vm551_vm0, %v587_v48, %v470_v32  ;;  %v576_v55 = vsel %vm551_vm0, %v575_v49, %v6946_v26  ;;  %v578_v26 = vsel %vm551_vm0, %v502_v47, %v577_v21 }
 0x111   : > { %v594_v56 = vperm.slane %v588_v54, %v6948_v28  ;;  %v582_v57 = vperm.slane %v576_v55, %v6948_v28  ;;  %v635_v43 = vrot.slane %v598_v25, 4  ;;  %v586_v47 = vperm.slane %v578_v26, %v6948_v28 }
 0x112   : > { %v612_v54 = vsel %vm551_vm0, %v611_v39, %v562_v16 }
 0x113   : > { %v623_v0 = vrot.slane %v594_v56, 4  ;;  %v625_v1 = vrot.slane %v582_v57, 4  ;;  %v636_v55 = vsel %vm551_vm0, %v635_v43, %v586_v47  ;;  %v618_v62 = vperm.slane %v612_v54, %v6976_v61 }
 0x114   : > { %v642_v63 = vperm.slane %v636_v55, %v6976_v61 }
 0x115   : > { %v535_v6 = vpop.trf.xlu1  ;;  %v503_v7 = vpop.trf.xlu0  ;;  %v626_v8 = vsel %vm551_vm0, %v594_v56, %v625_v1  ;;  %v624_v9 = vsel %vm551_vm0, %v623_v0, %v582_v57  ;;  %v675_v0 = vrot.slane %v6955_v34, 4 }
 0x116   : > { %v702_v11 = vsel %vm551_vm0, %v535_v6, %v701_v60  ;;  %v690_v12 = vsel %vm551_vm0, %v503_v7, %v689_v2  ;;  %v634_v17 = vperm.slane %v626_v8, %v6976_v61  ;;  %v630_v18 = vperm.slane %v624_v9, %v6976_v61 }
 0x117   : > { %v710_v14 = vperm.slane %v702_v11, %v6948_v28  ;;  %v698_v15 = vperm.slane %v690_v12, %v6948_v28  ;;  %v699_v52 = vrot.slane %v535_v6, 4  ;;  %v687_v1 = vrot.slane %v503_v7, 4 }
 0x118   : > { %v654_v32 = vsel %vm551_vm0, %v634_v17, %v653_v24  ;;  %v651_v35 = vrot.slane %v634_v17, 4  ;;  %v647_v36 = vrot.slane %v630_v18, 4  ;;  %v655_v4 = vrot.slane %v642_v63, 4 }
 0x119   : > { %v749_v27 = vrot.slane %v698_v15, 4  ;;  %v747_v31 = vrot.slane %v710_v14, 4  ;;  %871 = vxpose.xlu1.b32.start.end [1/1] (short) (narrow) %v654_v32, 16  ;;  %v700_v60 = vsel %vm551_vm0, %v699_v52, %v6967_v53  ;;  %v676_v5 = vsel %vm551_vm0, %v675_v0, %v6937_v19 }
 0x11a   : > { %v652_v40 = vsel %vm551_vm0, %v651_v35, %v610_v3  ;;  %v648_v42 = vsel %vm551_vm0, %v647_v36, %v606_v29  ;;  %v706_v2 = vperm.slane %v700_v60, %v6948_v28  ;;  %v657_v3 = vrot.slane %v618_v62, 4 }
 0x11b   : > { %v750_v41 = vsel %vm551_vm0, %v710_v14, %v749_v27  ;;  %839 = vxpose.xlu0.b32.start.end [1/1] (short) (narrow) %v652_v40, 16  ;;  %775 = vxpose.xlu2.b32.start.end [1/1] (short) (narrow) %v648_v42, 16  ;;  %v748_v44 = vsel %vm551_vm0, %v747_v31, %v698_v15  ;;  %v688_v6 = vsel %vm551_vm0, %v687_v1, %v6953_v33  ;;  %v649_v53 = vrot.slane %v606_v29, 4 }
 0x11c   : > { %v758_v45 = vperm.slane %v750_v41, %v6976_v61  ;;  %v754_v49 = vperm.slane %v748_v44, %v6976_v61  ;;  %v658_v8 = vsel %vm551_vm0, %v642_v63, %v657_v3  ;;  %v735_v9 = vrot.slane %v706_v2, 4 }
 0x11d   : > { %v656_v34 = vsel %vm551_vm0, %v655_v4, %v618_v62  ;;  %v650_v7 = vsel %vm551_vm0, %v630_v18, %v649_v53  ;;  %v682_v11 = vperm.slane %v676_v5, %v6948_v28  ;;  %v637_v12 = vrot.slane %v586_v47, 4 }
 0x11e   : > { %v771_v48 = vrot.slane %v758_v45, 4  ;;  %v7014_v51 = vsel %vm551_vm0, %v758_v45, %v773_v46  ;;  %v770_v57 = vsel %vm551_vm0, %v754_v49, %v769_v50  ;;  %v767_v58 = vrot.slane %v754_v49, 4 }
 0x11f   : > { %v694_v13 = vperm.slane %v688_v6, %v6948_v28  ;;  %v664_v33 = vsel %vm551_vm0, %v663_v10, %v6939_v20  ;;  %v613_v14 = vrot.slane %v562_v16, 4  ;;  %v711_v15 = vrot.slane %v682_v11, 4 }
 0x120   : > { %v772_v56 = vsel %vm551_vm0, %v771_v48, %v734_v30  ;;  %v768_v59 = vsel %vm551_vm0, %v767_v58, %v730_v38  ;;  %v638_v22 = vsel %vm551_vm0, %v598_v25, %v637_v12  ;;  %v670_v18 = vperm.slane %v664_v33, %v6948_v28 }
 0x121   : > { %v736_v19 = vsel %vm551_vm0, %v735_v9, %v694_v13  ;;  %v614_v21 = vsel %vm551_vm0, %v6994_v23, %v613_v14  ;;  %v646_v24 = vperm.slane %v638_v22, %v6976_v61  ;;  %v737_v37 = vrot.slane %v694_v13, 4 }
 0x122   : > { %v742_v17 = vperm.slane %v736_v19, %v6976_v61  ;;  %v712_v27 = vsel %vm551_vm0, %v711_v15, %v670_v18  ;;  %v622_v30 = vperm.slane %v614_v21, %v6976_v61  ;;  %v713_v23 = vrot.slane %v670_v18, 4 }
 0x123   : > { %v718_v20 = vperm.slane %v712_v27, %v6976_v61  ;;  %v659_v31 = vrot.slane %v646_v24, 4  ;;  %v738_v38 = vsel %vm551_vm0, %v706_v2, %v737_v37 }
 0x124   : > { %v759_v29 = vrot.slane %v742_v17, 4  ;;  %v661_v25 = vrot.slane %v622_v30, 4  ;;  %v714_v26 = vsel %vm551_vm0, %v682_v11, %v713_v23  ;;  %v746_v40 = vperm.slane %v738_v38, %v6976_v61 }
 0x125   : > { %v660_v36 = vsel %vm551_vm0, %v659_v31, %v622_v30  ;;  %v722_v39 = vperm.slane %v714_v26, %v6976_v61  ;;  %v761_v45 = vrot.slane %v718_v20, 4 }
 0x126   : > { %v760_v32 = vsel %vm551_vm0, %v759_v29, %v718_v20  ;;  %v662_v35 = vsel %vm551_vm0, %v646_v24, %v661_v25  ;;  %v763_v41 = vrot.slane %v746_v40, 4 }
 0x127   : > { %v765_v42 = vrot.slane %v722_v39, 4  ;;  %v762_v16 = vsel %vm551_vm0, %v742_v17, %v761_v45 }
 0x128   : > { %v764_v46 = vsel %vm551_vm0, %v763_v41, %v722_v39 }
 0x129   : > { %935 = vxpose.xlu1.b32.start.end [1/1] (short) (narrow) %v658_v8, 16  ;;  %v766_v43 = vsel %vm551_vm0, %v746_v40, %v765_v42 }
 0x12b   : > { %903 = vxpose.xlu0.b32.start.end [1/1] (short) (narrow) %v656_v34, 16  ;;  %807 = vxpose.xlu2.b32.start.end [1/1] (short) (narrow) %v650_v7, 16 }
 0x139   : > { %1031 = vxpose.xlu1.b32.start.end [1/1] (short) (narrow) %v760_v32, 16 }
 0x13b   : > { %999 = vxpose.xlu0.b32.start.end [1/1] (short) (narrow) %v662_v35, 16  ;;  %967 = vxpose.xlu2.b32.start.end [1/1] (short) (narrow) %v660_v36, 16 }
 0x149   : > { %1127 = vxpose.xlu1.b32.start.end [1/1] (short) (narrow) %v766_v43, 16 }
 0x14b   : > { %1095 = vxpose.xlu0.b32.start.end [1/1] (short) (narrow) %v764_v46, 16  ;;  %1063 = vxpose.xlu2.b32.start.end [1/1] (short) (narrow) %v762_v16, 16 }
 0x159   : > { %1223 = vxpose.xlu1.b32.start.end [1/1] (short) (narrow) %v772_v56, 16 }
 0x15b   : > { %1191 = vxpose.xlu0.b32.start.end [1/1] (short) (narrow) %v770_v57, 16  ;;  %1159 = vxpose.xlu2.b32.start.end [1/1] (short) (narrow) %v768_v59, 16 }
 0x16b   : > { %1255 = vxpose.xlu2.b32.start.end [1/1] (short) (narrow) %v7014_v51, 16 }
 0x1b4   : > { %v791_v47 = vpop.trf.xlu2 }
 0x1b5   : > { %v1289_v51 = vrot.slane %v791_v47, 4 }
 0x1bc   : > { %v792_v44 = vpop.trf.xlu2 }
 0x1bd   : > { %v887_v48 = vpop.trf.xlu1  ;;  %v1513_v7 = vrot.slane %v792_v44, 4 }
 0x1be   : > { %v1299_v58 = vrot.slane %v887_v48, 4 }
 0x1bf   : > { %v855_v49 = vpop.trf.xlu0 }
 0x1c0   : > { %v1287_v54 = vrot.slane %v855_v49, 4  ;;  %v1290_v3 = vsel %vm551_vm0, %v855_v49, %v1289_v51 }
 0x1c1   : > { %v1298_v9 = vperm.slane %v1290_v3, %v6948_v28 }
 0x1c2   : > { %v1288_v60 = vsel %vm551_vm0, %v1287_v54, %v791_v47 }
 0x1c3   : > { %v1294_v0 = vperm.slane %v1288_v60, %v6948_v28  ;;  %v1349_v18 = vrot.slane %v1298_v9, 4 }
 0x1c4   : > { %v823_v50 = vpop.trf.xlu2 }
 0x1c5   : > { %v888_v52 = vpop.trf.xlu1  ;;  %v1301_v62 = vrot.slane %v823_v50, 4  ;;  %v1300_v56 = vsel %vm551_vm0, %v1299_v58, %v823_v50  ;;  %v1337_v8 = vrot.slane %v1294_v0, 4 }
 0x1c6   : > { %v1523_v1 = vrot.slane %v888_v52, 4  ;;  %v1306_v5 = vperm.slane %v1300_v56, %v6948_v28 }
 0x1c7   : > { %v856_v55 = vpop.trf.xlu0  ;;  %v1302_v4 = vsel %vm551_vm0, %v887_v48, %v1301_v62 }
 0x1c8   : > { %v1511_v59 = vrot.slane %v856_v55, 4  ;;  %v1310_v10 = vperm.slane %v1302_v4, %v6948_v28  ;;  %v1335_v11 = vrot.slane %v1306_v5, 4  ;;  %v1338_v19 = vsel %vm551_vm0, %v1306_v5, %v1337_v8 }
 0x1c9   : > { %v1514_v15 = vsel %vm551_vm0, %v856_v55, %v1513_v7  ;;  %v7082_v20 = vperm.slane %v1338_v19, %v6976_v61 }
 0x1ca   : > { %v1512_v53 = vsel %vm551_vm0, %v1511_v59, %v792_v44  ;;  %v1347_v21 = vrot.slane %v1310_v10, 4  ;;  %v1336_v30 = vsel %vm551_vm0, %v1335_v11, %v1294_v0  ;;  %v1350_v31 = vsel %vm551_vm0, %v1310_v10, %v1349_v18 }
 0x1cb   : > { %v1518_v33 = vperm.slane %v1512_v53, %v6948_v28  ;;  %v1522_v32 = vperm.slane %v1514_v15, %v6948_v28  ;;  %v7088_v37 = vperm.slane %v1336_v30, %v6976_v61  ;;  %v1358_v39 = vperm.slane %v1350_v31, %v6976_v61 }
 0x1cc   : > { %v824_v63 = vpop.trf.xlu2  ;;  %v1348_v23 = vsel %vm551_vm0, %v1347_v21, %v1298_v9  ;;  %v1389_v40 = vrot.slane %v7082_v20, 4 }
 0x1cd   : > { %v7063_v57 = vpop.trf.xlu1  ;;  %v1525_v6 = vrot.slane %v824_v63, 4  ;;  %v1524_v34 = vsel %vm551_vm0, %v1523_v1, %v824_v63  ;;  %v1561_v25 = vrot.slane %v1518_v33, 4  ;;  %v1573_v41 = vrot.slane %v1522_v32, 4 }
 0x1ce   : > { %v1530_v22 = vperm.slane %v1524_v34, %v6948_v28  ;;  %v7099_v47 = vperm.slane %v1348_v23, %v6976_v61  ;;  %v1325_v48 = vrot.slane %v7063_v57, 4  ;;  %v1385_v50 = vrot.slane %v7088_v37, 4 }
 0x1cf   : > { %v919_v2 = vpop.trf.xlu0  ;;  %v1526_v12 = vsel %vm551_vm0, %v888_v52, %v1525_v6  ;;  %v1397_v60 = vrot.slane %v1358_v39, 4 }
 0x1d0   : > { %v1313_v17 = vrot.slane %v919_v2, 4  ;;  %v1534_v24 = vperm.slane %v1526_v12, %v6948_v28  ;;  %v1559_v35 = vrot.slane %v1530_v22, 4  ;;  %v1562_v43 = vsel %vm551_vm0, %v1530_v22, %v1561_v25 }
 0x1d1   : > { %v7108_v62 = vperm.slane %v1562_v43, %v6976_v61  ;;  %v1393_v10 = vrot.slane %v7099_v47, 4 }
 0x1d2   : > { %v1571_v26 = vrot.slane %v1534_v24, 4  ;;  %v1560_v44 = vsel %vm551_vm0, %v1559_v35, %v1518_v33  ;;  %v1574_v54 = vsel %vm551_vm0, %v1534_v24, %v1573_v41 }
 0x1d3   : > { %v7112_v56 = vperm.slane %v1560_v44, %v6976_v61  ;;  %v7120_v3 = vperm.slane %v1574_v54, %v6976_v61  ;;  %v1613_v34 = vrot.slane %v7108_v62, 4 }
 0x1d4   : > { %v983_v13 = vpop.trf.xlu2  ;;  %v1572_v52 = vsel %vm551_vm0, %v1571_v26, %v1522_v32 }
 0x1d5   : > { %v7075_v14 = vpop.trf.xlu1  ;;  %v1311_v27 = vrot.slane %v983_v13, 4  ;;  %v1314_v36 = vsel %vm551_vm0, %v983_v13, %v1313_v17  ;;  %v1609_v13 = vrot.slane %v7112_v56, 4  ;;  %v1621_v22 = vrot.slane %v7120_v3, 4 }
 0x1d6   : > { %v1322_v45 = vperm.slane %v1314_v36, %v6948_v28 }
 0x1d7   : > { %v920_v29 = vpop.trf.xlu0  ;;  %v1312_v38 = vsel %vm551_vm0, %v1311_v27, %v919_v2  ;;  %v7117_v2 = vperm.slane %v1572_v52, %v6976_v61  ;;  %v1549_v27 = vrot.slane %v7075_v14, 4 }
 0x1d8   : > { %v1537_v46 = vrot.slane %v920_v29, 4  ;;  %v1318_v49 = vperm.slane %v1312_v38, %v6948_v28  ;;  %v1373_v51 = vrot.slane %v1322_v45, 4 }
 0x1d9   : > { %v1617_v24 = vrot.slane %v7117_v2, 4 }
 0x1da   : > { %v1361_v4 = vrot.slane %v1318_v49, 4 }
 0x1dc   : > { %v984_v42 = vpop.trf.xlu2 }
 0x1dd   : > { %v7096_v16 = vpop.trf.xlu1  ;;  %v1535_v55 = vrot.slane %v984_v42, 4  ;;  %v1538_v59 = vsel %vm551_vm0, %v984_v42, %v1537_v46 }
 0x1de   : > { %v1546_v7 = vperm.slane %v1538_v59, %v6948_v28  ;;  %v1401_v25 = vrot.slane %v7096_v16, 4 }
 0x1df   : > { %v1015_v58 = vpop.trf.xlu0  ;;  %v1536_v6 = vsel %vm551_vm0, %v1535_v55, %v920_v29 }
 0x1e0   : > { %v1323_v63 = vrot.slane %v1015_v58, 4  ;;  %v1326_v0 = vsel %vm551_vm0, %v1015_v58, %v1325_v48  ;;  %v1542_v17 = vperm.slane %v1536_v6, %v6948_v28  ;;  %v1597_v32 = vrot.slane %v1546_v7, 4 }
 0x1e1   : > { %v1334_v1 = vperm.slane %v1326_v0, %v6948_v28 }
 0x1e2   : > { %v1324_v5 = vsel %vm551_vm0, %v1323_v63, %v7063_v57  ;;  %v1585_v41 = vrot.slane %v1542_v17, 4 }
 0x1e3   : > { %v1330_v8 = vperm.slane %v1324_v5, %v6948_v28  ;;  %v1371_v53 = vrot.slane %v1334_v1, 4  ;;  %v1374_v9 = vsel %vm551_vm0, %v1334_v1, %v1373_v51 }
 0x1e4   : > { %v1382_v11 = vperm.slane %v1374_v9, %v6976_v61  ;;  %v1079_v12 = vpop.trf.xlu2 }
 0x1e5   : > { %v1359_v19 = vrot.slane %v1330_v8, 4  ;;  %v1362_v57 = vsel %vm551_vm0, %v1330_v8, %v1361_v4  ;;  %v1372_v33 = vsel %vm551_vm0, %v1371_v53, %v1322_v45  ;;  %v7134_v15 = vpop.trf.xlu1  ;;  %v1413_v45 = vrot.slane %v1079_v12, 4 }
 0x1e6   : > { %v1378_v18 = vperm.slane %v1372_v33, %v6976_v61  ;;  %v1395_v21 = vrot.slane %v1382_v11, 4  ;;  %v1370_v30 = vperm.slane %v1362_v57, %v6976_v61  ;;  %v7146_v36 = vsel %vm551_vm0, %v1382_v11, %v1397_v60 }
 0x1e7   : > { %v1360_v29 = vsel %vm551_vm0, %v1359_v19, %v1318_v49  ;;  %v1016_v31 = vpop.trf.xlu0  ;;  %v1771_v48 = vrot.slane %v7146_v36, 4  ;;  %v1625_v49 = vrot.slane %v7134_v15, 4 }
 0x1e8   : > { %v1366_v35 = vperm.slane %v1360_v29, %v6976_v61  ;;  %v1391_v23 = vrot.slane %v1378_v18, 4  ;;  %v7149_v26 = vsel %vm551_vm0, %v1378_v18, %v1393_v10  ;;  %v1547_v38 = vrot.slane %v1016_v31, 4 }
 0x1e9   : > { %v1550_v42 = vsel %vm551_vm0, %v1016_v31, %v1549_v27  ;;  %v7153_v43 = vsel %vm551_vm0, %v1395_v21, %v1358_v39  ;;  %v1387_v44 = vrot.slane %v1370_v30, 4  ;;  %v1773_v54 = vrot.slane %v7149_v26, 4 }
 0x1ea   : > { %v1558_v46 = vperm.slane %v1550_v42, %v6948_v28  ;;  %v1548_v52 = vsel %vm551_vm0, %v1547_v38, %v7075_v14  ;;  %v1383_v39 = vrot.slane %v1366_v35, 4  ;;  %v7165_v63 = vsel %vm551_vm0, %v1391_v23, %v7099_v47 }
 0x1eb   : > { %v1554_v55 = vperm.slane %v1548_v52, %v6948_v28  ;;  %v1759_v0 = vrot.slane %v7153_v43, 4  ;;  %v7177_v47 = vsel %vm551_vm0, %v1387_v44, %v7082_v20  ;;  %v1761_v57 = vrot.slane %v7165_v63, 4 }
 0x1ec   : > { %v1595_v58 = vrot.slane %v1558_v46, 4  ;;  %v1598_v60 = vsel %vm551_vm0, %v1558_v46, %v1597_v32  ;;  %v1080_v59 = vpop.trf.xlu2  ;;  %v1735_v23 = vrot.slane %v7177_v47, 4 }
 0x1ed   : > { %v1606_v51 = vperm.slane %v1598_v60, %v6976_v61  ;;  %v1143_v1 = vpop.trf.xlu1  ;;  %v1583_v4 = vrot.slane %v1554_v55, 4  ;;  %v1586_v14 = vsel %vm551_vm0, %v1554_v55, %v1585_v41  ;;  %v1637_v32 = vrot.slane %v1080_v59, 4 }
 0x1ee   : > { %v1596_v5 = vsel %vm551_vm0, %v1595_v58, %v1546_v7  ;;  %v1411_v6 = vrot.slane %v1143_v1, 4  ;;  %v7172_v8 = vperm.slane %v1586_v14, %v6976_v61  ;;  %v1414_v7 = vsel %vm551_vm0, %v1143_v1, %v1413_v45 }
 0x1ef   : > { %v1602_v53 = vperm.slane %v1596_v5, %v6976_v61  ;;  %v1619_v9 = vrot.slane %v1606_v51, 4  ;;  %v1584_v10 = vsel %vm551_vm0, %v1583_v4, %v1542_v17  ;;  %v7181_v11 = vsel %vm551_vm0, %v1606_v51, %v1621_v22  ;;  %v1111_v27 = vpop.trf.xlu0 }
 0x1f0   : > { %v1412_v19 = vsel %vm551_vm0, %v1411_v6, %v1079_v12  ;;  %v7187_v33 = vperm.slane %v1584_v10, %v6976_v61  ;;  %v1422_v22 = vperm.slane %v1414_v7, %v6948_v28  ;;  %v7198_v12 = vsel %vm551_vm0, %v1383_v39, %v7088_v37 }
 0x1f1   : > { %v1615_v18 = vrot.slane %v1602_v53, 4  ;;  %v7190_v21 = vsel %vm551_vm0, %v1602_v53, %v1617_v24  ;;  %v7193_v29 = vperm.slane %v1412_v19, %v6948_v28  ;;  %v7203_v17 = vsel %vm551_vm0, %v1366_v35, %v1385_v50 }
 0x1f2   : > { %v1883_v31 = vrot.slane %v7181_v11, 4  ;;  %v7209_v24 = vsel %vm551_vm0, %v1370_v30, %v1389_v40  ;;  %v1611_v38 = vrot.slane %v7172_v8, 4  ;;  %v7215_v42 = vsel %vm551_vm0, %v1619_v9, %v7120_v3 }
 0x1f3   : > { %v1885_v37 = vrot.slane %v7190_v21, 4  ;;  %v1459_v50 = vrot.slane %v1422_v22, 4  ;;  %v1607_v35 = vrot.slane %v7187_v33, 4  ;;  %v7221_v41 = vsel %vm551_vm0, %v1615_v18, %v7117_v2 }
 0x1f4   : > { %v1399_v20 = vrot.slane %v1111_v27, 4  ;;  %v1402_v40 = vsel %vm551_vm0, %v1111_v27, %v1401_v25  ;;  %v1447_v45 = vrot.slane %v7193_v29, 4  ;;  %v7229_v55 = vpop.trf.xlu2  ;;  %v1736_v2 = vsel %vm551_vm0, %v1735_v23, %v7198_v12 }
 0x1f5   : > { %v1144_v30 = vpop.trf.xlu1  ;;  %v1410_v46 = vperm.slane %v1402_v40, %v6948_v28  ;;  %v1747_v25 = vrot.slane %v7209_v24, 4  ;;  %v1871_v4 = vrot.slane %v7215_v42, 4  ;;  %v1873_v14 = vrot.slane %v7221_v41, 4 }
 0x1f6   : > { %v1635_v44 = vrot.slane %v1144_v30, 4  ;;  %v1638_v3 = vsel %vm551_vm0, %v1144_v30, %v1637_v32  ;;  %v1400_v52 = vsel %vm551_vm0, %v1399_v20, %v7096_v16  ;;  %v7244_v16 = vsel %vm551_vm0, %v7187_v33, %v1609_v13 }
 0x1f7   : > { %v7232_v58 = vperm.slane %v1638_v3, %v6948_v28  ;;  %v1406_v60 = vperm.slane %v1400_v52, %v6948_v28  ;;  %v1460_v39 = vsel %vm551_vm0, %v1459_v50, %v1410_v46  ;;  %v1461_v51 = vrot.slane %v1410_v46, 4  ;;  %v1112_v18 = vpop.trf.xlu0 }
 0x1f8   : > { %v1636_v1 = vsel %vm551_vm0, %v1635_v44, %v1080_v59  ;;  %v1748_v5 = vsel %vm551_vm0, %v1747_v25, %v7203_v17  ;;  %v7252_v6 = vsel %vm551_vm0, %v7181_v11, %v1885_v37  ;;  %v1425_v59 = vrot.slane %v7229_v55, 4 }
 0x1f9   : > { %v1448_v53 = vsel %vm551_vm0, %v1447_v45, %v1406_v60  ;;  %v1742_v9 = vperm.slane %v1736_v2, %v6948_v28  ;;  %v7258_v13 = vperm.slane %v1460_v39, %v6976_v61  ;;  %v1642_v10 = vperm.slane %v1636_v1, %v6948_v28 }
 0x1fa   : > { %v1683_v19 = vrot.slane %v7232_v58, 4  ;;  %v1737_v7 = vrot.slane %v7198_v12, 4  ;;  %v1462_v27 = vsel %vm551_vm0, %v1422_v22, %v1461_v51  ;;  %v1754_v32 = vperm.slane %v1748_v5, %v6948_v28 }
 0x1fb   : > { %v1760_v23 = vsel %vm551_vm0, %v1759_v0, %v7165_v63  ;;  %v1772_v37 = vsel %vm551_vm0, %v1771_v48, %v7149_v26  ;;  %v1449_v50 = vrot.slane %v1406_v60, 4  ;;  %v7274_v20 = vperm.slane %v1448_v53, %v6976_v61 }
 0x1fc   : > { %v1749_v40 = vrot.slane %v7203_v17, 4  ;;  %v1766_v22 = vperm.slane %v1760_v23, %v6948_v28  ;;  %v1778_v30 = vperm.slane %v1772_v37, %v6948_v28  ;;  %v1785_v45 = vrot.slane %v1742_v9, 4  ;;  %v7308_v37 = vpop.trf.xlu2 }
 0x1fd   : > { %v1783_v46 = vrot.slane %v1754_v32, 4  ;;  %v1623_v44 = vrot.slane %v1112_v18, 4  ;;  %v7280_v0 = vperm.slane %v1462_v27, %v6976_v61  ;;  %v1671_v3 = vrot.slane %v1642_v10, 4  ;;  %v1239_v51 = vpop.trf.xlu1 }
 0x1fe   : > { %v1809_v52 = vrot.slane %v1766_v22, 4  ;;  %v1626_v48 = vsel %vm551_vm0, %v1112_v18, %v1625_v49  ;;  %v1786_v2 = vsel %vm551_vm0, %v1754_v32, %v1785_v45  ;;  %v1807_v60 = vrot.slane %v1778_v30, 4 }
 0x1ff   : > { %v1784_v25 = vsel %vm551_vm0, %v1783_v46, %v1742_v9  ;;  %v1624_v39 = vsel %vm551_vm0, %v1623_v44, %v7134_v15  ;;  %v1450_v1 = vsel %vm551_vm0, %v7193_v29, %v1449_v50  ;;  %v7297_v49 = vperm.slane %v1786_v2, %v6976_v61 }
 0x200   : > { %v1810_v5 = vsel %vm551_vm0, %v1778_v30, %v1809_v52  ;;  %v7293_v53 = vperm.slane %v1784_v25, %v6976_v61  ;;  %v1630_v27 = vperm.slane %v1624_v39, %v6948_v28  ;;  %v1808_v18 = vsel %vm551_vm0, %v1807_v60, %v1766_v22 }
 0x201   : > { %v7300_v9 = vperm.slane %v1810_v5, %v6976_v61  ;;  %v1634_v15 = vperm.slane %v1626_v48, %v6948_v28  ;;  %v7305_v32 = vperm.slane %v1808_v18, %v6976_v61  ;;  %v1423_v50 = vrot.slane %v1239_v51, 4 }
 0x202   : > { %v1833_v29 = vrot.slane %v7293_v53, 4  ;;  %v1673_v23 = vrot.slane %v1630_v27, 4  ;;  %v1505_v30 = vrot.slane %v7258_v13, 4  ;;  %v1672_v46 = vsel %vm551_vm0, %v1671_v3, %v1630_v27 }
 0x203   : > { %v1835_v45 = vrot.slane %v7300_v9, 4  ;;  %v1685_v44 = vrot.slane %v1634_v15, 4  ;;  %v7314_v22 = vperm.slane %v1450_v1, %v6976_v61  ;;  %v1684_v2 = vsel %vm551_vm0, %v1683_v19, %v1634_v15 }
 0x204   : > { %v1834_v52 = vsel %vm551_vm0, %v7305_v32, %v1833_v29  ;;  %v1674_v48 = vsel %vm551_vm0, %v1642_v10, %v1673_v23  ;;  %v1497_v25 = vrot.slane %v7274_v20, 4  ;;  %v1509_v60 = vrot.slane %v7280_v0, 4 }
 0x205   : > { %v1836_v39 = vsel %vm551_vm0, %v1835_v45, %v7297_v49  ;;  %2185 = vrot.lane.b32.xlu0 %v1834_v52, %s6730_s24  ;;  %v1686_v3 = vsel %vm551_vm0, %v7232_v58, %v1685_v44  ;;  %v7329_v10 = vperm.slane %v1672_v46, %v6976_v61  ;;  %v1649_v19 = vrot.slane %v7308_v37, 4 }
 0x206   : > { %2193 = vrot.lane.b32.xlu2 %v1836_v39, %s6731_s26  ;;  %v1424_v1 = vsel %vm551_vm0, %v1423_v50, %v7229_v55  ;;  %v1426_v5 = vsel %vm551_vm0, %v1239_v51, %v1425_v59  ;;  %v7336_v27 = vperm.slane %v1674_v48, %v6976_v61  ;;  %v7339_v18 = vperm.slane %v1684_v2, %v6976_v61  ;;  %v1271_v39 = vpop.trf.xlu2 }
 0x207   : > { %v7342_v58 = vperm.slane %v1424_v1, %v6948_v28  ;;  %v1608_v15 = vsel %vm551_vm0, %v1607_v35, %v7112_v56  ;;  %v7349_v29 = vperm.slane %v1686_v3, %v6976_v61  ;;  %v1612_v55 = vsel %vm551_vm0, %v1611_v38, %v7108_v62 }
 0x208   : > { %v1614_v59 = vsel %vm551_vm0, %v7172_v8, %v1613_v34  ;;  %v1849_v51 = vrot.slane %v1608_v15, 4  ;;  %v7360_v23 = vperm.slane %v1426_v5, %v6948_v28  ;;  %v1847_v56 = vrot.slane %v1612_v55, 4  ;;  %v1207_v8 = vpop.trf.xlu0 }
 0x209   : > { %v1473_v33 = vrot.slane %v7342_v58, 4  ;;  %v1859_v35 = vrot.slane %v1614_v59, 4  ;;  %v1861_v45 = vrot.slane %v7244_v16, 4  ;;  %v1874_v62 = vsel %vm551_vm0, %v7215_v42, %v1873_v14 }
 0x20a   : > { %v1850_v50 = vsel %vm551_vm0, %v1612_v55, %v1849_v51  ;;  %v7371_v34 = vperm.slane %v7252_v6, %v6948_v28  ;;  %v7377_v46 = vperm.slane %v1874_v62, %v6948_v28  ;;  %v1848_v44 = vsel %vm551_vm0, %v1847_v56, %v1608_v15 }
 0x20b   : > { %v7374_v38 = vperm.slane %v1850_v50, %v6948_v28  ;;  %v1860_v52 = vsel %vm551_vm0, %v1859_v35, %v7244_v16  ;;  %v1862_v48 = vsel %vm551_vm0, %v1614_v59, %v1861_v45  ;;  %v1854_v2 = vperm.slane %v1848_v44, %v6948_v28 }
 0x20c   : > { %v1931_v14 = vrot.slane %v7371_v34, 4  ;;  %v1866_v6 = vperm.slane %v1860_v52, %v6948_v28  ;;  %v7387_v3 = vperm.slane %v1862_v48, %v6948_v28  ;;  %v1872_v1 = vsel %vm551_vm0, %v1871_v4, %v7221_v41 }
 0x20d   : > { %v1884_v16 = vsel %vm551_vm0, %v1883_v31, %v7190_v21  ;;  %v1437_v5 = vrot.slane %v1207_v8, 4  ;;  %v1878_v55 = vperm.slane %v1872_v1, %v6948_v28  ;;  %v1897_v41 = vrot.slane %v1854_v2, 4 }
 0x20e   : > { %v1932_v15 = vsel %vm551_vm0, %v1931_v14, %v7377_v46  ;;  %v1890_v59 = vperm.slane %v1884_v16, %v6948_v28  ;;  %v1895_v51 = vrot.slane %v1866_v6, 4  ;;  %v1907_v56 = vrot.slane %v7387_v3, 4 }
 0x20f   : > { %v7403_v42 = vperm.slane %v1932_v15, %v6976_v61  ;;  %v1435_v4 = vrot.slane %v1271_v39, 4  ;;  %v1921_v21 = vrot.slane %v1878_v55, 4  ;;  %v1438_v31 = vsel %vm551_vm0, %v1271_v39, %v1437_v5  ;;  %v1240_v39 = vpop.trf.xlu1 }
 0x210   : > { %v1896_v11 = vsel %vm551_vm0, %v1895_v51, %v1854_v2  ;;  %v1919_v35 = vrot.slane %v1890_v59, 4  ;;  %v1908_v50 = vsel %vm551_vm0, %v1907_v56, %v7374_v38  ;;  %v1898_v44 = vsel %vm551_vm0, %v1866_v6, %v1897_v41 }
 0x211   : > { %v1951_v45 = vrot.slane %v7403_v42, 4  ;;  %v7411_v62 = vperm.slane %v1896_v11, %v6976_v61  ;;  %v7415_v52 = vperm.slane %v1908_v50, %v6976_v61  ;;  %v7419_v14 = vperm.slane %v1898_v44, %v6976_v61 }
 0x212   : > { %v1920_v48 = vsel %vm551_vm0, %v1919_v35, %v1878_v55  ;;  %v1922_v2 = vsel %vm551_vm0, %v1890_v59, %v1921_v21  ;;  %v1436_v6 = vsel %vm551_vm0, %v1435_v4, %v1207_v8  ;;  %v1446_v56 = vperm.slane %v1438_v31, %v6948_v28 }
 0x213   : > { %v7423_v1 = vperm.slane %v1920_v48, %v6976_v61  ;;  %v1945_v16 = vrot.slane %v7411_v62, 4  ;;  %v1930_v5 = vperm.slane %v1922_v2, %v6976_v61  ;;  %v1952_v15 = vsel %vm551_vm0, %v1951_v45, %v7415_v52 }
 0x214   : > { %v1949_v55 = vrot.slane %v7419_v14, 4  ;;  %v1442_v51 = vperm.slane %v1436_v6, %v6948_v28  ;;  %v1485_v59 = vrot.slane %v7360_v23, 4  ;;  %2211 = vrot.lane.b32.xlu0 %v1952_v15, %s6732_s12  ;;  %v1647_v11 = vrot.slane %v1240_v39, 4 }
 0x215   : > { %v1946_v41 = vsel %vm551_vm0, %v7423_v1, %v1945_v16  ;;  %v1650_v8 = vsel %vm551_vm0, %v1240_v39, %v1649_v19  ;;  %v1483_v31 = vrot.slane %v1446_v56, 4  ;;  %v1501_v16 = vrot.slane %v7314_v22, 4 }
 0x216   : > { %2187 = vrot.lane.b32.xlu1 %v1946_v41, %s6730_s24  ;;  %v1950_v4 = vsel %vm551_vm0, %v1930_v5, %v1949_v55  ;;  %v1471_v35 = vrot.slane %v1442_v51, 4  ;;  %v1474_v21 = vsel %vm551_vm0, %v1442_v51, %v1473_v33  ;;  %v1486_v45 = vsel %vm551_vm0, %v1446_v56, %v1485_v59 }
 0x217   : > { %2203 = vrot.lane.b32.xlu2 %v1950_v4, %s6733_s7  ;;  %v7445_v50 = vperm.slane %v1474_v21, %v6976_v61  ;;  %v1648_v44 = vsel %vm551_vm0, %v1647_v11, %v7308_v37  ;;  %v7451_v19 = vperm.slane %v1650_v8, %v6948_v28  ;;  %v1484_v33 = vsel %vm551_vm0, %v1483_v31, %v7360_v23  ;;  %v1208_v8 = vpop.trf.xlu0 }
 0x218   : > { %v1472_v48 = vsel %vm551_vm0, %v1471_v35, %v7342_v58  ;;  %v7458_v2 = vperm.slane %v1486_v45, %v6976_v61  ;;  %v1654_v39 = vperm.slane %v1648_v44, %v6948_v28  ;;  %v1721_v6 = vrot.slane %v7329_v10, 4  ;;  %v1272_v45 = vpop.trf.xlu2 }
 0x219   : > { %v7464_v37 = vperm.slane %v1472_v48, %v6976_v61  ;;  %v7467_v15 = vperm.slane %v1484_v33, %v6976_v61  ;;  %v1725_v58 = vrot.slane %v7336_v27, 4  ;;  %v1729_v55 = vrot.slane %v7339_v18, 4 }
 0x21a   : > { %v1733_v23 = vrot.slane %v7349_v29, 4  ;;  %v1499_v51 = vrot.slane %v7445_v50, 4  ;;  %v7475_v56 = vsel %vm551_vm0, %v7445_v50, %v1501_v16  ;;  %v1507_v59 = vrot.slane %v7458_v2, 4 }
 0x21b   : > { %v7482_v41 = vsel %vm551_vm0, %v7458_v2, %v1509_v60  ;;  %v1697_v11 = vrot.slane %v1654_v39, 4  ;;  %v1495_v4 = vrot.slane %v7464_v37, 4  ;;  %v1709_v35 = vrot.slane %v7451_v19, 4 }
 0x21c   : > { %v1738_v21 = vsel %vm551_vm0, %v7177_v47, %v1737_v7  ;;  %v1750_v31 = vsel %vm551_vm0, %v7209_v24, %v1749_v40  ;;  %v7498_v60 = vsel %vm551_vm0, %v7467_v15, %v1505_v30  ;;  %v1762_v47 = vsel %vm551_vm0, %v7153_v43, %v1761_v57 }
 0x21d   : > { %v1746_v44 = vperm.slane %v1738_v21, %v6948_v28  ;;  %v1758_v48 = vperm.slane %v1750_v31, %v6948_v28  ;;  %v1770_v12 = vperm.slane %v1762_v47, %v6948_v28  ;;  %v1774_v17 = vsel %vm551_vm0, %v7146_v36, %v1773_v54 }
 0x21e   : > { %v1947_v24 = vrot.slane %v1930_v5, 4  ;;  %v1661_v7 = vrot.slane %v1208_v8, 4  ;;  %v1782_v40 = vperm.slane %v1774_v17, %v6948_v28  ;;  %v1659_v2 = vrot.slane %v1272_v45, 4 }
 0x21f   : > { %v1797_v30 = vrot.slane %v1746_v44, 4  ;;  %v1795_v33 = vrot.slane %v1758_v48, 4  ;;  %v1821_v16 = vrot.slane %v1770_v12, 4  ;;  %v1909_v57 = vrot.slane %v7374_v38, 4 }
 0x220   : > { %v1948_v63 = vsel %vm551_vm0, %v1947_v24, %v7419_v14  ;;  %v1662_v43 = vsel %vm551_vm0, %v1272_v45, %v1661_v7  ;;  %v1819_v54 = vrot.slane %v1782_v40, 4  ;;  %v1660_v5 = vsel %vm551_vm0, %v1659_v2, %v1208_v8 }
 0x221   : > { %v1798_v26 = vsel %vm551_vm0, %v1758_v48, %v1797_v30  ;;  %2195 = vrot.lane.b32.xlu1 %v1948_v63, %s6731_s26  ;;  %v1796_v36 = vsel %vm551_vm0, %v1795_v33, %v1746_v44  ;;  %v1822_v31 = vsel %vm551_vm0, %v1782_v40, %v1821_v16  ;;  %v1666_v45 = vperm.slane %v1660_v5, %v6948_v28 }
 0x222   : > { %v7521_v21 = vperm.slane %v1798_v26, %v6976_v61  ;;  %v7525_v14 = vperm.slane %v1796_v36, %v6976_v61  ;;  %v7529_v38 = vperm.slane %v1822_v31, %v6976_v61  ;;  %v1820_v48 = vsel %vm551_vm0, %v1819_v54, %v1770_v12 }
 0x223   : > { %v1670_v44 = vperm.slane %v1662_v43, %v6948_v28  ;;  %v1910_v8 = vsel %vm551_vm0, %v7387_v3, %v1909_v57  ;;  %v1826_v47 = vperm.slane %v1820_v48, %v6976_v61  ;;  %v1695_v24 = vrot.slane %v1666_v45, 4 }
 0x224   : > { %v1841_v17 = vrot.slane %v7525_v14, 4  ;;  %v1698_v7 = vsel %vm551_vm0, %v1666_v45, %v1697_v11  ;;  %v1843_v40 = vrot.slane %v7529_v38, 4  ;;  %v1918_v63 = vperm.slane %v1910_v8, %v6976_v61 }
 0x225   : > { %v7540_v30 = vperm.slane %v1698_v7, %v6976_v61  ;;  %v1707_v33 = vrot.slane %v1670_v44, 4  ;;  %v1710_v12 = vsel %vm551_vm0, %v1670_v44, %v1709_v35  ;;  %v1696_v16 = vsel %vm551_vm0, %v1695_v24, %v1654_v39 }
 0x226   : > { %v1842_v2 = vsel %vm551_vm0, %v1826_v47, %v1841_v17  ;;  %v1718_v3 = vperm.slane %v1710_v12, %v6976_v61  ;;  %v1503_v43 = vrot.slane %v7467_v15, 4  ;;  %v7550_v11 = vsel %vm551_vm0, %v1507_v59, %v7280_v0 }
 0x227   : > { %v1844_v57 = vsel %vm551_vm0, %v1843_v40, %v7521_v21  ;;  %2217 = vrot.lane.b32.xlu2 %v1842_v2, %s6734_s8  ;;  %v1708_v35 = vsel %vm551_vm0, %v1707_v33, %v7451_v19  ;;  %v1702_v39 = vperm.slane %v1696_v16, %v6976_v61  ;;  %v1933_v0 = vrot.slane %v7377_v46, 4 }
 0x228   : > { %2225 = vrot.lane.b32.xlu0 %v1844_v57, %s6735_s10  ;;  %v1714_v15 = vperm.slane %v1708_v35, %v6976_v61  ;;  %v1731_v26 = vrot.slane %v1718_v3, 4  ;;  %v1995_v59 = vrot.slane %v7482_v41, 4  ;;  %v1997_v36 = vrot.slane %v7498_v60, 4 }
 0x229   : > { %v7566_v54 = vsel %vm551_vm0, %v1718_v3, %v1733_v23  ;;  %v1837_v19 = vrot.slane %v7297_v49, 4  ;;  %v1983_v5 = vrot.slane %v7550_v11, 4  ;;  %v1723_v31 = vrot.slane %v7540_v30, 4 }
 0x22a   : > { %v1934_v45 = vsel %vm551_vm0, %v7371_v34, %v1933_v0  ;;  %v1957_v48 = vrot.slane %v1918_v63, 4  ;;  %v1727_v46 = vrot.slane %v1714_v15, 4  ;;  %v7575_v44 = vsel %vm551_vm0, %v1731_v26, %v7349_v29 }
 0x22b   : > { %v1942_v8 = vperm.slane %v1934_v45, %v6976_v61  ;;  %v1838_v23 = vsel %vm551_vm0, %v7300_v9, %v1837_v19  ;;  %v1719_v17 = vrot.slane %v1702_v39, 4  ;;  %v2107_v49 = vrot.slane %v7566_v54, 4 }
 0x22c   : > { %2201 = vrot.lane.b32.xlu1 %v1838_v23, %s6733_s7  ;;  %v1839_v24 = vrot.slane %v1826_v47, 4  ;;  %v7586_v34 = vsel %vm551_vm0, %v1495_v4, %v7274_v20  ;;  %v7592_v29 = vsel %vm551_vm0, %v7464_v37, %v1497_v25  ;;  %v7598_v9 = vsel %vm551_vm0, %v1499_v51, %v7314_v22 }
 0x22d   : > { %v1955_v7 = vrot.slane %v1942_v8, 4  ;;  %v7602_v47 = vsel %vm551_vm0, %v1503_v43, %v7258_v13  ;;  %v7607_v4 = vsel %vm551_vm0, %v1714_v15, %v1729_v55  ;;  %v2095_v20 = vrot.slane %v7575_v44, 4 }
 0x22e   : > { %v1959_v25 = vrot.slane %v7598_v9, 4  ;;  %v1971_v37 = vrot.slane %v7475_v56, 4  ;;  %v7614_v50 = vsel %vm551_vm0, %v1727_v46, %v7339_v18  ;;  %v1958_v22 = vsel %vm551_vm0, %v1942_v8, %v1957_v48 }
 0x22f   : > { %v1956_v13 = vsel %vm551_vm0, %v1955_v7, %v1918_v63  ;;  %v1984_v51 = vsel %vm551_vm0, %v1983_v5, %v7602_v47  ;;  %v1840_v55 = vsel %vm551_vm0, %v1839_v24, %v7525_v14  ;;  %v1961_v18 = vrot.slane %v7586_v34, 4 }
 0x230   : > { %2235 = vrot.lane.b32.xlu0 %v1958_v22, %s6736_s5  ;;  %2227 = vrot.lane.b32.xlu2 %v1956_v13, %s6735_s10  ;;  %v1960_v40 = vsel %vm551_vm0, %v1959_v25, %v7586_v34  ;;  %v1972_v33 = vsel %vm551_vm0, %v1971_v37, %v7592_v29  ;;  %v1973_v2 = vrot.slane %v7592_v29, 4  ;;  %v1996_v3 = vsel %vm551_vm0, %v1995_v59, %v7498_v60 }
 0x231   : > { %v7630_v12 = vperm.slane %v1960_v40, %v6948_v28  ;;  %v7634_v16 = vperm.slane %v1972_v33, %v6948_v28  ;;  %v7639_v14 = vperm.slane %v1984_v51, %v6948_v28  ;;  %v7642_v63 = vperm.slane %v1996_v3, %v6948_v28 }
 0x232   : > { %v7646_v43 = vsel %vm551_vm0, %v1719_v17, %v7329_v10  ;;  %v7650_v57 = vsel %vm551_vm0, %v1723_v31, %v7336_v27  ;;  %v7656_v15 = vsel %vm551_vm0, %v1702_v39, %v1721_v6  ;;  %v7662_v26 = vsel %vm551_vm0, %v7540_v30, %v1725_v58 }
 0x233   : > { %v2007_v35 = vrot.slane %v7634_v16, 4  ;;  %v2071_v0 = vrot.slane %v7650_v57, 4  ;;  %v2031_v59 = vrot.slane %v7642_v63, 4  ;;  %v1953_v19 = vrot.slane %v7415_v52, 4 }
 0x234   : > { %2209 = vrot.lane.b32.xlu1 %v1840_v55, %s6732_s12  ;;  %v2083_v5 = vrot.slane %v7662_v26, 4  ;;  %v2096_v10 = vsel %vm551_vm0, %v2095_v20, %v7614_v50  ;;  %v2108_v30 = vsel %vm551_vm0, %v2107_v49, %v7607_v4  ;;  %v1985_v17 = vrot.slane %v7602_v47, 4 }
 0x235   : > { %v2008_v27 = vsel %vm551_vm0, %v2007_v35, %v7630_v12  ;;  %v2072_v6 = vsel %vm551_vm0, %v2071_v0, %v7646_v43  ;;  %v2102_v58 = vperm.slane %v2096_v10, %v6948_v28  ;;  %v2032_v52 = vsel %vm551_vm0, %v2031_v59, %v7639_v14 }
 0x236   : > { %v2014_v39 = vperm.slane %v2008_v27, %v6976_v61  ;;  %v2078_v31 = vperm.slane %v2072_v6, %v6948_v28  ;;  %v2084_v45 = vsel %vm551_vm0, %v2083_v5, %v7656_v15  ;;  %v2038_v48 = vperm.slane %v2032_v52, %v6976_v61 }
 0x237   : > { %v2090_v46 = vperm.slane %v2084_v45, %v6948_v28  ;;  %v2114_v8 = vperm.slane %v2108_v30, %v6948_v28  ;;  %v2145_v23 = vrot.slane %v2102_v58, 4  ;;  %v1954_v24 = vsel %vm551_vm0, %v7403_v42, %v1953_v19 }
 0x238   : > { %v2057_v49 = vrot.slane %v2014_v39, 4  ;;  %v2121_v34 = vrot.slane %v2078_v31, 4  ;;  %v2055_v7 = vrot.slane %v2038_v48, 4  ;;  %v2073_v22 = vrot.slane %v7646_v43, 4 }
 0x239   : > { %v2146_v29 = vsel %vm551_vm0, %v2114_v8, %v2145_v23  ;;  %v2119_v20 = vrot.slane %v2090_v46, 4  ;;  %v2143_v25 = vrot.slane %v2114_v8, 4  ;;  %v1845_v40 = vrot.slane %v7521_v21, 4 }
 0x23a   : > { %v2058_v37 = vsel %vm551_vm0, %v2038_v48, %v2057_v49  ;;  %v2122_v13 = vsel %vm551_vm0, %v2090_v46, %v2121_v34  ;;  %v7695_v51 = vperm.slane %v2146_v29, %v6976_v61  ;;  %v2056_v47 = vsel %vm551_vm0, %v2055_v7, %v2014_v39 }
 0x23b   : > { %2249 = vrot.lane.b32.xlu0 %v2058_v37, %s6737_s6  ;;  %v2120_v42 = vsel %vm551_vm0, %v2119_v20, %v2078_v31  ;;  %v2144_v55 = vsel %vm551_vm0, %v2143_v25, %v2102_v58  ;;  %2241 = vrot.lane.b32.xlu2 %v2056_v47, %s6738_s9  ;;  %v7705_v33 = vperm.slane %v2122_v13, %v6976_v61  ;;  %v2009_v19 = vrot.slane %v7630_v12, 4 }
 0x23c   : > { %2219 = vrot.lane.b32.xlu1 %v1954_v24, %s6734_s8  ;;  %v2171_v3 = vrot.slane %v7695_v51, 4  ;;  %v2126_v43 = vperm.slane %v2120_v42, %v6976_v61  ;;  %v1962_v35 = vsel %vm551_vm0, %v7598_v9, %v1961_v18  ;;  %v1974_v0 = vsel %vm551_vm0, %v7475_v56, %v1973_v2 }
 0x23d   : > { %v1986_v21 = vsel %vm551_vm0, %v7550_v11, %v1985_v17  ;;  %v1998_v59 = vsel %vm551_vm0, %v7482_v41, %v1997_v36  ;;  %v2085_v5 = vrot.slane %v7656_v15, 4  ;;  %v2150_v10 = vperm.slane %v2144_v55, %v6976_v61 }
 0x23e   : > { %v2169_v27 = vrot.slane %v2126_v43, 4  ;;  %v1982_v9 = vperm.slane %v1974_v0, %v6948_v28  ;;  %v1970_v18 = vperm.slane %v1962_v35, %v6948_v28  ;;  %v1994_v56 = vperm.slane %v1986_v21, %v6948_v28  ;;  %v7789_v0 = vld [vmem:[%s6903_s30] sm:$0xff] }
 0x23f   : > { %v2006_v11 = vperm.slane %v1998_v59, %v6948_v28  ;;  %v2010_v60 = vsel %vm551_vm0, %v7634_v16, %v2009_v19  ;;  %v2109_v41 = vrot.slane %v7607_v4, 4  ;;  %v2172_v36 = vsel %vm551_vm0, %v2171_v3, %v7705_v33 }
 0x240   : > { %v2019_v12 = vrot.slane %v1982_v9, 4  ;;  %v2074_v2 = vsel %vm551_vm0, %v7650_v57, %v2073_v22  ;;  %v2170_v15 = vsel %vm551_vm0, %v2150_v10, %v2169_v27  ;;  %v1846_v6 = vsel %vm551_vm0, %v7529_v38, %v1845_v40 }
 0x241   : > { %v2043_v58 = vrot.slane %v2006_v11, 4  ;;  %v2018_v30 = vperm.slane %v2010_v60, %v6976_v61  ;;  %v2033_v39 = vrot.slane %v7639_v14, 4  ;;  %v7739_v16 = vperm.slane %v2074_v2, %v6948_v28  ;;  %v7818_v2 = vld [vmem:[%s6903_s30 + $0x28] sm:$0xff] }
 0x242   : > { %v2086_v4 = vsel %vm551_vm0, %v7662_v26, %v2085_v5  ;;  %v2020_v57 = vsel %vm551_vm0, %v2019_v12, %v1970_v18  ;;  %v2097_v31 = vrot.slane %v7614_v50, 4  ;;  %v2110_v26 = vsel %vm551_vm0, %v7566_v54, %v2109_v41  ;;  %v7815_v12 = vld [vmem:[%s6903_s30 + $0x20] sm:$0xff] }
 0x243   : > { %2259 = vrot.lane.b32.xlu0 %v2172_v36, %s6739_s11  ;;  %v2044_v52 = vsel %vm551_vm0, %v2043_v58, %v1994_v56  ;;  %v7747_v38 = vperm.slane %v2086_v4, %v6948_v28  ;;  %2251 = vrot.lane.b32.xlu2 %v2170_v15, %s6737_s6  ;;  %v7760_v48 = vperm.slane %v2110_v26, %v6948_v28  ;;  %v2061_v54 = vrot.slane %v2018_v30, 4  ;;  %v7822_v58 = vld [vmem:[%s6903_s30 + $0x10] sm:$0xff]  ;;  %s6747_s6 = smov 4  }
 0x244   : > { %2233 = vrot.lane.b32.xlu1 %v1846_v6, %s6736_s5  ;;  %v7753_v14 = vperm.slane %v2044_v52, %v6976_v61  ;;  %v2098_v45 = vsel %vm551_vm0, %v7575_v44, %v2097_v31  ;;  %v7764_v50 = vperm.slane %v2020_v57, %v6976_v61  ;;  %v2034_v23 = vsel %vm551_vm0, %v7642_v63, %v2033_v39 }
 0x245   : > { %v2131_v46 = vrot.slane %v7747_v38, 4  ;;  %v7770_v17 = vperm.slane %v2098_v45, %v6948_v28  ;;  %v2167_v49 = vrot.slane %v2150_v10, 4  ;;  %v2155_v24 = vrot.slane %v7760_v48, 4 }
 0x246   : > { %v2063_v8 = vrot.slane %v7753_v14, 4  ;;  %v2042_v34 = vperm.slane %v2034_v23, %v6976_v61  ;;  %v2021_v22 = vrot.slane %v1970_v18, 4  ;;  %v2045_v13 = vrot.slane %v1994_v56, 4 }
 0x247   : > { %v2132_v44 = vsel %vm551_vm0, %v2131_v46, %v7739_v16  ;;  %v2156_v7 = vsel %vm551_vm0, %v2155_v24, %v7770_v17  ;;  %v2168_v25 = vsel %vm551_vm0, %v2167_v49, %v2126_v43  ;;  %v2358_v47 = vlaneseq  ;;  %v7792_v43 = vld [vmem:[%s6903_s30 + $0x8] sm:$0xff] }
 0x248   : > { %v2064_v29 = vsel %vm551_vm0, %v2063_v8, %v7764_v50  ;;  %v2138_v63 = vperm.slane %v2132_v44, %v6976_v61  ;;  %v2062_v20 = vsel %vm551_vm0, %v2042_v34, %v2061_v54  ;;  %v2162_v37 = vperm.slane %v2156_v7, %v6976_v61 }
 0x249   : > { %v2059_v40 = vrot.slane %v2042_v34, 4  ;;  %v2022_v3 = vsel %vm551_vm0, %v1982_v9, %v2021_v22  ;;  %v2046_v35 = vsel %vm551_vm0, %v2006_v11, %v2045_v13  ;;  %v7795_v21 = vshrl.u32 %v2358_v47, 7  ;;  %v7881_v22 = vld [vmem:[%s6903_s30 + $0x30] sm:$0xff]  ;;  %v7884_v13 = vld [vmem:[%s6903_s30 + $0x38] sm:$0xff] }
 0x24a   : > { %v2177_v42 = vrot.slane %v2138_v63, 4  ;;  %v2175_v55 = vrot.slane %v2162_v37, 4  ;;  %v2030_v19 = vperm.slane %v2022_v3, %v6976_v61  ;;  %v2054_v27 = vperm.slane %v2046_v35, %v6976_v61 }
 0x24b   : > { %2273 = vrot.lane.b32.xlu0 %v2064_v29, %s6740_s13  ;;  %2265 = vrot.lane.b32.xlu2 %v2062_v20, %s6741_s23  ;;  %v2060_v10 = vsel %vm551_vm0, %v2059_v40, %v2018_v30  ;;  %v2365_v9 = vrot.slane %v7789_v0, 7  ;;  %v2369_v18 = vrot.slane %v7792_v43, 7  ;;  %v2133_v56 = vrot.slane %v7739_v16, 4  ;;  %v7825_v30 = vld [vmem:[%s6903_s30 + $0x18] sm:$0xff]  ;;  %s8016_s30 = sshll.u32 %s6899_s29, 4 }
 0x24c   : > { %2243 = vrot.lane.b32.xlu1 %v2168_v25, %s6738_s9  ;;  %v2178_v59 = vsel %vm551_vm0, %v2162_v37, %v2177_v42  ;;  %v2176_v5 = vsel %vm551_vm0, %v2175_v55, %v2138_v63  ;;  %v7808_v11 = vadd.s32 8, %v7795_v21  ;;  %vm2373_vm1 = vcmp.lt.s32.totalorder %v7795_v21, 1  ;;  %s8029_s0 = scalar_lea.vmem [#allocation7], %s8016_s30  ;;  %s6748_s9 = smov 12  }
 0x24d   : > { %v2396_v60 = vrot.slane %v7789_v0, 1  ;;  %v2400_v41 = vrot.slane %v7792_v43, 1  ;;  %v2069_v36 = vrot.slane %v2030_v19, 4  ;;  %vm2404_vm2 = vcmp.lt.s32.totalorder %v7795_v21, 7 }
 0x24e   : > { %v2067_v15 = vrot.slane %v2054_v27, 4  ;;  %v2173_v6 = vrot.slane %v7705_v33, 4  ;;  %v2374_v39 = vsel %vm2373_vm1, %v2365_v9, %v2369_v18  ;;  %v2134_v16 = vsel %vm551_vm0, %v7747_v38, %v2133_v56 }
 0x24f   : > { %vm2395_vm3 = vcmp.eq.s32.totalorder %v7808_v11, 15  ;;  %v2409_v33 = vsel %vm2404_vm2, %v2400_v41, %v2396_v60  ;;  %v2367_v4 = vrot.slane %v7815_v12, 7  ;;  %v2371_v57 = vrot.slane %v7818_v2, 7 }
 0x250   : > { %v2070_v52 = vsel %vm551_vm0, %v2054_v27, %v2069_v36  ;;  %v2157_v31 = vrot.slane %v7770_v17, 4  ;;  %v2366_v26 = vrot.slane %v7822_v58, 7  ;;  %v2370_v38 = vrot.slane %v7825_v30, 7 }
 0x251   : > { %v2068_v45 = vsel %vm551_vm0, %v2067_v15, %v2030_v19  ;;  %v2174_v46 = vsel %vm551_vm0, %v7695_v51, %v2173_v6  ;;  %v2426_v8 = vmax.f32 %v7792_v43, %v2374_v39  ;;  %v2142_v23 = vperm.slane %v2134_v16, %v6976_v61 }
 0x252   : > { %v2418_v17 = vsel %vm2395_vm3, -inf, %v2409_v33  ;;  %vm2363_vm4 = vcmp.eq.s32.totalorder %v7795_v21, 0  ;;  %v2380_v54 = vsel %vm2373_vm1, %v2371_v57, %v2367_v4  ;;  %v2158_v51 = vsel %vm551_vm0, %v7760_v48, %v2157_v31 }
 0x253   : > { %2283 = vrot.lane.b32.xlu0 %v2178_v59, %s6742_s22  ;;  %2275 = vrot.lane.b32.xlu2 %v2176_v5, %s6740_s13  ;;  %v2379_v49 = vsel %vm2373_vm1, %v2370_v38, %v2366_v26  ;;  %v7868_v44 = vmax.f32 %v2426_v8, %v2418_v17  ;;  %v2181_v24 = vrot.slane %v2142_v23, 4  ;;  %v2065_v34 = vrot.slane %v7764_v50, 4  ;;  %s6750_s13 = smov 28  }
 0x254   : > { %2257 = vrot.lane.b32.xlu1 %v2060_v10, %s6739_s11  ;;  %v2390_v7 = vsel %vm2363_vm4, -inf, %v2380_v54  ;;  %v2398_v29 = vrot.slane %v7815_v12, 1  ;;  %v2402_v63 = vrot.slane %v7818_v2, 1  ;;  %v2166_v48 = vperm.slane %v2158_v51, %v6976_v61  ;;  %s6749_s11 = smov 20  }
 0x255   : > { %v2388_v20 = vsel %vm2363_vm4, -inf, %v2379_v49  ;;  %v2397_v25 = vrot.slane %v7822_v58, 1  ;;  %v2401_v37 = vrot.slane %v7825_v30, 1  ;;  %v2066_v42 = vsel %vm551_vm0, %v7753_v14, %v2065_v34 }
 0x256   : > { %v2182_v50 = vsel %vm551_vm0, %v2166_v48, %v2181_v24  ;;  %v2429_v55 = vmax.f32 %v7815_v12, %v2390_v7  ;;  %v2407_v40 = vsel %vm2404_vm2, %v2398_v29, %v2402_v63  ;;  %v2427_v3 = vmax.f32 %v7822_v58, %v2388_v20 }
 0x257   : > { %v2368_v35 = vrot.slane %v7881_v22, 7  ;;  %v2372_v59 = vrot.slane %v7884_v13, 7  ;;  %v2406_v19 = vsel %vm2404_vm2, %v2397_v25, %v2401_v37  ;;  %v2399_v5 = vrot.slane %v7881_v22, 1 }
 0x258   : > { %v2403_v14 = vrot.slane %v7884_v13, 1  ;;  %v2378_v10 = vsel %vm2373_vm1, %v2369_v18, %v2365_v9  ;;  %v7908_v27 = vmax.f32 %v2429_v55, %v2407_v40  ;;  %v2179_v56 = vrot.slane %v2166_v48, 4 }
 0x259   : > { %v7910_v36 = vmax.f32 %v2427_v3, %v2406_v19  ;;  %v2377_v15 = vsel %vm2373_vm1, %v2368_v35, %v2372_v59  ;;  %v2376_v39 = vsel %vm2373_vm1, %v2367_v4, %v2371_v57  ;;  %v2386_v16 = vsel %vm2363_vm4, -inf, %v2378_v10 }
 0x25a   : > { %v2412_v6 = vsel %vm2404_vm2, %v2403_v14, %v2399_v5  ;;  %v2411_v9 = vsel %vm2404_vm2, %v2402_v63, %v2398_v29  ;;  %v2180_v18 = vsel %vm551_vm0, %v2179_v56, %v2142_v23  ;;  %v2432_v33 = vmax.f32 %v7884_v13, %v2377_v15 }
 0x25b   : > { %2297 = vrot.lane.b32.xlu0 %v2070_v52, %s6743_s14  ;;  %2289 = vrot.lane.b32.xlu2 %v2068_v45, %s6744_s25  ;;  %v2424_v4 = vsel %vm2395_vm3, -inf, %v2412_v6  ;;  %v2430_v57 = vmax.f32 %v7818_v2, %v2376_v39  ;;  %v2425_v52 = vmax.f32 %v7789_v0, %v2386_v16  ;;  %v2422_v31 = vsel %vm2395_vm3, -inf, %v2411_v9 }
 0x25c   : > { %2267 = vrot.lane.b32.xlu1 %v2174_v46, %s6741_s23  ;;  %v2405_v45 = vsel %vm2404_vm2, %v2396_v60, %v2400_v41  ;;  %v7941_v46 = vmax.f32 %v2432_v33, %v2424_v4  ;;  %v2375_v54 = vsel %vm2373_vm1, %v2366_v26, %v2370_v38  ;;  %v2410_v51 = vsel %vm2404_vm2, %v2401_v37, %v2397_v25  ;;  %s6751_s23 = smov 36  }
 0x25d   : > { %v7943_v23 = vmax.f32 %v2430_v57, %v2422_v31  ;;  %v7945_v17 = vmax.f32 %v2425_v52, %v2405_v45  ;;  %v2428_v60 = vmax.f32 %v7825_v30, %v2375_v54  ;;  %v2420_v41 = vsel %vm2395_vm3, -inf, %v2410_v51 }
 0x25e   : > { %v2381_v26 = vsel %vm2373_vm1, %v2372_v59, %v2368_v35  ;;  %v2408_v7 = vsel %vm2404_vm2, %v2399_v5, %v2403_v14  ;;  %v1831_v15 = vrot.slane %v7305_v32, 4  ;;  %v1943_v39 = vrot.slane %v7423_v1, 4 }
 0x25f   : > { %v7966_v49 = vmax.f32 %v2428_v60, %v2420_v41  ;;  %v2392_v24 = vsel %vm2363_vm4, -inf, %v2381_v26  ;;  %vm2333_vm1 = vcmask 719872   ;;  %vm2336_vm2 = vcmask 785408  }
 0x260   : > { %v2194_v8 = vpop.permute.xlu2 %2193  ;;  %v2431_v34 = vmax.f32 %v7881_v22, %v2392_v24  ;;  %v1832_v6 = vsel %vm551_vm0, %v1831_v15, %v7293_v53  ;;  %v1944_v57 = vsel %vm551_vm0, %v1943_v39, %v7411_v62  ;;  %vm2342_vm3 = vcmask 916480  }
 0x261   : > { %vm2339_vm4 = vcmask 850944  }
 0x262   : > { %v7975_v29 = vmax.f32 %v2431_v34, %v2408_v7 }
 0x263   : > { %2446 = vrot.lane.b32.xlu0 %v7868_v44, %s6731_s26  ;;  %2299 = vrot.lane.b32.xlu2 %v2182_v50, %s6743_s14  ;;  %s6753_s14 = smov 52  }
 0x264   : > { %2281 = vrot.lane.b32.xlu1 %v2066_v42, %s6742_s22  ;;  %s6752_s22 = smov 44  }
 0x26b   : > { %2455 = vrot.lane.b32.xlu0 %v7908_v27, %s6731_s26  ;;  %2449 = vrot.lane.b32.xlu2 %v7910_v36, %s6731_s26 }
 0x26c   : > { %2291 = vrot.lane.b32.xlu1 %v2180_v18, %s6744_s25  ;;  %s6754_s25 = smov 60  }
 0x271   : > { %v2204_v38 = vpop.permute.xlu2 %2203 }
 0x273   : > { %2464 = vrot.lane.b32.xlu0 %v7941_v46, %s6731_s26  ;;  %2458 = vrot.lane.b32.xlu2 %v7943_v23, %s6731_s26 }
 0x274   : > { %2443 = vrot.lane.b32.xlu1 %v7945_v17, %s6731_s26 }
 0x277   : > { %v2186_v63 = vpop.permute.xlu0 %2185 }
 0x278   : > { %v2304_v16 = vsel %vm2303_vm5, %v1832_v6, %v2186_v63 }
 0x279   : > { %v2307_v4 = vsel %vm2306_vm6, %v2304_v16, %v2194_v8 }
 0x27c   : > { %2452 = vrot.lane.b32.xlu1 %v7966_v49, %s6731_s26 }
 0x281   : > { %v2218_v11 = vpop.permute.xlu2 %2217 }
 0x284   : > { %2461 = vrot.lane.b32.xlu1 %v7975_v29, %s6731_s26 }
 0x286   : > { %v2212_v25 = vpop.permute.xlu0 %2211 }
 0x288   : > { %v2188_v48 = vpop.permute.xlu1 %2187 }
 0x289   : > { %v2305_v53 = vsel %vm2303_vm5, %v1944_v57, %v2188_v48 }
 0x28a   : > { %v2228_v20 = vpop.permute.xlu2 %2227 }
 0x293   : > { %v2196_v37 = vpop.permute.xlu1 %2195 }
 0x294   : > { %v2308_v52 = vsel %vm2306_vm6, %v2305_v53, %v2196_v37 }
 0x295   : > { %v2242_v50 = vpop.permute.xlu2 %2241  ;;  %v2311_v8 = vsel %vm2309_vm7, %v2308_v52, %v2204_v38 }
 0x296   : > { %v2314_v41 = vsel %vm2312_vm8, %v2311_v8, %v2212_v25 }
 0x29a   : > { %v2226_v42 = vpop.permute.xlu0 %2225 }
 0x29d   : > { %v2252_v55 = vpop.permute.xlu2 %2251 }
 0x29e   : > { %v2202_v40 = vpop.permute.xlu1 %2201 }
 0x29f   : > { %v2310_v32 = vsel %vm2309_vm7, %v2307_v4, %v2202_v40 }
 0x2a2   : > { %v2236_v3 = vpop.permute.xlu0 %2235 }
 0x2a5   : > { %v2266_v35 = vpop.permute.xlu2 %2265 }
 0x2a6   : > { %v2210_v59 = vpop.permute.xlu1 %2209 }
 0x2a7   : > { %v2313_v1 = vsel %vm2312_vm8, %v2310_v32, %v2210_v59 }
 0x2a8   : > { %v2316_v31 = vsel %vm2315_vm9, %v2313_v1, %v2218_v11 }
 0x2a9   : > { %v2319_v60 = vsel %vm2318_vm11, %v2316_v31, %v2226_v42 }
 0x2ad   : > { %v2250_v21 = vpop.permute.xlu0 %2249  ;;  %v7979_v19 = vpop.permute.xlu2 %2275 }
 0x2ae   : > { %v2220_v5 = vpop.permute.xlu1 %2219 }
 0x2af   : > { %v2317_v24 = vsel %vm2315_vm9, %v2314_v41, %v2220_v5 }
 0x2b0   : > { %v2320_v38 = vsel %vm2318_vm11, %v2317_v24, %v2228_v20 }
 0x2b1   : > { %v2323_v25 = vsel %vm10090_vm12, %v2320_v38, %v2236_v3 }
 0x2b5   : > { %v2260_v14 = vpop.permute.xlu0 %2259  ;;  %v7981_v10 = vpop.permute.xlu2 %2289 }
 0x2b6   : > { %v2234_v56 = vpop.permute.xlu1 %2233 }
 0x2b7   : > { %v2322_v26 = vsel %vm10090_vm12, %v2319_v60, %v2234_v56  ;;  %vm2345_vm12 = vcmask 982016  }
 0x2b8   : > { %v2325_v34 = vsel %vm2324_vm13, %v2322_v26, %v2242_v50 }
 0x2b9   : > { %v2328_v48 = vsel %vm2327_vm14, %v2325_v34, %v2250_v21 }
 0x2bd   : > { %v2274_v9 = vpop.permute.xlu0 %2273  ;;  %v7988_v18 = vpop.permute.xlu2 %2299 }
 0x2be   : > { %v2244_v33 = vpop.permute.xlu1 %2243 }
 0x2bf   : > { %v2326_v50 = vsel %vm2324_vm13, %v2323_v25, %v2244_v33 }
 0x2c0   : > { %v2329_v20 = vsel %vm2327_vm14, %v2326_v50, %v2252_v55  ;;  %vm4352_vm14 = vcmask 31744  }
 0x2c1   : > { %v2332_v56 = vsel %vm2330_vm15, %v2329_v20, %v2260_v14 }
 0x2c5   : > { %v2284_v45 = vpop.permute.xlu0 %2283  ;;  %v2450_v54 = vpop.permute.xlu2 %2449 }
 0x2c6   : > { %v2258_v51 = vpop.permute.xlu1 %2257  ;;  %v2451_v62 = vsel %vm2442_vm10, %v2450_v54, %v7910_v36 }
 0x2c7   : > { %2471 = vrot.lane.b32.xlu0 %v2451_v62, %s6731_s26  ;;  %v2331_v42 = vsel %vm2330_vm15, %v2328_v48, %v2258_v51  ;;  %vm4357_vm15 = vcmask 97280  }
 0x2c8   : > { %v2334_v40 = vsel %vm2333_vm1, %v2331_v42, %v2266_v35 }
 0x2c9   : > { %v2337_v5 = vsel %vm2336_vm2, %v2334_v40, %v2274_v9 }
 0x2cd   : > { %v2298_v7 = vpop.permute.xlu0 %2297  ;;  %v2459_v11 = vpop.permute.xlu2 %2458 }
 0x2ce   : > { %v2268_v63 = vpop.permute.xlu1 %2267  ;;  %v2460_v37 = vsel %vm2442_vm10, %v2459_v11, %v7943_v23 }
 0x2cf   : > { %2477 = vrot.lane.b32.xlu0 %v2460_v37, %s6731_s26  ;;  %v2335_v55 = vsel %vm2333_vm1, %v2332_v56, %v2268_v63  ;;  %vm4362_vm1 = vcmask 162816  }
 0x2d0   : > { %v2338_v39 = vsel %vm2336_vm2, %v2335_v55, %v7979_v19  ;;  %vm4367_vm2 = vcmask 228352  }
 0x2d1   : > { %v2341_v33 = vsel %vm2339_vm4, %v2338_v39, %v2284_v45 }
 0x2d5   : > { %v2447_v59 = vpop.permute.xlu0 %2446 }
 0x2d6   : > { %v2448_v21 = vsel %vm2442_vm10, %v2447_v59, %v7868_v44  ;;  %v2282_v3 = vpop.permute.xlu1 %2281 }
 0x2d7   : > { %2469 = vrot.lane.b32.xlu1 %v2448_v21, %s6731_s26  ;;  %v2340_v35 = vsel %vm2339_vm4, %v2337_v5, %v2282_v3 }
 0x2d8   : > { %v2343_v15 = vsel %vm2342_vm3, %v2340_v35, %v7981_v10 }
 0x2d9   : > { %v2346_v6 = vsel %vm2345_vm12, %v2343_v15, %v2298_v7 }
 0x2da   : > { %2348 = vst [vmem:[%s8029_s0] sm:$0xff] %v2346_v6 }
 0x2dd   : > { %v2456_v14 = vpop.permute.xlu0 %2455 }
 0x2de   : > { %v2457_v16 = vsel %vm2442_vm10, %v2456_v14, %v7908_v27  ;;  %v2292_v9 = vpop.permute.xlu1 %2291 }
 0x2df   : > { %2475 = vrot.lane.b32.xlu1 %v2457_v16, %s6731_s26  ;;  %v2344_v10 = vsel %vm2342_vm3, %v2341_v33, %v2292_v9 }
 0x2e0   : > { %v2347_v4 = vsel %vm2345_vm12, %v2344_v10, %v7988_v18 }
 0x2e1   : > { %2349 = vst [vmem:[%s8029_s0 + $0x8] sm:$0xff] %v2347_v4 }
 0x2e5   : > { %v2465_v57 = vpop.permute.xlu0 %2464 }
 0x2e6   : > { %v2466_v32 = vsel %vm2442_vm10, %v2465_v57, %v7941_v46  ;;  %v2444_v19 = vpop.permute.xlu1 %2443 }
 0x2e7   : > { %2481 = vrot.lane.b32.xlu1 %v2466_v32, %s6731_s26  ;;  %v2445_v53 = vsel %vm2442_vm10, %v2444_v19, %v7945_v17 }
 0x2e8   : > { %2467 = vrot.lane.b32.xlu2 %v2445_v53, %s6731_s26 }
 0x2ee   : > { %v2453_v1 = vpop.permute.xlu1 %2452 }
 0x2ef   : > { %v2454_v52 = vsel %vm2442_vm10, %v2453_v1, %v7966_v49 }
 0x2f0   : > { %2473 = vrot.lane.b32.xlu2 %v2454_v52, %s6731_s26 }
 0x2f6   : > { %v2462_v18 = vpop.permute.xlu1 %2461 }
 0x2f7   : > { %v2463_v31 = vsel %vm2442_vm10, %v2462_v18, %v7975_v29 }
 0x2f8   : > { %2479 = vrot.lane.b32.xlu2 %v2463_v31, %s6731_s26 }
 0x339   : > { %v2472_v45 = vpop.permute.xlu0 %2471 }
 0x33a   : > { %v2485_v8 = vsel %vm2442_vm10, %v2472_v45, %v7910_v36 }
 0x33b   : > { %2505 = vrot.lane.b32.xlu1 %v2485_v8, %s6745_s17 }
 0x341   : > { %v2478_v51 = vpop.permute.xlu0 %2477 }
 0x342   : > { %v2468_v54 = vpop.permute.xlu2 %2467  ;;  %v2488_v60 = vsel %vm2442_vm10, %v2478_v51, %v7943_v23 }
 0x343   : > { %v2483_v62 = vsel %vm2442_vm10, %v2468_v54, %v7945_v17  ;;  %2511 = vrot.lane.b32.xlu1 %v2488_v60, %s6745_s17 }
 0x344   : > { %2501 = vrot.lane.b32.xlu0 %v2483_v62, %s6745_s17 }
 0x349   : > { %v2470_v41 = vpop.permute.xlu1 %2469 }
 0x34a   : > { %v2484_v26 = vsel %vm2442_vm10, %v2470_v41, %v7868_v44  ;;  %v2474_v24 = vpop.permute.xlu2 %2473 }
 0x34b   : > { %2503 = vrot.lane.b32.xlu2 %v2484_v26, %s6745_s17  ;;  %v2486_v34 = vsel %vm2442_vm10, %v2474_v24, %v7966_v49  ;;  %2536 = vrot.lane.b32.xlu1 %v2483_v62, %s6746_s20 }
 0x34c   : > { %2507 = vrot.lane.b32.xlu0 %v2486_v34, %s6745_s17 }
 0x351   : > { %v2476_v38 = vpop.permute.xlu1 %2475 }
 0x352   : > { %v2487_v7 = vsel %vm2442_vm10, %v2476_v38, %v7908_v27  ;;  %v2480_v11 = vpop.permute.xlu2 %2479 }
 0x353   : > { %2509 = vrot.lane.b32.xlu2 %v2487_v7, %s6745_s17  ;;  %v2489_v63 = vsel %vm2442_vm10, %v2480_v11, %v7975_v29  ;;  %2542 = vrot.lane.b32.xlu1 %v2486_v34, %s6746_s20 }
 0x354   : > { %2513 = vrot.lane.b32.xlu0 %v2489_v63, %s6745_s17 }
 0x359   : > { %v2482_v48 = vpop.permute.xlu1 %2481 }
 0x35a   : > { %v2490_v37 = vsel %vm2442_vm10, %v2482_v48, %v7941_v46 }
 0x35b   : > { %2515 = vrot.lane.b32.xlu2 %v2490_v37, %s6745_s17  ;;  %2548 = vrot.lane.b32.xlu1 %v2489_v63, %s6746_s20  ;;  %s6193_s17 = scalar_lea.sflag [#allocation4], %s6899_s29 }
 0x35c   : > { %2538 = vrot.lane.b32.xlu0 %v2484_v26, %s6746_s20 }
 0x363   : > { %2540 = vrot.lane.b32.xlu2 %v2485_v8, %s6746_s20 }
 0x364   : > { %2544 = vrot.lane.b32.xlu0 %v2487_v7, %s6746_s20 }
 0x36b   : > { %2546 = vrot.lane.b32.xlu2 %v2488_v60, %s6746_s20 }
 0x36c   : > { %2550 = vrot.lane.b32.xlu0 %v2490_v37, %s6746_s20 }
 0x38e   : > { %2648 = vxpose.xlu0.b32.start [1/2] (short) (narrow) %v7815_v12, 16 }
 0x390   : > { %2616 = vxpose.xlu1.b32.start [1/2] (short) (narrow) %v7822_v58, 16 }
 0x391   : > { %2584 = vxpose.xlu2.b32.start [1/2] (short) (narrow) %v7789_v0, 16 }
 0x396   : > { %2649 = vxpose.xlu0.b32.end [2/2] (short) (narrow) %v7818_v2, 16 }
 0x398   : > { %2617 = vxpose.xlu1.b32.end [2/2] (short) (narrow) %v7825_v30, 16 }
 0x399   : > { %2585 = vxpose.xlu2.b32.end [2/2] (short) (narrow) %v7792_v43, 16 }
 0x3a1   : > { %2680 = vxpose.xlu2.b32.start [1/2] (short) (narrow) %v7881_v22, 16 }
 0x3a5   : > { %v8080_v42 = vpop.permute.xlu2 %2503 }
 0x3a9   : > { %2681 = vxpose.xlu2.b32.end [2/2] (short) (narrow) %v7884_v13, 16 }
 0x3ad   : > { %v8084_v12 = vpop.permute.xlu2 %2509  ;;  %v8086_v0 = vpop.permute.xlu1 %2505 }
 0x3b5   : > { %v8090_v2 = vpop.permute.xlu2 %2515  ;;  %v8092_v43 = vpop.permute.xlu1 %2511 }
 0x3b6   : > { %v8078_v25 = vpop.permute.xlu0 %2501 }
 0x3bd   : > { %v8096_v22 = vpop.permute.xlu2 %2540  ;;  %v8098_v13 = vpop.permute.xlu1 %2536 }
 0x3be   : > { %v8082_v50 = vpop.permute.xlu0 %2507 }
 0x3c5   : > { %v8102_v20 = vpop.permute.xlu2 %2546  ;;  %v8104_v59 = vpop.permute.xlu1 %2542 }
 0x3c6   : > { %v8088_v58 = vpop.permute.xlu0 %2513 }
 0x3cd   : > { %v8108_v5 = vpop.permute.xlu1 %2548 }
 0x3ce   : > { %v8094_v30 = vpop.permute.xlu0 %2538 }
 0x3d6   : > { %v8100_v40 = vpop.permute.xlu0 %2544 }
 0x3de   : > { %v8106_v21 = vpop.permute.xlu0 %2550 }
 0x42a   : > { %v2600_v3 = vpop.trf.xlu2 }
 0x42b   : > { %v2714_v18 = vrot.slane %v2600_v3, 4 }
 0x432   : > { %v8110_v56 = vpop.trf.xlu2  ;;  %v2664_v35 = vpop.trf.xlu0 }
 0x433   : > { %v2712_v55 = vrot.slane %v2664_v35, 4  ;;  %v2715_v8 = vsel %vm551_vm0, %v2664_v35, %v2714_v18  ;;  %v2770_v18 = vrot.slane %v8110_v56, 4 }
 0x434   : > { %v2632_v6 = vpop.trf.xlu1  ;;  %v2723_v62 = vperm.slane %v2715_v8, %v6948_v28 }
 0x435   : > { %v2713_v15 = vsel %vm551_vm0, %v2712_v55, %v2600_v3  ;;  %v2726_v16 = vrot.slane %v2632_v6, 4 }
 0x436   : > { %v2719_v39 = vperm.slane %v2713_v15, %v6948_v28  ;;  %v2750_v11 = vrot.slane %v2723_v62, 4 }
 0x438   : > { %v2738_v4 = vrot.slane %v2719_v39, 4 }
 0x43a   : > { %v2696_v14 = vpop.trf.xlu2  ;;  %v2665_v63 = vpop.trf.xlu0 }
 0x43b   : > { %v2724_v9 = vrot.slane %v2696_v14, 4  ;;  %v2727_v57 = vsel %vm551_vm0, %v2696_v14, %v2726_v16  ;;  %v2768_v55 = vrot.slane %v2665_v63, 4  ;;  %v2771_v8 = vsel %vm551_vm0, %v2665_v63, %v2770_v18 }
 0x43c   : > { %v2735_v1 = vperm.slane %v2727_v57, %v6948_v28  ;;  %v2633_v48 = vpop.trf.xlu1 }
 0x43d   : > { %v2725_v33 = vsel %vm551_vm0, %v2724_v9, %v2632_v6  ;;  %v2782_v57 = vrot.slane %v2633_v48, 4 }
 0x43e   : > { %v2731_v10 = vperm.slane %v2725_v33, %v6948_v28  ;;  %v2748_v51 = vrot.slane %v2735_v1, 4  ;;  %v2751_v35 = vsel %vm551_vm0, %v2735_v1, %v2750_v11  ;;  %v2362_v11 = vand.u32 127, %v2358_v47 }
 0x43f   : > { %v2759_v6 = vperm.slane %v2751_v35, %v6976_v61 }
 0x440   : > { %v2739_v32 = vsel %vm551_vm0, %v2731_v10, %v2738_v4  ;;  %v2736_v19 = vrot.slane %v2731_v10, 4  ;;  %v2749_v60 = vsel %vm551_vm0, %v2748_v51, %v2723_v62  ;;  %v2779_v62 = vperm.slane %v2771_v8, %v6948_v28 }
 0x441   : > { %v2747_v53 = vperm.slane %v2739_v32, %v6976_v61  ;;  %v2755_v41 = vperm.slane %v2749_v60, %v6976_v61  ;;  %v2766_v16 = vrot.slane %v2759_v6, 4  ;;  %vm2441_vm10 = vcmp.eq.s32.totalorder %v2362_v11, 0 }
 0x442   : > { %v2737_v52 = vsel %vm551_vm0, %v2736_v19, %v2719_v39  ;;  %v2697_v26 = vpop.trf.xlu2  ;;  %v2769_v39 = vsel %vm551_vm0, %v2768_v55, %v8110_v56  ;;  %v2806_v56 = vrot.slane %v2779_v62, 4  ;;  %v2525_v63 = vsel %vm2441_vm10, -inf, %v8078_v25 }
 0x443   : > { %2888 = vxpose.xlu1.b32.start.end [1/1] (short) (narrow) %v2747_v53, 16  ;;  %v2743_v31 = vperm.slane %v2737_v52, %v6976_v61  ;;  %v2762_v45 = vrot.slane %v2747_v53, 4  ;;  %v2764_v34 = vrot.slane %v2755_v41, 4  ;;  %v2780_v38 = vrot.slane %v2697_v26, 4 }
 0x444   : > { %v2775_v9 = vperm.slane %v2769_v39, %v6948_v28  ;;  %v2767_v10 = vsel %vm551_vm0, 0.0, %v2766_v16  ;;  %v2783_v53 = vsel %vm551_vm0, %v2697_v26, %v2782_v57  ;;  %vm2533_vm12 = vcmp.eq.s32.totalorder %v2362_v11, 15 }
 0x445   : > { %2824 = vxpose.xlu0.b32.start.end [1/1] (short) (narrow) %v2743_v31, 16  ;;  %v2763_v54 = vsel %vm551_vm0, 0.0, %v2762_v45  ;;  %v2760_v24 = vrot.slane %v2743_v31, 4  ;;  %v2765_v37 = vsel %vm551_vm0, 0.0, %v2764_v34  ;;  %v2781_v3 = vsel %vm551_vm0, %v2780_v38, %v2633_v48 }
 0x446   : > { %2920 = vxpose.xlu2.b32.start.end [1/1] (short) (narrow) %v2763_v54, 16  ;;  %v2787_v15 = vperm.slane %v2781_v3, %v6948_v28  ;;  %v2794_v32 = vrot.slane %v2775_v9, 4  ;;  %v2791_v52 = vperm.slane %v2783_v53, %v6948_v28  ;;  %v2568_v48 = vmax.f32 %v7945_v17, %v2525_v63 }
 0x447   : > { %v2761_v7 = vsel %vm551_vm0, 0.0, %v2760_v24  ;;  %v2529_v3 = vsel %vm2441_vm10, -inf, %v8084_v12  ;;  %v2564_v47 = vsel %vm2533_vm12, -inf, %v8100_v40  ;;  %v2526_v25 = vsel %vm2441_vm10, -inf, %v8080_v42 }
 0x448   : > { %v2792_v14 = vrot.slane %v2787_v15, 4  ;;  %v2795_v19 = vsel %vm551_vm0, %v2787_v15, %v2794_v32  ;;  %v2804_v54 = vrot.slane %v2791_v52, 4  ;;  %v2807_v34 = vsel %vm551_vm0, %v2791_v52, %v2806_v56 }
 0x449   : > { %v2803_v1 = vperm.slane %v2795_v19, %v6976_v61  ;;  %v2572_v15 = vmax.f32 %v7908_v27, %v2529_v3  ;;  %v2569_v12 = vmax.f32 %v7868_v44, %v2526_v25  ;;  %v2530_v39 = vsel %vm2441_vm10, -inf, %v8092_v43 }
 0x44a   : > { %v2793_v33 = vsel %vm551_vm0, %v2792_v14, %v2775_v9  ;;  %v2565_v27 = vsel %vm2533_vm12, -inf, %v8102_v20  ;;  %v2573_v14 = vmax.f32 %v7943_v23, %v2530_v39  ;;  %v2527_v16 = vsel %vm2441_vm10, -inf, %v8086_v0 }
 0x44b   : > { %v2799_v4 = vperm.slane %v2793_v33, %v6976_v61  ;;  %v2818_v45 = vrot.slane %v2803_v1, 4  ;;  %v2570_v44 = vmax.f32 %v7910_v36, %v2527_v16  ;;  %v2528_v43 = vsel %vm2441_vm10, -inf, %v8082_v50 }
 0x44c   : > { %v2581_v42 = vmax.f32 %v2573_v14, %v2565_v27  ;;  %v2571_v20 = vmax.f32 %v7966_v49, %v2528_v43  ;;  %v2563_v23 = vsel %vm2533_vm12, -inf, %v8104_v59  ;;  %v2531_v0 = vsel %vm2441_vm10, -inf, %v8088_v58 }
 0x44d   : > { %v2816_v31 = vrot.slane %v2799_v4, 4  ;;  %v2819_v60 = vsel %vm551_vm0, 0.0, %v2818_v45  ;;  %v2566_v36 = vsel %vm2533_vm12, -inf, %v8108_v5  ;;  %v2532_v50 = vsel %vm2441_vm10, -inf, %v8090_v2 }
 0x44e   : > { %v2579_v33 = vmax.f32 %v2571_v20, %v2563_v23  ;;  %v2567_v49 = vsel %vm2533_vm12, -inf, %v8106_v21  ;;  %v2575_v59 = vmax.f32 %v7941_v46, %v2532_v50 }
 0x44f   : > { %v2817_v51 = vsel %vm551_vm0, 0.0, %v2816_v31 }
 0x453   : > { %2952 = vxpose.xlu1.b32.start.end [1/1] (short) (narrow) %v2755_v41, 16  ;;  %v2805_v41 = vsel %vm551_vm0, %v2804_v54, %v2779_v62 }
 0x454   : > { %v2811_v26 = vperm.slane %v2805_v41, %v6976_v61 }
 0x455   : > { %2856 = vxpose.xlu0.b32.start.end [1/1] (short) (narrow) %v2761_v7, 16  ;;  %v2815_v7 = vperm.slane %v2807_v34, %v6976_v61 }
 0x456   : > { %2984 = vxpose.xlu2.b32.start.end [1/1] (short) (narrow) %v2765_v37, 16  ;;  %v2820_v24 = vrot.slane %v2811_v26, 4  ;;  %v2560_v37 = vsel %vm2533_vm12, -inf, %v8098_v13  ;;  %v2561_v13 = vsel %vm2533_vm12, -inf, %v8094_v30  ;;  %v2562_v30 = vsel %vm2533_vm12, -inf, %v8096_v22 }
 0x457   : > { %v2822_v35 = vrot.slane %v2815_v7, 4  ;;  %v2576_v55 = vmax.f32 %v2568_v48, %v2560_v37  ;;  %v2577_v40 = vmax.f32 %v2569_v12, %v2561_v13  ;;  %v2578_v9 = vmax.f32 %v2570_v44, %v2562_v30 }
 0x458   : > { %v2821_v38 = vsel %vm551_vm0, 0.0, %v2820_v24 }
 0x459   : > { %v2823_v17 = vsel %vm551_vm0, 0.0, %v2822_v35 }
 0x463   : > { %3048 = vxpose.xlu1.b32.start.end [1/1] (short) (narrow) %v2767_v10, 16  ;;  %v2574_v10 = vmax.f32 %v7975_v29, %v2531_v0 }
 0x465   : > { %3016 = vxpose.xlu0.b32.start.end [1/1] (short) (narrow) %v2759_v6, 16  ;;  %v2580_v6 = vmax.f32 %v2572_v15, %v2564_v47  ;;  %v2582_v22 = vmax.f32 %v2574_v10, %v2566_v36 }
 0x466   : > { %3080 = vxpose.xlu2.b32.start.end [1/1] (short) (narrow) %v2799_v4, 16  ;;  %v2583_v4 = vmax.f32 %v2575_v59, %v2567_v49 }
 0x473   : > { %3144 = vxpose.xlu1.b32.start.end [1/1] (short) (narrow) %v2803_v1, 16 }
 0x475   : > { %3112 = vxpose.xlu0.b32.start.end [1/1] (short) (narrow) %v2817_v51, 16 }
 0x476   : > { %3176 = vxpose.xlu2.b32.start.end [1/1] (short) (narrow) %v2819_v60, 16 }
 0x483   : > { %3240 = vxpose.xlu1.b32.start.end [1/1] (short) (narrow) %v2821_v38, 16 }
 0x485   : > { %3208 = vxpose.xlu0.b32.start.end [1/1] (short) (narrow) %v2811_v26, 16 }
 0x486   : > { %3272 = vxpose.xlu2.b32.start.end [1/1] (short) (narrow) %v2815_v7, 16 }
 0x493   : > { %4392 = vxpose.xlu1.b32.start [1/2] (short) (narrow) %v2576_v55, 16 }
 0x495   : > { %3304 = vxpose.xlu0.b32.start.end [1/1] (short) (narrow) %v2823_v17, 16 }
 0x496   : > { %4456 = vxpose.xlu2.b32.start [1/2] (short) (narrow) %v2580_v6, 16 }
 0x49b   : > { %4393 = vxpose.xlu1.b32.end [2/2] (short) (narrow) %v2577_v40, 16 }
 0x49e   : > { %4457 = vxpose.xlu2.b32.end [2/2] (short) (narrow) %v2581_v42, 16 }
 0x4a5   : > { %4424 = vxpose.xlu0.b32.start [1/2] (short) (narrow) %v2578_v9, 16 }
 0x4ad   : > { %4425 = vxpose.xlu0.b32.end [2/2] (short) (narrow) %v2579_v33, 16 }
 0x4b5   : > { %4488 = vxpose.xlu0.b32.start [1/2] (short) (narrow) %v2582_v22, 16 }
 0x4bd   : > { %4489 = vxpose.xlu0.b32.end [2/2] (short) (narrow) %v2583_v4, 16 }
 0x4df   : > { %v2936_v57 = vpop.trf.xlu2 }
 0x4e0   : > { %v3348_v8 = vrot.slane %v2936_v57, 4 }
 0x4e7   : > { %v2904_v58 = vpop.trf.xlu1  ;;  %v2937_v32 = vpop.trf.xlu2 }
 0x4e8   : > { %v3336_v19 = vrot.slane %v2904_v58, 4  ;;  %v3572_v37 = vrot.slane %v2937_v32, 4 }
 0x4e9   : > { %v2840_v29 = vpop.trf.xlu0 }
 0x4ea   : > { %v3337_v53 = vsel %vm551_vm0, %v3336_v19, %v2840_v29  ;;  %v3338_v5 = vrot.slane %v2840_v29, 4 }
 0x4eb   : > { %v3343_v54 = vperm.slane %v3337_v53, %v6948_v28 }
 0x4ec   : > { %v3339_v1 = vsel %vm551_vm0, %v2904_v58, %v3338_v5 }
 0x4ed   : > { %v3347_v60 = vperm.slane %v3339_v1, %v6948_v28  ;;  %v3386_v56 = vrot.slane %v3343_v54, 4 }
 0x4ef   : > { %v2905_v52 = vpop.trf.xlu1  ;;  %v3000_v18 = vpop.trf.xlu2  ;;  %v3398_v7 = vrot.slane %v3347_v60, 4 }
 0x4f0   : > { %v3560_v2 = vrot.slane %v2905_v52, 4  ;;  %v3374_v14 = vrot.slane %v3000_v18, 4 }
 0x4f1   : > { %v2841_v31 = vpop.trf.xlu0 }
 0x4f2   : > { %v3561_v21 = vsel %vm551_vm0, %v3560_v2, %v2841_v31  ;;  %v3562_v45 = vrot.slane %v2841_v31, 4 }
 0x4f3   : > { %v3567_v3 = vperm.slane %v3561_v21, %v6948_v28 }
 0x4f4   : > { %v3563_v46 = vsel %vm551_vm0, %v2905_v52, %v3562_v45 }
 0x4f5   : > { %v3571_v13 = vperm.slane %v3563_v46, %v6948_v28  ;;  %v3610_v39 = vrot.slane %v3567_v3, 4 }
 0x4f7   : > { %v2968_v51 = vpop.trf.xlu1  ;;  %v8200_v62 = vpop.trf.xlu2  ;;  %v3622_v44 = vrot.slane %v3571_v13, 4 }
 0x4f8   : > { %v3362_v43 = vrot.slane %v2968_v51, 4  ;;  %v3598_v19 = vrot.slane %v8200_v62, 4 }
 0x4f9   : > { %v2872_v41 = vpop.trf.xlu0 }
 0x4fa   : > { %v3349_v26 = vsel %vm551_vm0, %v3348_v8, %v2872_v41  ;;  %v3350_v24 = vrot.slane %v2872_v41, 4 }
 0x4fb   : > { %v3355_v34 = vperm.slane %v3349_v26, %v6948_v28 }
 0x4fc   : > { %v3351_v38 = vsel %vm551_vm0, %v2936_v57, %v3350_v24 }
 0x4fd   : > { %v3359_v11 = vperm.slane %v3351_v38, %v6948_v28  ;;  %v3384_v63 = vrot.slane %v3355_v34, 4  ;;  %v3387_v48 = vsel %vm551_vm0, %v3355_v34, %v3386_v56 }
 0x4fe   : > { %v3395_v36 = vperm.slane %v3387_v48, %v6976_v61 }
 0x4ff   : > { %v3385_v35 = vsel %vm551_vm0, %v3384_v63, %v3343_v54  ;;  %v3396_v55 = vrot.slane %v3359_v11, 4  ;;  %v3399_v47 = vsel %vm551_vm0, %v3359_v11, %v3398_v7  ;;  %v8211_v15 = vpop.trf.xlu1  ;;  %v8213_v25 = vpop.trf.xlu2 }
 0x500   : > { %v8231_v59 = vperm.slane %v3385_v35, %v6976_v61  ;;  %v3407_v31 = vperm.slane %v3399_v47, %v6976_v61  ;;  %v3438_v21 = vrot.slane %v3395_v36, 4  ;;  %v3586_v45 = vrot.slane %v8211_v15, 4 }
 0x501   : > { %v3397_v6 = vsel %vm551_vm0, %v3396_v55, %v3347_v60  ;;  %v2873_v17 = vpop.trf.xlu0 }
 0x502   : > { %v3573_v12 = vsel %vm551_vm0, %v3572_v37, %v2873_v17  ;;  %v3574_v27 = vrot.slane %v2873_v17, 4  ;;  %v3434_v8 = vrot.slane %v8231_v59, 4  ;;  %v3446_v47 = vrot.slane %v3407_v31, 4 }
 0x503   : > { %v3579_v40 = vperm.slane %v3573_v12, %v6948_v28 }
 0x504   : > { %v3575_v42 = vsel %vm551_vm0, %v2937_v32, %v3574_v27  ;;  %v3403_v32 = vperm.slane %v3397_v6, %v6976_v61 }
 0x505   : > { %v3608_v16 = vrot.slane %v3579_v40, 4  ;;  %v3611_v30 = vsel %vm551_vm0, %v3579_v40, %v3610_v39  ;;  %v3583_v9 = vperm.slane %v3575_v42, %v6948_v28 }
 0x506   : > { %v3442_v41 = vrot.slane %v3403_v32, 4  ;;  %v8248_v26 = vperm.slane %v3611_v30, %v6976_v61 }
 0x507   : > { %v8223_v20 = vsel %vm551_vm0, %v3608_v16, %v3567_v3  ;;  %v3064_v23 = vpop.trf.xlu1  ;;  %v8225_v33 = vpop.trf.xlu2  ;;  %v3620_v0 = vrot.slane %v3583_v9, 4  ;;  %v3623_v10 = vsel %vm551_vm0, %v3583_v9, %v3622_v44 }
 0x508   : > { %v3372_v22 = vrot.slane %v3064_v23, 4  ;;  %v3375_v50 = vsel %vm551_vm0, %v3064_v23, %v3374_v14  ;;  %v3450_v14 = vrot.slane %v8213_v25, 4  ;;  %v3662_v44 = vrot.slane %v8248_v26, 4 }
 0x509   : > { %v3032_v49 = vpop.trf.xlu0  ;;  %v3621_v4 = vsel %vm551_vm0, %v3620_v0, %v3571_v13  ;;  %v3383_v57 = vperm.slane %v3375_v50, %v6948_v28  ;;  %v3631_v23 = vperm.slane %v3623_v10, %v6976_v61 }
 0x50a   : > { %v3360_v58 = vrot.slane %v3032_v49, 4  ;;  %v3373_v29 = vsel %vm551_vm0, %v3372_v22, %v3000_v18  ;;  %v3363_v53 = vsel %vm551_vm0, %v3032_v49, %v3362_v43 }
 0x50b   : > { %v3379_v5 = vperm.slane %v3373_v29, %v6948_v28  ;;  %v3420_v1 = vrot.slane %v3383_v57, 4  ;;  %v3371_v2 = vperm.slane %v3363_v53, %v6948_v28 }
 0x50c   : > { %v3361_v52 = vsel %vm551_vm0, %v3360_v58, %v2968_v51 }
 0x50d   : > { %v3367_v46 = vperm.slane %v3361_v52, %v6948_v28  ;;  %v3408_v54 = vrot.slane %v3379_v5, 4  ;;  %v3421_v18 = vsel %vm551_vm0, %v3420_v1, %v3371_v2  ;;  %v3422_v60 = vrot.slane %v3371_v2, 4 }
 0x50e   : > { %v3427_v24 = vperm.slane %v3421_v18, %v6976_v61 }
 0x50f   : > { %v3410_v51 = vrot.slane %v3367_v46, 4  ;;  %v3065_v56 = vpop.trf.xlu1  ;;  %v8251_v34 = vpop.trf.xlu2  ;;  %v3409_v38 = vsel %vm551_vm0, %v3408_v54, %v3367_v46  ;;  %v3423_v7 = vsel %vm551_vm0, %v3383_v57, %v3422_v60 }
 0x510   : > { %v3596_v11 = vrot.slane %v3065_v56, 4  ;;  %v3599_v63 = vsel %vm551_vm0, %v3065_v56, %v3598_v19  ;;  %v8258_v37 = vperm.slane %v3409_v38, %v6976_v61  ;;  %v3431_v3 = vperm.slane %v3423_v7, %v6976_v61 }
 0x511   : > { %v3411_v48 = vsel %vm551_vm0, %v3379_v5, %v3410_v51  ;;  %v3440_v35 = vrot.slane %v3427_v24, 4  ;;  %v3033_v55 = vpop.trf.xlu0  ;;  %v3443_v17 = vsel %vm551_vm0, %v3427_v24, %v3442_v41  ;;  %v3607_v40 = vperm.slane %v3599_v63, %v6948_v28 }
 0x512   : > { %v3419_v6 = vperm.slane %v3411_v48, %v6976_v61  ;;  %v3597_v13 = vsel %vm551_vm0, %v3596_v11, %v8200_v62  ;;  %v8267_v12 = vsel %vm551_vm0, %v8258_v37, %v3434_v8  ;;  %v3444_v27 = vrot.slane %v3431_v3, 4 }
 0x513   : > { %v8270_v39 = vsel %vm551_vm0, %v3440_v35, %v3403_v32  ;;  %v3447_v30 = vsel %vm551_vm0, %v3431_v3, %v3446_v47  ;;  %v3627_v62 = vperm.slane %v3621_v4, %v6976_v61  ;;  %v3822_v22 = vrot.slane %v3443_v17, 4 }
 0x514   : > { %v3436_v42 = vrot.slane %v3419_v6, 4  ;;  %v8275_v16 = vsel %vm551_vm0, %v3419_v6, %v3438_v21  ;;  %v8281_v9 = vsel %vm551_vm0, %v3444_v27, %v3407_v31  ;;  %v3820_v43 = vrot.slane %v3447_v30, 4 }
 0x515   : > { %v3603_v50 = vperm.slane %v3597_v13, %v6948_v28  ;;  %v3644_v57 = vrot.slane %v3607_v40, 4  ;;  %v3584_v58 = vrot.slane %v3033_v55, 4  ;;  %v3587_v4 = vsel %vm551_vm0, %v3033_v55, %v3586_v45 }
 0x516   : > { %v8285_v0 = vsel %vm551_vm0, %v3436_v42, %v3395_v36  ;;  %v8289_v49 = vsel %vm551_vm0, %v3820_v43, %v3443_v17  ;;  %v8295_v29 = vsel %vm551_vm0, %v3447_v30, %v3822_v22  ;;  %v3595_v36 = vperm.slane %v3587_v4, %v6948_v28 }
 0x517   : > { %v3160_v32 = vpop.trf.xlu1  ;;  %v8292_v19 = vpop.trf.xlu2  ;;  %v3632_v10 = vrot.slane %v3603_v50, 4  ;;  %v3666_v5 = vrot.slane %v3627_v62, 4  ;;  %v3585_v1 = vsel %vm551_vm0, %v3584_v58, %v8211_v15  ;;  %v3460_v2 = vrot.slane %v8251_v34, 4 }
 0x518   : > { %v3448_v53 = vrot.slane %v3160_v32, 4  ;;  %v3451_v52 = vsel %vm551_vm0, %v3160_v32, %v3450_v14  ;;  %v3591_v21 = vperm.slane %v3585_v1, %v6948_v28  ;;  %v3645_v45 = vsel %vm551_vm0, %v3644_v57, %v3595_v36 }
 0x519   : > { %v3128_v31 = vpop.trf.xlu0  ;;  %v3646_v46 = vrot.slane %v3595_v36, 4  ;;  %v3651_v54 = vperm.slane %v3645_v45, %v6976_v61  ;;  %v3459_v60 = vperm.slane %v3451_v52, %v6948_v28  ;;  %v3674_v38 = vrot.slane %v8225_v33, 4 }
 0x51a   : > { %v3449_v8 = vsel %vm551_vm0, %v3448_v53, %v8213_v25  ;;  %v3461_v15 = vsel %vm551_vm0, %v3460_v2, %v3128_v31  ;;  %v8311_v41 = vsel %vm551_vm0, %v3632_v10, %v3591_v21  ;;  %v3634_v51 = vrot.slane %v3591_v21, 4 }
 0x51b   : > { %v3455_v18 = vperm.slane %v3449_v8, %v6948_v28  ;;  %v3647_v24 = vsel %vm551_vm0, %v3607_v40, %v3646_v46  ;;  %v3462_v56 = vrot.slane %v3128_v31, 4  ;;  %v3664_v25 = vrot.slane %v3651_v54, 4 }
 0x51c   : > { %v3655_v7 = vperm.slane %v3647_v24, %v6976_v61  ;;  %v3667_v11 = vsel %vm551_vm0, %v3651_v54, %v3666_v5  ;;  %v3670_v63 = vrot.slane %v3631_v23, 4  ;;  %v3635_v48 = vsel %vm551_vm0, %v3603_v50, %v3634_v51 }
 0x51d   : > { %v3934_v3 = vrot.slane %v3667_v11, 4  ;;  %v3684_v35 = vrot.slane %v8292_v19, 4  ;;  %v3643_v55 = vperm.slane %v3635_v48, %v6976_v61  ;;  %v8321_v47 = vsel %vm551_vm0, %v3664_v25, %v3627_v62 }
 0x51e   : > { %v3668_v6 = vrot.slane %v3655_v7, 4  ;;  %v3498_v17 = vrot.slane %v3455_v18, 4  ;;  %v3671_v13 = vsel %vm551_vm0, %v3655_v7, %v3670_v63  ;;  %v3510_v27 = vrot.slane %v3459_v60, 4 }
 0x51f   : > { %v3463_v40 = vsel %vm551_vm0, %v8251_v34, %v3462_v56  ;;  %v3467_v14 = vperm.slane %v3461_v15, %v6948_v28  ;;  %v3161_v42 = vpop.trf.xlu1  ;;  %v3660_v30 = vrot.slane %v3643_v55, 4  ;;  %v8328_v43 = vsel %vm551_vm0, %v3643_v55, %v3662_v44  ;;  %v3288_v57 = vpop.trf.xlu2 }
 0x520   : > { %v8331_v22 = vsel %vm551_vm0, %v3668_v6, %v3631_v23  ;;  %v3932_v62 = vrot.slane %v3671_v13, 4  ;;  %v8335_v4 = vsel %vm551_vm0, %v3671_v13, %v3934_v3  ;;  %v3471_v34 = vperm.slane %v3463_v40, %v6948_v28 }
 0x521   : > { %v3129_v50 = vpop.trf.xlu0  ;;  %v3920_v58 = vrot.slane %v8331_v22, 4  ;;  %v3496_v32 = vrot.slane %v3467_v14, 4  ;;  %v8340_v10 = vsel %vm551_vm0, %v3660_v30, %v8248_v26  ;;  %v3499_v23 = vsel %vm551_vm0, %v3467_v14, %v3498_v17 }
 0x522   : > { %v8343_v44 = vsel %vm551_vm0, %v3932_v62, %v3667_v11  ;;  %v3672_v36 = vrot.slane %v3161_v42, 4  ;;  %v3508_v1 = vrot.slane %v3471_v34, 4  ;;  %v3511_v52 = vsel %vm551_vm0, %v3471_v34, %v3510_v27 }
 0x523   : > { %v8348_v53 = vsel %vm551_vm0, %v3920_v58, %v8321_v47  ;;  %v3497_v5 = vsel %vm551_vm0, %v3496_v32, %v3455_v18  ;;  %v3675_v26 = vsel %vm551_vm0, %v3161_v42, %v3674_v38  ;;  %v3685_v46 = vsel %vm551_vm0, %v3684_v35, %v3129_v50 }
 0x524   : > { %v3673_v2 = vsel %vm551_vm0, %v3672_v36, %v8225_v33  ;;  %v3509_v31 = vsel %vm551_vm0, %v3508_v1, %v3459_v60  ;;  %v3683_v45 = vperm.slane %v3675_v26, %v6948_v28  ;;  %v3686_v54 = vrot.slane %v3129_v50, 4 }
 0x525   : > { %v3679_v21 = vperm.slane %v3673_v2, %v6948_v28  ;;  %v3691_v18 = vperm.slane %v3685_v46, %v6948_v28  ;;  %v3472_v51 = vrot.slane %v3288_v57, 4  ;;  %v8378_v40 = vperm.slane %v8223_v20, %v6976_v61 }
 0x526   : > { %v3734_v15 = vrot.slane %v3683_v45, 4  ;;  %v3687_v33 = vsel %vm551_vm0, %v8292_v19, %v3686_v54  ;;  %v8385_v50 = vperm.slane %v8311_v41, %v6976_v61  ;;  %v3507_v58 = vperm.slane %v3499_v23, %v6976_v61 }
 0x527   : > { %v3722_v8 = vrot.slane %v3679_v21, 4  ;;  %v3720_v56 = vrot.slane %v3691_v18, 4  ;;  %v3695_v7 = vperm.slane %v3687_v33, %v6948_v28  ;;  %v3289_v11 = vpop.trf.xlu2  ;;  %v3256_v19 = vpop.trf.xlu1  ;;  %v3658_v62 = vrot.slane %v8378_v40, 4 }
 0x528   : > { %v3696_v55 = vrot.slane %v3289_v11, 4  ;;  %v3486_v42 = vrot.slane %v3256_v19, 4  ;;  %v3432_v20 = vrot.slane %v8258_v37, 4  ;;  %v3796_v32 = vrot.slane %v8275_v16, 4 }
 0x529   : > { %v3224_v24 = vpop.trf.xlu0  ;;  %v3723_v38 = vsel %vm551_vm0, %v3691_v18, %v3722_v8  ;;  %v8366_v63 = vsel %vm551_vm0, %v3720_v56, %v3679_v21  ;;  %v3732_v3 = vrot.slane %v3695_v7, 4  ;;  %v8370_v35 = vsel %vm551_vm0, %v3695_v7, %v3734_v15 }
 0x52a   : > { %v3474_v60 = vrot.slane %v3224_v24, 4  ;;  %v3473_v25 = vsel %vm551_vm0, %v3472_v51, %v3224_v24  ;;  %v3798_v36 = vrot.slane %v8267_v12, 4  ;;  %v8396_v26 = vperm.slane %v3509_v31, %v6976_v61 }
 0x52b   : > { %v8373_v6 = vsel %vm551_vm0, %v3732_v3, %v3683_v45  ;;  %v3479_v1 = vperm.slane %v3473_v25, %v6948_v28  ;;  %v3519_v41 = vperm.slane %v3511_v52, %v6976_v61  ;;  %v3808_v23 = vrot.slane %v8281_v9, 4 }
 0x52c   : > { %v3475_v48 = vsel %vm551_vm0, %v3288_v57, %v3474_v60  ;;  %v8388_v57 = vperm.slane %v3497_v5, %v6976_v61  ;;  %v3810_v45 = vrot.slane %v8270_v39, 4  ;;  %v3656_v8 = vrot.slane %v8385_v50, 4 }
 0x52d   : > { %v3483_v30 = vperm.slane %v3475_v48, %v6948_v28  ;;  %v3550_v18 = vrot.slane %v3507_v58, 4  ;;  %v3522_v15 = vrot.slane %v3479_v1, 4  ;;  %v3554_v33 = vrot.slane %v8396_v26, 4 }
 0x52e   : > { %v3546_v54 = vrot.slane %v8388_v57, 4  ;;  %v3558_v56 = vrot.slane %v3519_v41, 4  ;;  %v8412_v25 = vsel %vm551_vm0, %v3432_v20, %v8231_v59 }
 0x52f   : > { %v3257_v34 = vpop.trf.xlu1  ;;  %v3534_v37 = vrot.slane %v3483_v30, 4  ;;  %v4472_v7 = vpop.trf.xlu2 }
 0x531   : > { %v3225_v17 = vpop.trf.xlu0 }
 0x532   : > { %v3697_v13 = vsel %vm551_vm0, %v3696_v55, %v3225_v17  ;;  %v3698_v27 = vrot.slane %v3225_v17, 4 }
 0x533   : > { %v3703_v59 = vperm.slane %v3697_v13, %v6948_v28 }
 0x534   : > { %v3699_v14 = vsel %vm551_vm0, %v3289_v11, %v3698_v27  ;;  %v3731_v11 = vperm.slane %v3723_v38, %v6976_v61  ;;  %v3710_v38 = vrot.slane %v3257_v34, 4 }
 0x539   : > { %v3320_v2 = vpop.trf.xlu0 }
 0x53a   : > { %v3484_v21 = vrot.slane %v3320_v2, 4  ;;  %v3487_v5 = vsel %vm551_vm0, %v3320_v2, %v3486_v42  ;;  %v4408_v2 = vpop.trf.xlu1 }
 0x53b   : > { %v3495_v46 = vperm.slane %v3487_v5, %v6948_v28  ;;  %v4520_v5 = vrot.slane %v4472_v7, 4 }
 0x53c   : > { %v3485_v31 = vsel %vm551_vm0, %v3484_v21, %v3256_v19 }
 0x53d   : > { %v3491_v52 = vperm.slane %v3485_v31, %v6948_v28  ;;  %v3532_v51 = vrot.slane %v3495_v46, 4  ;;  %v3535_v24 = vsel %vm551_vm0, %v3495_v46, %v3534_v37  ;;  %v3707_v37 = vperm.slane %v3699_v14, %v6948_v28 }
 0x53e   : > { %v3543_v60 = vperm.slane %v3535_v24, %v6976_v61  ;;  %v8443_v14 = vperm.slane %v8366_v63, %v6976_v61 }
 0x53f   : > { %v3520_v48 = vrot.slane %v3491_v52, 4  ;;  %v3523_v3 = vsel %vm551_vm0, %v3491_v52, %v3522_v15  ;;  %v3533_v55 = vsel %vm551_vm0, %v3532_v51, %v3483_v30  ;;  %v4522_v52 = vrot.slane %v4408_v2, 4 }
 0x540   : > { %v3531_v19 = vperm.slane %v3523_v3, %v6976_v61  ;;  %v8419_v17 = vperm.slane %v3533_v55, %v6976_v61  ;;  %v3556_v27 = vrot.slane %v3543_v60, 4  ;;  %v8422_v42 = vsel %vm551_vm0, %v3543_v60, %v3558_v56 }
 0x541   : > { %v3521_v20 = vsel %vm551_vm0, %v3520_v48, %v3479_v1  ;;  %v3321_v21 = vpop.trf.xlu0  ;;  %v4521_v60 = vsel %vm551_vm0, %v4520_v5, %v4408_v2  ;;  %v3743_v48 = vperm.slane %v8370_v35, %v6976_v61  ;;  %v3746_v3 = vrot.slane %v3703_v59, 4 }
 0x542   : > { %v8428_v30 = vperm.slane %v3521_v20, %v6976_v61  ;;  %v3548_v46 = vrot.slane %v3531_v19, 4  ;;  %v8431_v31 = vsel %vm551_vm0, %v3531_v19, %v3550_v18  ;;  %v8435_v15 = vsel %vm551_vm0, %v8419_v17, %v3554_v33 }
 0x543   : > { %v8438_v13 = vsel %vm551_vm0, %v3556_v27, %v3519_v41  ;;  %v3708_v1 = vrot.slane %v3321_v21, 4  ;;  %v3774_v33 = vrot.slane %v3731_v11, 4  ;;  %v4046_v56 = vrot.slane %v8435_v15, 4 }
 0x544   : > { %v8447_v24 = vsel %vm551_vm0, %v8428_v30, %v3546_v54  ;;  %v8450_v18 = vsel %vm551_vm0, %v3548_v46, %v3507_v58  ;;  %v3711_v63 = vsel %vm551_vm0, %v3321_v21, %v3710_v38  ;;  %v3758_v54 = vrot.slane %v3707_v37, 4 }
 0x545   : > { %v3709_v41 = vsel %vm551_vm0, %v3708_v1, %v3257_v34  ;;  %v8461_v58 = vsel %vm551_vm0, %v8422_v42, %v4046_v56  ;;  %v3719_v19 = vperm.slane %v3711_v63, %v6948_v28  ;;  %v4523_v27 = vsel %vm551_vm0, %v4472_v7, %v4522_v52 }
 0x546   : > { %v3715_v55 = vperm.slane %v3709_v41, %v6948_v28  ;;  %v3739_v34 = vperm.slane %v8373_v6, %v6976_v61  ;;  %v8469_v20 = vperm.slane %v4521_v60, %v6948_v28  ;;  %v3784_v1 = vrot.slane %v8285_v0, 4 }
 0x547   : > { %v3756_v21 = vrot.slane %v3719_v19, 4  ;;  %v3759_v5 = vsel %vm551_vm0, %v3719_v19, %v3758_v54  ;;  %v3782_v56 = vrot.slane %v3743_v48, 4  ;;  %v8481_v52 = vperm.slane %v4523_v27, %v6948_v28 }
 0x548   : > { %v3744_v2 = vrot.slane %v3715_v55, 4  ;;  %v3747_v35 = vsel %vm551_vm0, %v3715_v55, %v3746_v3  ;;  %v3767_v6 = vperm.slane %v3759_v5, %v6976_v61  ;;  %v3778_v55 = vrot.slane %v3739_v34, 4 }
 0x549   : > { %v3755_v38 = vperm.slane %v3747_v35, %v6976_v61  ;;  %v8473_v46 = vpop.trf.xlu0  ;;  %v3757_v60 = vsel %vm551_vm0, %v3756_v21, %v3707_v37  ;;  %v4546_v27 = vrot.slane %v8469_v20, 4  ;;  %v3785_v5 = vsel %vm551_vm0, %v3784_v1, %v8412_v25 }
 0x54a   : > { %v8477_v7 = vsel %vm551_vm0, %v3744_v2, %v3703_v59  ;;  %v3763_v54 = vperm.slane %v3757_v60, %v6976_v61  ;;  %v3780_v19 = vrot.slane %v3767_v6, 4  ;;  %v3783_v59 = vsel %vm551_vm0, %v3767_v6, %v3782_v56 }
 0x54b   : > { %v3772_v3 = vrot.slane %v3755_v38, 4  ;;  %v8486_v63 = vsel %vm551_vm0, %v3755_v38, %v3774_v33  ;;  %v4156_v35 = vrot.slane %v3783_v59, 4  ;;  %v3797_v6 = vsel %vm551_vm0, %v3796_v32, %v8267_v12 }
 0x54c   : > { %v3776_v37 = vrot.slane %v3763_v54, 4  ;;  %v3779_v21 = vsel %vm551_vm0, %v3763_v54, %v3778_v55  ;;  %v8498_v33 = vsel %vm551_vm0, %v3780_v19, %v3743_v48  ;;  %v3809_v48 = vsel %vm551_vm0, %v3808_v23, %v8270_v39 }
 0x54d   : > { %v8491_v2 = vsel %vm551_vm0, %v3772_v3, %v3731_v11  ;;  %v8502_v60 = vsel %vm551_vm0, %v4156_v35, %v3779_v21  ;;  %v4158_v56 = vrot.slane %v3779_v21, 4  ;;  %v3791_v11 = vperm.slane %v3785_v5, %v6948_v28 }
 0x54e   : > { %v8510_v1 = vsel %vm551_vm0, %v3776_v37, %v3739_v34  ;;  %v3803_v3 = vperm.slane %v3797_v6, %v6948_v28  ;;  %v3827_v55 = vperm.slane %v8289_v49, %v6948_v28  ;;  %v3815_v32 = vperm.slane %v3809_v48, %v6948_v28 }
 0x54f   : > { %v8520_v54 = vsel %vm551_vm0, %v3783_v59, %v4158_v56  ;;  %v8529_v34 = vsel %vm551_vm0, %v3656_v8, %v8378_v40  ;;  %v8533_v35 = vperm.slane %v8295_v29, %v6948_v28  ;;  %v8539_v49 = vsel %vm551_vm0, %v8385_v50, %v3658_v62 }
 0x550   : > { %v3832_v23 = vrot.slane %v3803_v3, 4  ;;  %v3856_v5 = vrot.slane %v3827_v55, 4  ;;  %v3786_v59 = vrot.slane %v8412_v25, 4  ;;  %v4534_v37 = vrot.slane %v8473_v46, 4 }
 0x551   : > { %v8522_v19 = vpop.trf.xlu0  ;;  %v3896_v21 = vrot.slane %v8340_v10, 4  ;;  %v3908_v8 = vrot.slane %v8328_v43, 4  ;;  %v8547_v29 = vperm.slane %v8348_v53, %v6948_v28  ;;  %v8553_v62 = vperm.slane %v8343_v44, %v6948_v28 }
 0x552   : > { %v3833_v56 = vsel %vm551_vm0, %v3832_v23, %v3791_v11  ;;  %v3857_v40 = vsel %vm551_vm0, %v3856_v5, %v3815_v32  ;;  %v3834_v50 = vrot.slane %v3791_v11, 4  ;;  %v3858_v41 = vrot.slane %v3815_v32, 4 }
 0x553   : > { %v8556_v25 = vperm.slane %v3833_v56, %v6976_v61  ;;  %v8559_v6 = vperm.slane %v3857_v40, %v6976_v61  ;;  %v3897_v48 = vsel %vm551_vm0, %v3896_v21, %v8529_v34  ;;  %v3909_v53 = vsel %vm551_vm0, %v3908_v8, %v8539_v49 }
 0x554   : > { %v8566_v23 = vperm.slane %v3897_v48, %v6948_v28  ;;  %v8569_v5 = vperm.slane %v3909_v53, %v6948_v28  ;;  %v3970_v44 = vrot.slane %v8547_v29, 4  ;;  %v3835_v11 = vsel %vm551_vm0, %v3803_v3, %v3834_v50 }
 0x555   : > { %v3882_v56 = vrot.slane %v8556_v25, 4  ;;  %v3843_v40 = vperm.slane %v3835_v11, %v6976_v61  ;;  %v3787_v21 = vsel %vm551_vm0, %v8285_v0, %v3786_v59  ;;  %v3799_v3 = vsel %vm551_vm0, %v8275_v16, %v3798_v36 }
 0x556   : > { %v3946_v8 = vrot.slane %v8566_v23, 4  ;;  %v3971_v48 = vsel %vm551_vm0, %v8553_v62, %v3970_v44  ;;  %v8581_v53 = vperm.slane %v3787_v21, %v6948_v28  ;;  %v3859_v59 = vsel %vm551_vm0, %v3827_v55, %v3858_v41  ;;  %v8611_v55 = vpop.trf.xlu1 }
 0x557   : > { %v8589_v32 = vsel %vm551_vm0, %v8559_v6, %v3882_v56  ;;  %v8592_v0 = vperm.slane %v3971_v48, %v6976_v61  ;;  %v3886_v11 = vrot.slane %v3843_v40, 4  ;;  %v3867_v38 = vperm.slane %v3859_v59, %v6976_v61 }
 0x558   : > { %v3947_v12 = vsel %vm551_vm0, %v8569_v5, %v3946_v8  ;;  %v8607_v48 = vperm.slane %v3799_v3, %v6948_v28  ;;  %v8622_v3 = vpop.trf.xlu2 }
 0x559   : > { %v4504_v50 = vpop.trf.xlu0  ;;  %v8603_v36 = vperm.slane %v3947_v12, %v6976_v61  ;;  %v3996_v56 = vrot.slane %v8592_v0, 4  ;;  %v3884_v8 = vrot.slane %v3867_v38, 4  ;;  %v3910_v12 = vrot.slane %v8539_v49, 4 }
 0x55a   : > { %v4532_v44 = vrot.slane %v4504_v50, 4  ;;  %v4535_v21 = vsel %vm551_vm0, %v4504_v50, %v4534_v37  ;;  %v8614_v37 = vsel %vm551_vm0, %v3867_v38, %v3886_v11  ;;  %v3811_v50 = vsel %vm551_vm0, %v8281_v9, %v3810_v45 }
 0x55b   : > { %v8600_v16 = vperm.slane %v4535_v21, %v6948_v28  ;;  %v8631_v38 = vsel %vm551_vm0, %v3884_v8, %v3843_v40  ;;  %v8634_v39 = vperm.slane %v3811_v50, %v6948_v28  ;;  %v3844_v9 = vrot.slane %v8607_v48, 4 }
 0x55c   : > { %v4533_v41 = vsel %vm551_vm0, %v4532_v44, %v8473_v46  ;;  %v8627_v46 = vsel %vm551_vm0, %v3996_v56, %v8603_v36  ;;  %10102 = vst [vmem:[#allocation17_spill] sm:$0xff] %v8631_v38  ;;  %v3868_v56 = vrot.slane %v8533_v35, 4  ;;  %v3898_v8 = vrot.slane %v8529_v34, 4 }
 0x55d   : > { %v4539_v21 = vperm.slane %v4533_v41, %v6948_v28  ;;  %v4556_v11 = vrot.slane %v8600_v16, 4  ;;  %v4576_v41 = vrot.slane %v8622_v3, 4  ;;  %v3845_v40 = vsel %vm551_vm0, %v3844_v9, %v8581_v53 }
 0x55f   : > { %v4544_v45 = vrot.slane %v4539_v21, 4  ;;  %v4547_v49 = vsel %vm551_vm0, %v4539_v21, %v4546_v27  ;;  %v3869_v27 = vsel %vm551_vm0, %v3868_v56, %v8634_v39  ;;  %v3911_v21 = vsel %vm551_vm0, %v8328_v43, %v3910_v12 }
 0x560   : > { %v8644_v59 = vperm.slane %v4547_v49, %v6976_v61  ;;  %v4557_v34 = vsel %vm551_vm0, %v4556_v11, %v8481_v52  ;;  %v4577_v43 = vsel %vm551_vm0, %v4576_v41, %v8611_v55  ;;  %v8674_v11 = vperm.slane %v3845_v40, %v6976_v61 }
 0x561   : > { %v4545_v44 = vsel %vm551_vm0, %v4544_v45, %v8469_v20  ;;  %v8664_v20 = vperm.slane %v3869_v27, %v6976_v61  ;;  %v3899_v45 = vsel %vm551_vm0, %v8340_v10, %v3898_v8  ;;  %v8670_v12 = vpop.trf.xlu0  ;;  %v8679_v50 = vperm.slane %v4557_v34, %v6976_v61 }
 0x562   : > { %v4551_v49 = vperm.slane %v4545_v44, %v6976_v61  ;;  %v4570_v38 = vrot.slane %v8644_v59, 4  ;;  %v3907_v10 = vperm.slane %v3899_v45, %v6948_v28  ;;  %v8690_v9 = vperm.slane %v4577_v43, %v6948_v28 }
 0x563   : > { %v3888_v8 = vrot.slane %v8664_v20, 4  ;;  %v3943_v45 = vperm.slane %v8335_v4, %v6948_v28  ;;  %v10104_v43 = vrot.slane %v8481_v52, 4  ;;  %v3870_v27 = vrot.slane %v8634_v39, 4 }
 0x564   : > { %4632 = vxpose.xlu2.b32.start.end [1/1] (short) (narrow) %v4551_v49, 16  ;;  %v4571_v44 = vsel %vm551_vm0, 0.0, %v4570_v38  ;;  %v4568_v56 = vrot.slane %v4551_v49, 4  ;;  %v3919_v38 = vperm.slane %v3911_v21, %v6948_v28  ;;  %v10103_v49 = vrot.slane %v8321_v47, 4 }
 0x565   : > { %4728 = vxpose.xlu0.b32.start.end [1/1] (short) (narrow) %v4571_v44, 16  ;;  %v4588_v44 = vrot.slane %v8670_v12, 4  ;;  %v3944_v47 = vrot.slane %v8569_v5, 4  ;;  %v4572_v4 = vrot.slane %v8679_v50, 4 }
 0x566   : > { %v4569_v41 = vsel %vm551_vm0, 0.0, %v4568_v56  ;;  %v3923_v40 = vsel %vm551_vm0, %v8331_v22, %v10103_v49  ;;  %v8698_v56 = vsel %vm551_vm0, %v3888_v8, %v8674_v11  ;;  %v3956_v21 = vrot.slane %v3919_v38, 4 }
 0x567   : > { %4664 = vxpose.xlu1.b32.start.end [1/1] (short) (narrow) %v4569_v41, 16  ;;  %v3931_v34 = vperm.slane %v3923_v40, %v6948_v28  ;;  %v3968_v22 = vrot.slane %v8553_v62, 4  ;;  %v4559_v49 = vsel %vm551_vm0, %v8600_v16, %v10104_v43  ;;  %v3980_v41 = vrot.slane %v3943_v45, 4 }
 0x568   : > { %v3846_v40 = vrot.slane %v8581_v53, 4  ;;  %v3957_v8 = vsel %vm551_vm0, %v3956_v21, %v3907_v10  ;;  %v3945_v51 = vsel %vm551_vm0, %v3944_v47, %v8566_v23  ;;  %v4589_v52 = vsel %vm551_vm0, %v4588_v44, %v8522_v19 }
 0x569   : > { %v3969_v62 = vsel %vm551_vm0, %v3968_v22, %v8547_v29  ;;  %v3963_v5 = vperm.slane %v3957_v8, %v6976_v61  ;;  %v3981_v16 = vsel %vm551_vm0, %v3980_v41, %v3931_v34  ;;  %v3951_v53 = vperm.slane %v3945_v51, %v6976_v61 }
 0x56a   : > { %v3987_v39 = vperm.slane %v3981_v16, %v6976_v61  ;;  %v3975_v43 = vperm.slane %v3969_v62, %v6976_v61  ;;  %v3847_v21 = vsel %vm551_vm0, %v8607_v48, %v3846_v40  ;;  %v3871_v23 = vsel %vm551_vm0, %v8533_v35, %v3870_v27 }
 0x56b   : > { %v3994_v29 = vrot.slane %v3951_v53, 4  ;;  %v4002_v47 = vrot.slane %v3963_v5, 4  ;;  %v3855_v44 = vperm.slane %v3847_v21, %v6976_v61  ;;  %v3879_v22 = vperm.slane %v3871_v23, %v6976_v61 }
 0x56c   : > { %v4595_v41 = vperm.slane %v4589_v52, %v6948_v28  ;;  %v4000_v8 = vrot.slane %v3987_v39, 4  ;;  %v3998_v51 = vrot.slane %v8603_v36, 4  ;;  %v3958_v16 = vrot.slane %v3907_v10, 4 }
 0x56d   : > { %v8730_v62 = vsel %vm551_vm0, %v3975_v43, %v3994_v29  ;;  %v8733_v48 = vsel %vm551_vm0, %v3987_v39, %v4002_v47  ;;  %v3892_v40 = vrot.slane %v3879_v22, 4  ;;  %v3894_v35 = vrot.slane %v3855_v44, 4 }
 0x56e   : > { %v8736_v27 = vsel %vm551_vm0, %v4000_v8, %v3963_v5  ;;  %v8740_v21 = vsel %vm551_vm0, %v8592_v0, %v3998_v51  ;;  %v3959_v52 = vsel %vm551_vm0, %v3919_v38, %v3958_v16  ;;  %v3982_v23 = vrot.slane %v3931_v34, 4 }
 0x56f   : > { %v8744_v36 = vsel %vm551_vm0, %v3892_v40, %v3855_v44  ;;  %v8747_v10 = vsel %vm551_vm0, %v3879_v22, %v3894_v35  ;;  %v3967_v39 = vperm.slane %v3959_v52, %v6976_v61  ;;  %v3890_v29 = vrot.slane %v8674_v11, 4 }
 0x570   : > { %v8753_v5 = vperm.slane %v8477_v7, %v6976_v61  ;;  %v3983_v0 = vsel %vm551_vm0, %v3943_v45, %v3982_v23  ;;  %v3880_v47 = vrot.slane %v8559_v6, 4  ;;  %v3992_v38 = vrot.slane %v3975_v43, 4 }
 0x571   : > { %v8758_v34 = vperm.slane %v4559_v49, %v6976_v61  ;;  %v3991_v44 = vperm.slane %v3983_v0, %v6976_v61  ;;  %v4006_v22 = vrot.slane %v3967_v39, 4  ;;  %v8763_v8 = vsel %vm551_vm0, %v8664_v20, %v3890_v29 }
 0x572   : > { %v4600_v11 = vrot.slane %v4595_v41, 4  ;;  %v4573_v7 = vsel %vm551_vm0, 0.0, %v4572_v4  ;;  %v8769_v45 = vsel %vm551_vm0, %v3880_v47, %v8556_v25  ;;  %v8772_v6 = vsel %vm551_vm0, %v3992_v38, %v3951_v53 }
 0x573   : > { %v4590_v49 = vrot.slane %v8522_v19, 4  ;;  %v4602_v43 = vrot.slane %v8690_v9, 4  ;;  %v8777_v20 = vsel %vm551_vm0, %v3991_v44, %v4006_v22  ;;  %v4004_v51 = vrot.slane %v3991_v44, 4 }
 0x574   : > { %4696 = vxpose.xlu2.b32.start.end [1/1] (short) (narrow) %v8644_v59, 16  ;;  %v8781_v59 = vperm.slane %v8461_v58, %v6948_v28  ;;  %v3768_v4 = vrot.slane %v8753_v5, 4  ;;  %v4132_v25 = vrot.slane %v8486_v63, 4  ;;  %v4144_v53 = vrot.slane %v8498_v33, 4 }
 0x575   : > { %4792 = vxpose.xlu0.b32.start.end [1/1] (short) (narrow) %v4573_v7, 16  ;;  %v4146_v16 = vrot.slane %v8510_v1, 4  ;;  %v4591_v19 = vsel %vm551_vm0, %v8670_v12, %v4590_v49  ;;  %v10105_v40 = vrot.slane %v8422_v42, 4  ;;  %v8795_v58 = vsel %vm551_vm0, %v4004_v51, %v3967_v39 }
 0x576   : > { %v4601_v52 = vsel %vm551_vm0, %v4600_v11, %v8690_v9  ;;  %v4574_v23 = vrot.slane %v8758_v34, 4  ;;  %v10106_v29 = vrot.slane %v8419_v17, 4  ;;  %v4603_v0 = vsel %vm551_vm0, %v4595_v41, %v4602_v43 }
 0x577   : > { %4760 = vxpose.xlu1.b32.start.end [1/1] (short) (narrow) %v8679_v50, 16  ;;  %v4045_v35 = vsel %vm551_vm0, %v10105_v40, %v8435_v15  ;;  %v10107_v42 = vrot.slane %v8431_v31, 4  ;;  %v10108_v39 = vrot.slane %v8438_v13, 4  ;;  %v10109_v38 = vrot.slane %v8428_v30, 4 }
 0x578   : > { %v3553_v12 = vsel %vm551_vm0, %v10106_v29, %v8396_v26  ;;  %v4051_v50 = vperm.slane %v4045_v35, %v6948_v28  ;;  %v10110_v22 = vrot.slane %v8450_v18, 4  ;;  %v10111_v49 = vrot.slane %v8447_v24, 4 }
 0x579   : > { %v4021_v15 = vsel %vm551_vm0, %v10107_v42, %v8447_v24  ;;  %v4033_v9 = vsel %vm551_vm0, %v10108_v39, %v3553_v12  ;;  %v4034_v47 = vrot.slane %v3553_v12, 4  ;;  %v3545_v17 = vsel %vm551_vm0, %v10109_v38, %v8388_v57 }
 0x57a   : > { %v4027_v26 = vperm.slane %v4021_v15, %v6948_v28  ;;  %v4039_v44 = vperm.slane %v4033_v9, %v6948_v28  ;;  %v4080_v41 = vrot.slane %v4051_v50, 4  ;;  %v4009_v11 = vsel %vm551_vm0, %v10110_v22, %v3545_v17 }
 0x57b   : > { %v4010_v7 = vrot.slane %v3545_v17, 4  ;;  %v4023_v43 = vsel %vm551_vm0, %v8431_v31, %v10111_v49  ;;  %v4035_v30 = vsel %vm551_vm0, %v8438_v13, %v4034_v47  ;;  %v4015_v57 = vperm.slane %v4009_v11, %v6948_v28 }
 0x57c   : > { %v4056_v51 = vrot.slane %v4027_v26, 4  ;;  %v4081_v40 = vsel %vm551_vm0, %v4080_v41, %v4039_v44  ;;  %v4082_v35 = vrot.slane %v4039_v44, 4  ;;  %v8831_v29 = vperm.slane %v4591_v19, %v6948_v28 }
 0x57d   : > { %v8834_v12 = vperm.slane %v4601_v52, %v6976_v61  ;;  %v4575_v24 = vsel %vm551_vm0, 0.0, %v4574_v23  ;;  %v4011_v31 = vsel %vm551_vm0, %v8450_v18, %v4010_v7  ;;  %v8840_v42 = vperm.slane %v4603_v0, %v6976_v61 }
 0x57e   : > { %v4057_v13 = vsel %vm551_vm0, %v4056_v51, %v4015_v57  ;;  %v4058_v15 = vrot.slane %v4015_v57, 4  ;;  %v4083_v39 = vsel %vm551_vm0, %v4051_v50, %v4082_v35  ;;  %v4087_v19 = vperm.slane %v4081_v40, %v6976_v61 }
 0x57f   : > { %v4063_v9 = vperm.slane %v4057_v13, %v6976_v61  ;;  %v8847_v52 = vperm.slane %v4023_v43, %v6948_v28  ;;  %v8850_v23 = vperm.slane %v4035_v30, %v6948_v28  ;;  %v10112_v18 = vrot.slane %v8443_v14, 4 }
 0x580   : > { %v4163_v47 = vperm.slane %v8502_v60, %v6948_v28  ;;  %v4059_v50 = vsel %vm551_vm0, %v4027_v26, %v4058_v15  ;;  %v8860_v38 = vperm.slane %v4011_v31, %v6948_v28  ;;  %v4120_v17 = vrot.slane %v8491_v2, 4 }
 0x581   : > { %v3771_v0 = vsel %vm551_vm0, %v8753_v5, %v10112_v18  ;;  %v4145_v41 = vsel %vm551_vm0, %v4144_v53, %v8510_v1  ;;  %v8867_v22 = vperm.slane %v4083_v39, %v6976_v61  ;;  %v3769_v5 = vsel %vm551_vm0, %v3768_v4, %v8443_v14 }
 0x582   : > { %v4133_v44 = vsel %vm551_vm0, %v4132_v25, %v3771_v0  ;;  %v4151_v26 = vperm.slane %v4145_v41, %v6948_v28  ;;  %v4192_v11 = vrot.slane %v4163_v47, 4  ;;  %v4121_v7 = vsel %vm551_vm0, %v4120_v17, %v3769_v5 }
 0x583   : > { %v4139_v60 = vperm.slane %v4133_v44, %v6948_v28  ;;  %v4106_v49 = vrot.slane %v4063_v9, 4  ;;  %v4104_v43 = vrot.slane %v4087_v19, 4  ;;  %v4068_v25 = vrot.slane %v8847_v52, 4 }
 0x584   : > { %4824 = vxpose.xlu2.b32.start.end [1/1] (short) (narrow) %v8758_v34, 16  ;;  %v4127_v53 = vperm.slane %v4121_v7, %v6948_v28  ;;  %v4193_v57 = vsel %vm551_vm0, %v4192_v11, %v4151_v26  ;;  %v4067_v14 = vperm.slane %v4059_v50, %v6976_v61  ;;  %v4122_v4 = vrot.slane %v3769_v5, 4 }
 0x585   : > { %v4168_v30 = vrot.slane %v4139_v60, 4  ;;  %4888 = vxpose.xlu0.b32.start.end [1/1] (short) (narrow) %v8834_v12, 16  ;;  %v4199_v51 = vperm.slane %v4193_v57, %v6976_v61  ;;  %v8882_v40 = vsel %vm551_vm0, %v4087_v19, %v4106_v49  ;;  %v4092_v35 = vrot.slane %v8781_v59, 4 }
 0x586   : > { %v4108_v34 = vrot.slane %v8867_v22, 4  ;;  %v4170_v13 = vrot.slane %v4127_v53, 4  ;;  %v4194_v15 = vrot.slane %v4151_v26, 4  ;;  %v4624_v39 = vrot.slane %v8834_v12, 4 }
 0x587   : > { %v4169_v31 = vsel %vm551_vm0, %v4168_v30, %v4127_v53  ;;  %4856 = vxpose.xlu1.b32.start.end [1/1] (short) (narrow) %v4575_v24, 16  ;;  %v4134_v18 = vrot.slane %v3771_v0, 4  ;;  %v4216_v17 = vrot.slane %v4199_v51, 4  ;;  %v8895_v5 = vsel %vm551_vm0, %v4104_v43, %v4063_v9 }
 0x588   : > { %v4175_v50 = vperm.slane %v4169_v31, %v6976_v61  ;;  %v8890_v44 = vsel %vm551_vm0, %v4108_v34, %v4067_v14  ;;  %v4171_v19 = vsel %vm551_vm0, %v4139_v60, %v4170_v13  ;;  %v4195_v41 = vsel %vm551_vm0, %v4163_v47, %v4194_v15 }
 0x589   : > { %v4626_v11 = vrot.slane %v8840_v42, 4  ;;  %v4179_v12 = vperm.slane %v4171_v19, %v6976_v61  ;;  %v4203_v0 = vperm.slane %v4195_v41, %v6976_v61  ;;  %v4069_v26 = vsel %vm551_vm0, %v4068_v25, %v8860_v38 }
 0x58a   : > { %v8899_v24 = vsel %vm551_vm0, %v4216_v17, %v4175_v50  ;;  %v4093_v60 = vsel %vm551_vm0, %v4092_v35, %v8850_v23  ;;  %v4218_v7 = vrot.slane %v4175_v50, 4  ;;  %v4123_v9 = vsel %vm551_vm0, %v8491_v2, %v4122_v4 }
 0x58b   : > { %v4220_v47 = vrot.slane %v4203_v0, 4  ;;  %v4222_v49 = vrot.slane %v4179_v12, 4  ;;  %v4075_v43 = vperm.slane %v4069_v26, %v6976_v61  ;;  %v4099_v53 = vperm.slane %v4093_v60, %v6976_v61 }
 0x58c   : > { %v8912_v30 = vsel %vm551_vm0, %v4199_v51, %v4218_v7  ;;  %v4131_v57 = vperm.slane %v4123_v9, %v6948_v28  ;;  %v4135_v25 = vsel %vm551_vm0, %v8486_v63, %v4134_v18  ;;  %v4147_v35 = vsel %vm551_vm0, %v8498_v33, %v4146_v16 }
 0x58d   : > { %v8922_v2 = vsel %vm551_vm0, %v4220_v47, %v4179_v12  ;;  %v8925_v4 = vsel %vm551_vm0, %v4203_v0, %v4222_v49  ;;  %v4112_v31 = vrot.slane %v4099_v53, 4  ;;  %v4114_v34 = vrot.slane %v4075_v43, 4 }
 0x58e   : > { %v4143_v51 = vperm.slane %v4135_v25, %v6948_v28  ;;  %v4155_v13 = vperm.slane %v4147_v35, %v6948_v28  ;;  %v4167_v63 = vperm.slane %v8520_v54, %v6948_v28  ;;  %v4110_v15 = vrot.slane %v4067_v14, 4 }
 0x58f   : > { %v8932_v1 = vsel %vm551_vm0, %v4112_v31, %v4075_v43  ;;  %v8935_v33 = vsel %vm551_vm0, %v4099_v53, %v4114_v34  ;;  %v4182_v16 = vrot.slane %v4131_v57, 4  ;;  %v4070_v18 = vrot.slane %v8860_v38, 4 }
 0x590   : > { %v4180_v50 = vrot.slane %v4143_v51, 4  ;;  %v4204_v17 = vrot.slane %v4167_v63, 4  ;;  %v8940_v19 = vsel %vm551_vm0, %v8867_v22, %v4110_v15  ;;  %v4206_v41 = vrot.slane %v4155_v13, 4 }
 0x591   : > { %v4625_v12 = vsel %vm551_vm0, 0.0, %v4624_v39  ;;  %v4183_v54 = vsel %vm551_vm0, %v4143_v51, %v4182_v16  ;;  %v4071_v14 = vsel %vm551_vm0, %v8847_v52, %v4070_v18  ;;  %v4094_v0 = vrot.slane %v8850_v23, 4 }
 0x592   : > { %v4181_v26 = vsel %vm551_vm0, %v4180_v50, %v4131_v57  ;;  %v4205_v38 = vsel %vm551_vm0, %v4204_v17, %v4155_v13  ;;  %v4191_v60 = vperm.slane %v4183_v54, %v6976_v61  ;;  %v4207_v7 = vsel %vm551_vm0, %v4167_v63, %v4206_v41 }
 0x593   : > { %v4187_v22 = vperm.slane %v4181_v26, %v6976_v61  ;;  %v4211_v9 = vperm.slane %v4205_v38, %v6976_v61  ;;  %v4215_v39 = vperm.slane %v4207_v7, %v6976_v61  ;;  %v4079_v47 = vperm.slane %v4071_v14, %v6976_v61 }
 0x594   : > { %v10113_v52 = vrot.slane %v8611_v55, 4  ;;  %4920 = vxpose.xlu2.b32.start.end [1/1] (short) (narrow) %v4625_v12, 16  ;;  %v4627_v49 = vsel %vm551_vm0, 0.0, %v4626_v11  ;;  %v4095_v43 = vsel %vm551_vm0, %v8781_v59, %v4094_v0  ;;  %v4230_v53 = vrot.slane %v4191_v60, 4 }
 0x595   : > { %4984 = vxpose.xlu0.b32.start.end [1/1] (short) (narrow) %v4627_v49, 16  ;;  %v4226_v57 = vrot.slane %v4187_v22, 4  ;;  %v4228_v25 = vrot.slane %v4215_v39, 4  ;;  %v4103_v35 = vperm.slane %v4095_v43, %v6976_v61  ;;  %v4118_v31 = vrot.slane %v4079_v47, 4  ;;  %v10114_v49 = vld [vmem:[#allocation17_spill] sm:$0xff] }
 0x596   : > { %v4579_v23 = vsel %vm551_vm0, %v8622_v3, %v10113_v52  ;;  %v4612_v34 = vrot.slane %v8831_v29, 4  ;;  %v4224_v51 = vrot.slane %v4211_v9, 4  ;;  %v8965_v55 = vsel %vm551_vm0, %v4215_v39, %v4230_v53 }
 0x597   : > { %4952 = vxpose.xlu1.b32.start.end [1/1] (short) (narrow) %v8840_v42, 16  ;;  %v8969_v3 = vsel %vm551_vm0, %v4211_v9, %v4226_v57  ;;  %v8972_v59 = vsel %vm551_vm0, %v4228_v25, %v4191_v60  ;;  %v8975_v11 = vsel %vm551_vm0, %v4103_v35, %v4118_v31  ;;  %v4116_v13 = vrot.slane %v4103_v35, 4 }
 0x598   : > { %v4587_v63 = vperm.slane %v4579_v23, %v6948_v28  ;;  %v8979_v15 = vsel %vm551_vm0, %v4224_v51, %v4187_v22 }
 0x599   : > { %v8982_v16 = vsel %vm551_vm0, %v4116_v13, %v4079_v47 }
 0x59a   : > { %v4613_v42 = vsel %vm551_vm0, %v4612_v34, %v4587_v63  ;;  %v4614_v18 = vrot.slane %v4587_v63, 4 }
 0x59b   : > { %v4619_v50 = vperm.slane %v4613_v42, %v6976_v61 }
 0x59c   : > { %v4615_v17 = vsel %vm551_vm0, %v8831_v29, %v4614_v18 }
 0x59d   : > { %v4628_v41 = vrot.slane %v4619_v50, 4  ;;  %v4623_v12 = vperm.slane %v4615_v17, %v6976_v61 }
 0x59f   : > { %v4629_v54 = vsel %vm551_vm0, 0.0, %v4628_v41  ;;  %v4630_v14 = vrot.slane %v4623_v12, 4 }
 0x5a1   : > { %v4631_v0 = vsel %vm551_vm0, 0.0, %v4630_v14 }
 0x5a4   : > { %5016 = vxpose.xlu2.b32.start.end [1/1] (short) (narrow) %v4619_v50, 16 }
 0x5a5   : > { %5080 = vxpose.xlu0.b32.start.end [1/1] (short) (narrow) %v4623_v12, 16 }
 0x5a7   : > { %5048 = vxpose.xlu1.b32.start.end [1/1] (short) (narrow) %v4629_v54, 16 }
 0x5b4   : > { %5112 = vxpose.xlu2.b32.start.end [1/1] (short) (narrow) %v4631_v0, 16 }
 0x5fd   : > { %v4648_v26 = vpop.trf.xlu2 }
 0x5fe   : > { %v5146_v53 = vrot.slane %v4648_v26, 4 }
 0x605   : > { %v4649_v38 = vpop.trf.xlu2 }
 0x606   : > { %v5370_v18 = vrot.slane %v4649_v38, 4 }
 0x609   : > { %4234 = vrot.lane.b32.xlu1 %v8589_v32, %s6747_s6  ;;  %v4744_v60 = vpop.trf.xlu0 }
 0x60a   : > { %v5156_v52 = vrot.slane %v4744_v60, 4 }
 0x60b   : > { %v4680_v29 = vpop.trf.xlu1 }
 0x60c   : > { %v5158_v32 = vrot.slane %v4680_v29, 4  ;;  %v5157_v57 = vsel %vm551_vm0, %v5156_v52, %v4680_v29 }
 0x60d   : > { %v4712_v7 = vpop.trf.xlu2 }
 0x60e   : > { %v5159_v25 = vsel %vm551_vm0, %v4744_v60, %v5158_v32  ;;  %v5147_v31 = vsel %vm551_vm0, %v4712_v7, %v5146_v53 }
 0x60f   : > { %v5167_v51 = vperm.slane %v5159_v25, %v6948_v28  ;;  %v5155_v17 = vperm.slane %v5147_v31, %v6948_v28 }
 0x611   : > { %4244 = vrot.lane.b32.xlu1 %v8627_v46, %s6730_s24  ;;  %v4745_v22 = vpop.trf.xlu0  ;;  %v5144_v46 = vrot.slane %v4712_v7, 4 }
 0x612   : > { %v5380_v34 = vrot.slane %v4745_v22, 4 }
 0x613   : > { %v4681_v9 = vpop.trf.xlu1  ;;  %v5145_v13 = vsel %vm551_vm0, %v5144_v46, %v4648_v26  ;;  %v5204_v26 = vrot.slane %v5167_v51, 4 }
 0x614   : > { %v5382_v63 = vrot.slane %v4681_v9, 4  ;;  %v5151_v14 = vperm.slane %v5145_v13, %v6948_v28  ;;  %v5381_v0 = vsel %vm551_vm0, %v5380_v34, %v4681_v9 }
 0x615   : > { %v4713_v39 = vpop.trf.xlu2 }
 0x616   : > { %v5368_v41 = vrot.slane %v4713_v39, 4  ;;  %v5383_v60 = vsel %vm551_vm0, %v4745_v22, %v5382_v63 }
 0x617   : > { %v5391_v53 = vperm.slane %v5383_v60, %v6948_v28 }
 0x618   : > { %v5369_v32 = vsel %vm551_vm0, %v5368_v41, %v4649_v38 }
 0x619   : > { %4250 = vrot.lane.b32.xlu1 %v8614_v37, %s6748_s9  ;;  %v8997_v47 = vpop.trf.xlu0  ;;  %v5163_v37 = vperm.slane %v5157_v57, %v6948_v28  ;;  %v5375_v38 = vperm.slane %v5369_v32, %v6948_v28 }
 0x61a   : > { %v5182_v29 = vrot.slane %v8997_v47, 4 }
 0x61b   : > { %v4776_v23 = vpop.trf.xlu1  ;;  %4242 = vrot.lane.b32.xlu0 %v10114_v49, %s6730_s24  ;;  %v5192_v54 = vrot.slane %v5163_v37, 4  ;;  %v5206_v49 = vrot.slane %v5155_v17, 4 }
 0x61c   : > { %v5170_v50 = vrot.slane %v4776_v23, 4 }
 0x61d   : > { %v4840_v43 = vpop.trf.xlu2  ;;  %v5193_v22 = vsel %vm551_vm0, %v5192_v54, %v5151_v14  ;;  %v5207_v13 = vsel %vm551_vm0, %v5167_v51, %v5206_v49 }
 0x61e   : > { %v5171_v52 = vsel %vm551_vm0, %v4840_v43, %v5170_v50  ;;  %v9046_v34 = vperm.slane %v5193_v22, %v6976_v61 }
 0x61f   : > { %v5179_v57 = vperm.slane %v5171_v52, %v6948_v28 }
 0x620   : > { %v5242_v52 = vrot.slane %v9046_v34, 4 }
 0x621   : > { %4258 = vrot.lane.b32.xlu1 %v8698_v56, %s6731_s26  ;;  %v9005_v35 = vpop.trf.xlu0  ;;  %v5168_v56 = vrot.slane %v4840_v43, 4  ;;  %v5230_v51 = vrot.slane %v5179_v57, 4 }
 0x623   : > { %v9011_v42 = vpop.trf.xlu1  ;;  %4260 = vrot.lane.b32.xlu0 %v8736_v27, %s6731_s26  ;;  %v5371_v27 = vsel %vm551_vm0, %v4713_v39, %v5370_v18  ;;  %v5169_v7 = vsel %vm551_vm0, %v5168_v56, %v4776_v23  ;;  %v5194_v39 = vrot.slane %v5151_v14, 4  ;;  %v5428_v56 = vrot.slane %v5391_v53, 4 }
 0x624   : > { %v5379_v23 = vperm.slane %v5371_v27, %v6948_v28  ;;  %v9037_v43 = vperm.slane %v5169_v7, %v6948_v28  ;;  %v5394_v60 = vrot.slane %v9011_v42, 4  ;;  %v5215_v7 = vperm.slane %v5207_v13, %v6976_v61 }
 0x625   : > { %4236 = vrot.lane.b32.xlu2 %v8730_v62, %s6747_s6  ;;  %v9018_v12 = vpop.trf.xlu2  ;;  %v5387_v62 = vperm.slane %v5381_v0, %v6948_v28 }
 0x626   : > { %v5430_v54 = vrot.slane %v5379_v23, 4  ;;  %v5218_v14 = vrot.slane %v9037_v43, 4  ;;  %v5429_v32 = vsel %vm551_vm0, %v5428_v56, %v5379_v23 }
 0x627   : > { %v5416_v63 = vrot.slane %v5387_v62, 4 }
 0x628   : > { %v5431_v22 = vsel %vm551_vm0, %v5391_v53, %v5430_v54 }
 0x629   : > { %4268 = vrot.lane.b32.xlu1 %v8733_v48, %s6749_s11  ;;  %v9031_v9 = vpop.trf.xlu0  ;;  %v5205_v48 = vsel %vm551_vm0, %v5204_v26, %v5155_v17  ;;  %v5392_v17 = vrot.slane %v9018_v12, 4  ;;  %v5418_v26 = vrot.slane %v5375_v38, 4  ;;  %v9102_v56 = vperm.slane %v5431_v22, %v6976_v61 }
 0x62b   : > { %v4872_v46 = vpop.trf.xlu1  ;;  %4274 = vrot.lane.b32.xlu0 %v8744_v36, %s6733_s7  ;;  %v5195_v36 = vsel %vm551_vm0, %v5163_v37, %v5194_v39  ;;  %v5417_v37 = vsel %vm551_vm0, %v5416_v63, %v5375_v38  ;;  %v5393_v49 = vsel %vm551_vm0, %v5392_v17, %v9011_v42  ;;  %v5395_v42 = vsel %vm551_vm0, %v9018_v12, %v5394_v60 }
 0x62c   : > { %v5180_v25 = vrot.slane %v4872_v46, 4  ;;  %v5183_v31 = vsel %vm551_vm0, %v4872_v46, %v5182_v29  ;;  %v5203_v29 = vperm.slane %v5195_v36, %v6976_v61  ;;  %v9082_v38 = vperm.slane %v5417_v37, %v6976_v61 }
 0x62d   : > { %v5191_v18 = vperm.slane %v5183_v31, %v6948_v28  ;;  %4252 = vrot.lane.b32.xlu2 %v8740_v21, %s6748_s9  ;;  %v9052_v50 = vpop.trf.xlu2  ;;  %v9062_v21 = vperm.slane %v5205_v48, %v6976_v61  ;;  %v5419_v48 = vsel %vm551_vm0, %v5387_v62, %v5418_v26  ;;  %v5399_v53 = vperm.slane %v5393_v49, %v6948_v28 }
 0x62e   : > { %v5181_v41 = vsel %vm551_vm0, %v5180_v25, %v8997_v47  ;;  %v5406_v25 = vrot.slane %v9005_v35, 4  ;;  %v5254_v62 = vrot.slane %v5215_v7, 4  ;;  %v9094_v63 = vperm.slane %v5429_v32, %v6976_v61 }
 0x62f   : > { %v5187_v0 = vperm.slane %v5181_v41, %v6948_v28  ;;  %v5228_v27 = vrot.slane %v5191_v18, 4  ;;  %v5231_v46 = vsel %vm551_vm0, %v5191_v18, %v5230_v51  ;;  %v9099_v12 = vperm.slane %v5419_v48, %v6976_v61 }
 0x630   : > { %v5239_v36 = vperm.slane %v5231_v46, %v6976_v61  ;;  %v5246_v17 = vrot.slane %v5203_v29, 4  ;;  %v5250_v41 = vrot.slane %v9062_v21, 4  ;;  %v5466_v51 = vrot.slane %v9082_v38, 4 }
 0x631   : > { %4282 = vrot.lane.b32.xlu1 %v8747_v10, %s6750_s13  ;;  %v9067_v47 = vpop.trf.xlu0  ;;  %v5219_v39 = vsel %vm551_vm0, %v5187_v0, %v5218_v14  ;;  %v5216_v23 = vrot.slane %v5187_v0, 4  ;;  %v5229_v31 = vsel %vm551_vm0, %v5228_v27, %v5179_v57  ;;  %v5403_v57 = vperm.slane %v5395_v42, %v6948_v28 }
 0x632   : > { %v5227_v18 = vperm.slane %v5219_v39, %v6976_v61  ;;  %v9109_v54 = vperm.slane %v5229_v31, %v6976_v61  ;;  %v5442_v0 = vrot.slane %v5399_v53, 4  ;;  %v5252_v27 = vrot.slane %v5239_v36, 4 }
 0x633   : > { %v4873_v10 = vpop.trf.xlu1  ;;  %4284 = vrot.lane.b32.xlu0 %v8777_v20, %s6750_s13  ;;  %v5217_v26 = vsel %vm551_vm0, %v5216_v23, %v9037_v43  ;;  %v9119_v49 = vsel %vm551_vm0, %v5239_v36, %v5254_v62  ;;  %v5470_v22 = vrot.slane %v9099_v12, 4  ;;  %v5474_v39 = vrot.slane %v9094_v63, 4 }
 0x634   : > { %v5404_v13 = vrot.slane %v4873_v10, 4  ;;  %v5407_v14 = vsel %vm551_vm0, %v4873_v10, %v5406_v25  ;;  %v5244_v37 = vrot.slane %v5227_v18, 4  ;;  %v5478_v46 = vrot.slane %v9102_v56, 4 }
 0x635   : > { %4266 = vrot.lane.b32.xlu2 %v8763_v8, %s6749_s11  ;;  %v9091_v20 = vpop.trf.xlu2  ;;  %v5415_v32 = vperm.slane %v5407_v14, %v6948_v28  ;;  %v5454_v43 = vrot.slane %v5403_v57, 4  ;;  %v9128_v10 = vperm.slane %v5217_v26, %v6976_v61  ;;  %v9132_v48 = vsel %vm551_vm0, %v9109_v54, %v5250_v41 }
 0x636   : > { %v5405_v8 = vsel %vm551_vm0, %v5404_v13, %v9005_v35  ;;  %v5258_v25 = vrot.slane %v9031_v9, 4  ;;  %v5270_v42 = vrot.slane %v9052_v50, 4  ;;  %v9137_v23 = vsel %vm551_vm0, %v5227_v18, %v5246_v17 }
 0x637   : > { %v5411_v60 = vperm.slane %v5405_v8, %v6948_v28  ;;  %v9146_v36 = vsel %vm551_vm0, %v5244_v37, %v5203_v29  ;;  %v9149_v8 = vsel %vm551_vm0, %v5252_v27, %v5215_v7  ;;  %v5452_v41 = vrot.slane %v5415_v32, 4 }
 0x638   : > { %v5630_v17 = vrot.slane %v9132_v48, 4  ;;  %v5455_v26 = vsel %vm551_vm0, %v5415_v32, %v5454_v43  ;;  %v9160_v29 = vsel %vm551_vm0, %v9128_v10, %v5242_v52 }
 0x639   : > { %4292 = vrot.lane.b32.xlu1 %v8899_v24, %s6732_s12  ;;  %v5000_v35 = vpop.trf.xlu0  ;;  %v5440_v13 = vrot.slane %v5411_v60, 4  ;;  %v5453_v18 = vsel %vm551_vm0, %v5452_v41, %v5403_v57  ;;  %v5463_v52 = vperm.slane %v5455_v26, %v6976_v61 }
 0x63a   : > { %v5268_v43 = vrot.slane %v5000_v35, 4  ;;  %v5631_v27 = vsel %vm551_vm0, %v9119_v49, %v5630_v17 }
 0x63b   : > { %4298 = vrot.lane.b32.xlu0 %v8882_v40, %s6751_s23  ;;  %v4968_v24 = vpop.trf.xlu1  ;;  %v5443_v40 = vsel %vm551_vm0, %v5411_v60, %v5442_v0  ;;  %v5482_v0 = vrot.slane %v9067_v47, 4  ;;  %v5441_v32 = vsel %vm551_vm0, %v5440_v13, %v5399_v53  ;;  %v9198_v17 = vperm.slane %v5631_v27, %v6948_v28 }
 0x63c   : > { %v5256_v14 = vrot.slane %v4968_v24, 4  ;;  %v5451_v60 = vperm.slane %v5443_v40, %v6976_v61  ;;  %v5271_v40 = vsel %vm551_vm0, %v5000_v35, %v5270_v42  ;;  %v5259_v53 = vsel %vm551_vm0, %v4968_v24, %v5258_v25 }
 0x63d   : > { %4276 = vrot.lane.b32.xlu2 %v8795_v58, %s6733_s7  ;;  %v9143_v62 = vpop.trf.xlu2  ;;  %v5240_v58 = vrot.slane %v9128_v10, 4  ;;  %v9181_v57 = vperm.slane %v5441_v32, %v6976_v61  ;;  %v9187_v42 = vperm.slane %v5453_v18, %v6976_v61  ;;  %v5269_v24 = vsel %vm551_vm0, %v5268_v43, %v9052_v50 }
 0x63e   : > { %v5257_v7 = vsel %vm551_vm0, %v5256_v14, %v9031_v9  ;;  %v5468_v41 = vrot.slane %v5451_v60, 4  ;;  %v9184_v9 = vsel %vm551_vm0, %v5451_v60, %v5470_v22  ;;  %v5476_v22 = vrot.slane %v5463_v52, 4 }
 0x63f   : > { %v5263_v14 = vperm.slane %v5257_v7, %v6948_v28  ;;  %v9201_v26 = vsel %vm551_vm0, %v5463_v52, %v5478_v46  ;;  %v5494_v18 = vrot.slane %v9091_v20, 4  ;;  %v5267_v50 = vperm.slane %v5259_v53, %v6948_v28 }
 0x640   : > { %v9215_v46 = vsel %vm551_vm0, %v9181_v57, %v5466_v51  ;;  %v9219_v27 = vsel %vm551_vm0, %v5468_v41, %v9099_v12  ;;  %v5275_v43 = vperm.slane %v5269_v24, %v6948_v28  ;;  %v9238_v24 = vsel %vm551_vm0, %v5476_v22, %v9102_v56 }
 0x641   : > { %4306 = vrot.lane.b32.xlu1 %v8890_v44, %s6734_s8  ;;  %v5001_v31 = vpop.trf.xlu0  ;;  %v5728_v52 = vrot.slane %v9238_v24, 4 }
 0x642   : > { %v5492_v13 = vrot.slane %v5001_v31, 4  ;;  %v5495_v12 = vsel %vm551_vm0, %v5001_v31, %v5494_v18 }
 0x643   : > { %4308 = vrot.lane.b32.xlu0 %v8922_v2, %s6734_s8  ;;  %v4969_v44 = vpop.trf.xlu1  ;;  %v5279_v2 = vperm.slane %v5271_v40, %v6948_v28  ;;  %v5306_v40 = vrot.slane %v5263_v14, 4  ;;  %v5503_v22 = vperm.slane %v5495_v12, %v6948_v28 }
 0x644   : > { %v5480_v35 = vrot.slane %v4969_v44, 4  ;;  %v5483_v51 = vsel %vm551_vm0, %v4969_v44, %v5482_v0 }
 0x645   : > { %4290 = vrot.lane.b32.xlu2 %v8895_v5, %s6732_s12  ;;  %v9195_v25 = vpop.trf.xlu2  ;;  %v5493_v5 = vsel %vm551_vm0, %v5492_v13, %v9091_v20  ;;  %v5316_v20 = vrot.slane %v5279_v2, 4  ;;  %v5491_v56 = vperm.slane %v5483_v51, %v6948_v28 }
 0x646   : > { %v5481_v60 = vsel %vm551_vm0, %v5480_v35, %v9067_v47  ;;  %v5499_v41 = vperm.slane %v5493_v5, %v6948_v28  ;;  %v9234_v35 = vsel %vm551_vm0, %v9187_v42, %v5474_v39  ;;  %v5282_v5 = vrot.slane %v9143_v62, 4 }
 0x647   : > { %v5487_v13 = vperm.slane %v5481_v60, %v6948_v28  ;;  %v5304_v60 = vrot.slane %v5275_v43, 4  ;;  %v5307_v39 = vsel %vm551_vm0, %v5275_v43, %v5306_v40  ;;  %v5317_v37 = vsel %vm551_vm0, %v5316_v20, %v5267_v50 }
 0x648   : > { %v5528_v7 = vrot.slane %v5499_v41, 4  ;;  %v5742_v43 = vrot.slane %v9234_v35, 4  ;;  %v5506_v40 = vrot.slane %v9195_v25, 4  ;;  %v9261_v32 = vperm.slane %v5307_v39, %v6976_v61 }
 0x649   : > { %4316 = vrot.lane.b32.xlu1 %v8925_v4, %s6752_s22  ;;  %v5096_v53 = vpop.trf.xlu0  ;;  %v5318_v4 = vrot.slane %v5267_v50, 4  ;;  %v5530_v47 = vrot.slane %v5487_v13, 4  ;;  %v5305_v20 = vsel %vm551_vm0, %v5304_v60, %v5263_v14  ;;  %v5540_v60 = vrot.slane %v5503_v22, 4 }
 0x64a   : > { %v5280_v44 = vrot.slane %v5096_v53, 4  ;;  %v5529_v14 = vsel %vm551_vm0, %v5528_v7, %v5487_v13  ;;  %v9283_v7 = vperm.slane %v5305_v20, %v6976_v61 }
 0x64b   : > { %4322 = vrot.lane.b32.xlu0 %v8932_v1, %s6735_s10  ;;  %v5064_v0 = vpop.trf.xlu1  ;;  %v5319_v50 = vsel %vm551_vm0, %v5279_v2, %v5318_v4  ;;  %v5541_v20 = vsel %vm551_vm0, %v5540_v60, %v5491_v56 }
 0x64c   : > { %v5281_v18 = vsel %vm551_vm0, %v5280_v44, %v9143_v62  ;;  %v5294_v51 = vrot.slane %v5064_v0, 4  ;;  %v9264_v62 = vperm.slane %v5317_v37, %v6976_v61  ;;  %v5542_v44 = vrot.slane %v5491_v56, 4 }
 0x64d   : > { %4300 = vrot.lane.b32.xlu2 %v8912_v30, %s6751_s23  ;;  %v5128_v1 = vpop.trf.xlu2  ;;  %v5283_v30 = vsel %vm551_vm0, %v5096_v53, %v5282_v5  ;;  %v5287_v12 = vperm.slane %v5281_v18, %v6948_v28  ;;  %v5531_v53 = vsel %vm551_vm0, %v5499_v41, %v5530_v47  ;;  %v9273_v5 = vsel %vm551_vm0, %v9201_v26, %v5742_v43 }
 0x64e   : > { %v5292_v31 = vrot.slane %v5128_v1, 4  ;;  %v9276_v37 = vperm.slane %v5319_v50, %v6976_v61  ;;  %v5291_v39 = vperm.slane %v5283_v30, %v6948_v28  ;;  %v5295_v13 = vsel %vm551_vm0, %v5128_v1, %v5294_v51 }
 0x64f   : > { %v5330_v47 = vrot.slane %v5287_v12, 4  ;;  %v9291_v43 = vperm.slane %v5531_v53, %v6976_v61  ;;  %v5543_v50 = vsel %vm551_vm0, %v5503_v22, %v5542_v44  ;;  %v9311_v56 = vperm.slane %v5541_v20, %v6976_v61 }
 0x650   : > { %v5293_v2 = vsel %vm551_vm0, %v5292_v31, %v5064_v0  ;;  %v9288_v31 = vperm.slane %v5529_v14, %v6976_v61  ;;  %v5366_v30 = vrot.slane %v9276_v37, 4  ;;  %v9306_v14 = vperm.slane %v5543_v50, %v6976_v61 }
 0x651   : > { %4330 = vrot.lane.b32.xlu1 %v8935_v33, %s6753_s14  ;;  %v5097_v4 = vpop.trf.xlu0  ;;  %v5299_v41 = vperm.slane %v5293_v2, %v6948_v28  ;;  %v5342_v2 = vrot.slane %v5291_v39, 4  ;;  %v10115_v50 = vrot.slane %v9109_v54, 4 }
 0x652   : > { %v5504_v18 = vrot.slane %v5097_v4, 4  ;;  %v5507_v33 = vsel %vm551_vm0, %v5097_v4, %v5506_v40  ;;  %v5358_v40 = vrot.slane %v9261_v32, 4  ;;  %v5303_v4 = vperm.slane %v5295_v13, %v6948_v28 }
 0x653   : > { %4332 = vrot.lane.b32.xlu0 %v8969_v3, %s6753_s14  ;;  %v5065_v0 = vpop.trf.xlu1  ;;  %v5515_v51 = vperm.slane %v5507_v33, %v6948_v28  ;;  %v5328_v33 = vrot.slane %v5299_v41, 4 }
 0x654   : > { %v5505_v3 = vsel %vm551_vm0, %v5504_v18, %v9195_v25  ;;  %v5518_v22 = vrot.slane %v5065_v0, 4  ;;  %v5331_v25 = vsel %vm551_vm0, %v5299_v41, %v5330_v47  ;;  %v5582_v18 = vrot.slane %v9291_v43, 4 }
 0x655   : > { %4314 = vrot.lane.b32.xlu2 %v8940_v19, %s6752_s22  ;;  %v5129_v44 = vpop.trf.xlu2  ;;  %v5511_v53 = vperm.slane %v5505_v3, %v6948_v28  ;;  %v5566_v13 = vrot.slane %v5515_v51, 4  ;;  %v9321_v47 = vsel %vm551_vm0, %v5240_v58, %v9046_v34  ;;  %v9327_v3 = vsel %vm551_vm0, %v10115_v50, %v9062_v21 }
 0x656   : > { %v5516_v1 = vrot.slane %v5129_v44, 4  ;;  %v9330_v20 = vperm.slane %v5331_v25, %v6976_v61  ;;  %v5340_v41 = vrot.slane %v5303_v4, 4  ;;  %v5519_v19 = vsel %vm551_vm0, %v5129_v44, %v5518_v22 }
 0x657   : > { %v5554_v34 = vrot.slane %v5511_v53, 4  ;;  %v5527_v54 = vperm.slane %v5519_v19, %v6948_v28  ;;  %v10116_v21 = vrot.slane %v9137_v23, 4  ;;  %v5329_v25 = vsel %vm551_vm0, %v5328_v33, %v5287_v12 }
 0x658   : > { %v5517_v10 = vsel %vm551_vm0, %v5516_v1, %v5065_v0  ;;  %v10118_v12 = vrot.slane %v9119_v49, 4  ;;  %v5590_v33 = vrot.slane %v9306_v14, 4  ;;  %v5341_v50 = vsel %vm551_vm0, %v5340_v41, %v5291_v39 }
 0x659   : > { %4340 = vrot.lane.b32.xlu1 %v8972_v59, %s6736_s5  ;;  %v5343_v59 = vsel %vm551_vm0, %v5303_v4, %v5342_v2  ;;  %v5605_v58 = vsel %vm551_vm0, %v10116_v21, %v9160_v29  ;;  %v5523_v2 = vperm.slane %v5517_v10, %v6948_v28  ;;  %v5564_v22 = vrot.slane %v5527_v54, 4 }
 0x65a   : > { %v9351_v0 = vperm.slane %v5605_v58, %v6948_v28  ;;  %v9354_v1 = vperm.slane %v5343_v59, %v6976_v61  ;;  %v5567_v44 = vsel %vm551_vm0, %v5527_v54, %v5566_v13  ;;  %v5629_v19 = vsel %vm551_vm0, %v10118_v12, %v9132_v48 }
 0x65b   : > { %4346 = vrot.lane.b32.xlu0 %v8975_v11, %s6754_s25  ;;  %v10117_v11 = vrot.slane %v9146_v36, 4  ;;  %v5552_v10 = vrot.slane %v5523_v2, 4  ;;  %v9365_v21 = vperm.slane %v5329_v25, %v6976_v61  ;;  %v9369_v59 = vsel %vm551_vm0, %v9330_v20, %v5358_v40 }
 0x65c   : > { %v5555_v13 = vsel %vm551_vm0, %v5523_v2, %v5554_v34  ;;  %v10119_v49 = vrot.slane %v9149_v8, 4  ;;  %v9377_v54 = vperm.slane %v5567_v44, %v6976_v61  ;;  %v9383_v41 = vperm.slane %v5629_v19, %v6948_v28 }
 0x65d   : > { %4324 = vrot.lane.b32.xlu2 %v8979_v15, %s6735_s10  ;;  %v5593_v4 = vsel %vm551_vm0, %v10117_v11, %v9321_v47  ;;  %v5586_v15 = vrot.slane %v9311_v56, 4  ;;  %v5640_v58 = vrot.slane %v9351_v0, 4  ;;  %v9387_v40 = vperm.slane %v5341_v50, %v6976_v61 }
 0x65e   : > { %v5617_v48 = vsel %vm551_vm0, %v10119_v49, %v9327_v3  ;;  %v9380_v39 = vperm.slane %v5593_v4, %v6948_v28  ;;  %v5565_v2 = vsel %vm551_vm0, %v5564_v22, %v5515_v51  ;;  %v5553_v11 = vsel %vm551_vm0, %v5552_v10, %v5511_v53 }
 0x65f   : > { %v9394_v44 = vperm.slane %v5555_v13, %v6976_v61  ;;  %v9397_v4 = vperm.slane %v5617_v48, %v6948_v28  ;;  %v10120_v12 = vrot.slane %v9181_v57, 4  ;;  %v9407_v50 = vsel %vm551_vm0, %v9354_v1, %v5366_v30 }
 0x660   : > { %v5618_v53 = vrot.slane %v9327_v3, 4  ;;  %v10121_v22 = vrot.slane %v9187_v42, 4  ;;  %v9418_v13 = vperm.slane %v5565_v2, %v6976_v61  ;;  %v5641_v57 = vsel %vm551_vm0, %v5640_v58, %v9380_v39 }
 0x661   : > { %v9403_v19 = vsel %vm551_vm0, %v10120_v12, %v9082_v38  ;;  %v5588_v38 = vrot.slane %v9377_v54, 4  ;;  %v5664_v30 = vrot.slane %v9383_v41, 4  ;;  %v9427_v3 = vperm.slane %v5553_v11, %v6976_v61 }
 0x662   : > { %v9415_v10 = vsel %vm551_vm0, %v10121_v22, %v9094_v63  ;;  %v9431_v63 = vsel %vm551_vm0, %v9377_v54, %v5590_v33  ;;  %v9434_v42 = vperm.slane %v5641_v57, %v6976_v61  ;;  %v10122_v49 = vrot.slane %v9219_v27, 4 }
 0x663   : > { %v5580_v58 = vrot.slane %v9394_v44, 4  ;;  %v10123_v11 = vrot.slane %v9184_v9, 4  ;;  %v9452_v12 = vsel %vm551_vm0, %v9394_v44, %v5582_v18  ;;  %v10125_v34 = vrot.slane %v9160_v29, 4 }
 0x664   : > { %v5705_v48 = vsel %vm551_vm0, %v10122_v49, %v9403_v19  ;;  %v5690_v57 = vrot.slane %v9434_v42, 4  ;;  %v5706_v49 = vrot.slane %v9403_v19, 4 }
 0x665   : > { %4338 = vrot.lane.b32.xlu2 %v8982_v16, %s6736_s5  ;;  %v5665_v16 = vsel %vm551_vm0, %v5664_v30, %v9397_v4  ;;  %v5711_v2 = vperm.slane %v5705_v48, %v6948_v28  ;;  %v5717_v33 = vsel %vm551_vm0, %v10123_v11, %v9215_v46  ;;  %v5729_v48 = vsel %vm551_vm0, %v5728_v52, %v9415_v10 }
 0x666   : > { %v9455_v22 = vperm.slane %v5665_v16, %v6976_v61  ;;  %v5723_v30 = vperm.slane %v5717_v33, %v6948_v28  ;;  %v10124_v11 = vrot.slane %v9201_v26, 4  ;;  %v5735_v25 = vperm.slane %v5729_v48, %v6948_v28 }
 0x667   : > { %v5754_v51 = vrot.slane %v5711_v2, 4  ;;  %v5594_v52 = vrot.slane %v9321_v47, 4  ;;  %v5607_v26 = vsel %vm551_vm0, %v9137_v23, %v10125_v34 }
 0x668   : > { %v5741_v18 = vsel %vm551_vm0, %v10124_v11, %v9234_v35  ;;  %v5691_v16 = vsel %vm551_vm0, %v9455_v22, %v5690_v57  ;;  %v5752_v60 = vrot.slane %v5723_v30, 4  ;;  %v5619_v35 = vsel %vm551_vm0, %v9149_v8, %v5618_v53 }
 0x669   : > { %v5747_v33 = vperm.slane %v5741_v18, %v6948_v28  ;;  %6042 = vrot.lane.b32.xlu1 %v5691_v16, %s6747_s6  ;;  %v5755_v19 = vsel %vm551_vm0, %v5723_v30, %v5754_v51  ;;  %v5778_v18 = vrot.slane %v5735_v25, 4  ;;  %v5595_v47 = vsel %vm551_vm0, %v9146_v36, %v5594_v52 }
 0x66a   : > { %v5753_v57 = vsel %vm551_vm0, %v5752_v60, %v5711_v2  ;;  %v9483_v11 = vperm.slane %v5755_v19, %v6976_v61  ;;  %v9491_v29 = vperm.slane %v5607_v26, %v6948_v28  ;;  %v9494_v23 = vperm.slane %v5619_v35, %v6948_v28 }
 0x66b   : > { %v5776_v48 = vrot.slane %v5747_v33, 4  ;;  %v9486_v16 = vperm.slane %v5753_v57, %v6976_v61  ;;  %v5779_v60 = vsel %vm551_vm0, %v5747_v33, %v5778_v18  ;;  %v9501_v34 = vperm.slane %v5595_v47, %v6948_v28 }
 0x66c   : > { %v5676_v51 = vrot.slane %v9198_v17, 4  ;;  %v9509_v2 = vperm.slane %v5779_v60, %v6976_v61  ;;  %v5652_v30 = vrot.slane %v9491_v29, 4  ;;  %v5642_v33 = vrot.slane %v9380_v39, 4 }
 0x66d   : > { %4348 = vrot.lane.b32.xlu2 %v8965_v55, %s6754_s25  ;;  %v5777_v8 = vsel %vm551_vm0, %v5776_v48, %v5735_v25  ;;  %v5802_v53 = vrot.slane %v9486_v16, 4  ;;  %v5730_v55 = vrot.slane %v9415_v10, 4  ;;  %v5666_v19 = vrot.slane %v9397_v4, 4 }
 0x66e   : > { %v9505_v36 = vperm.slane %v5777_v8, %v6976_v61  ;;  %v5677_v25 = vsel %vm551_vm0, %v5676_v51, %v9494_v23  ;;  %v5804_v26 = vrot.slane %v9509_v2, 4  ;;  %v5653_v35 = vsel %vm551_vm0, %v5652_v30, %v9501_v34 }
 0x66f   : > { %v9523_v57 = vperm.slane %v5677_v25, %v6976_v61  ;;  %v5964_v10 = vrot.slane %v9431_v63, 4  ;;  %v5643_v39 = vsel %vm551_vm0, %v9351_v0, %v5642_v33  ;;  %v5667_v4 = vsel %vm551_vm0, %v9383_v41, %v5666_v19 }
 0x670   : > { %v5803_v52 = vsel %vm551_vm0, %v9505_v36, %v5802_v53  ;;  %v5707_v48 = vsel %vm551_vm0, %v9219_v27, %v5706_v49  ;;  %v5805_v18 = vsel %vm551_vm0, %v5804_v26, %v9483_v11  ;;  %v9536_v47 = vperm.slane %v5653_v35, %v6976_v61 }
 0x671   : > { %6044 = vrot.lane.b32.xlu0 %v5803_v52, %s6747_s6  ;;  %v5651_v8 = vperm.slane %v5643_v39, %v6976_v61  ;;  %v5675_v60 = vperm.slane %v5667_v4, %v6976_v61  ;;  %6052 = vrot.lane.b32.xlu1 %v5805_v18, %s6730_s24  ;;  %v5696_v0 = vrot.slane %v9523_v57, 4  ;;  %v10126_v51 = vrot.slane %v9215_v46, 4 }
 0x672   : > { %v5731_v27 = vsel %vm551_vm0, %v9238_v24, %v5730_v55  ;;  %v9550_v49 = vperm.slane %v9273_v5, %v6948_v28  ;;  %v5584_v53 = vrot.slane %v9418_v13, 4  ;;  %v9554_v30 = vperm.slane %v5707_v48, %v6948_v28 }
 0x673   : > { %v5719_v41 = vsel %vm551_vm0, %v9184_v9, %v10126_v51  ;;  %v9560_v46 = vperm.slane %v5731_v27, %v6948_v28  ;;  %v9566_v9 = vsel %vm551_vm0, %v9418_v13, %v5586_v15  ;;  %v9572_v24 = vsel %vm551_vm0, %v5588_v38, %v9306_v14 }
 0x674   : > { %v9557_v25 = vperm.slane %v5719_v41, %v6948_v28  ;;  %v5788_v5 = vrot.slane %v9550_v49, 4  ;;  %v5692_v55 = vrot.slane %v5675_v60, 4  ;;  %v5576_v33 = vrot.slane %v9427_v3, 4 }
 0x675   : > { %v9580_v19 = vsel %vm551_vm0, %v5580_v58, %v9291_v43  ;;  %v5694_v52 = vrot.slane %v5651_v8, 4  ;;  %v5697_v54 = vsel %vm551_vm0, %v5696_v0, %v9536_v47  ;;  %v5654_v38 = vrot.slane %v9501_v34, 4 }
 0x676   : > { %v5764_v15 = vrot.slane %v9557_v25, 4  ;;  %v5789_v14 = vsel %vm551_vm0, %v5788_v5, %v9560_v46  ;;  %v5693_v13 = vsel %vm551_vm0, %v5692_v55, %v5651_v8  ;;  %v5678_v43 = vrot.slane %v9494_v23, 4 }
 0x677   : > { %v5795_v44 = vperm.slane %v5789_v14, %v6976_v61  ;;  %6050 = vrot.lane.b32.xlu2 %v5693_v13, %s6730_s24  ;;  %v10127_v58 = vrot.slane %v9330_v20, 4  ;;  %v5940_v39 = vrot.slane %v9452_v12, 4  ;;  %v5952_v34 = vrot.slane %v9572_v24, 4 }
 0x678   : > { %v5765_v26 = vsel %vm551_vm0, %v5764_v15, %v9554_v30  ;;  %v9606_v48 = vsel %vm551_vm0, %v5584_v53, %v9311_v56  ;;  %v5965_v23 = vsel %vm551_vm0, %v5964_v10, %v9566_v9  ;;  %v5695_v20 = vsel %vm551_vm0, %v5675_v60, %v5694_v52 }
 0x679   : > { %v9598_v35 = vsel %vm551_vm0, %v10127_v58, %v9261_v32  ;;  %6066 = vrot.lane.b32.xlu0 %v5697_v54, %s6731_s26  ;;  %v5771_v4 = vperm.slane %v5765_v26, %v6976_v61  ;;  %v10128_v32 = vrot.slane %v9288_v31, 4  ;;  %6058 = vrot.lane.b32.xlu1 %v5695_v20, %s6748_s9  ;;  %v5655_v56 = vsel %vm551_vm0, %v9491_v29, %v5654_v38 }
 0x67a   : > { %v5808_v51 = vrot.slane %v5795_v44, 4  ;;  %v5928_v10 = vrot.slane %v9580_v19, 4  ;;  %v10129_v60 = vrot.slane %v9354_v1, 4  ;;  %v5679_v27 = vsel %vm551_vm0, %v9198_v17, %v5678_v43 }
 0x67b   : > { %v4235_v18 = vpop.permute.xlu1 %4234  ;;  %v9615_v8 = vsel %vm551_vm0, %v9427_v3, %v10128_v32  ;;  %v5810_v3 = vrot.slane %v5771_v4, 4  ;;  %v5352_v53 = vrot.slane %v9365_v21, 4  ;;  %v5360_v29 = vrot.slane %v9387_v40, 4 }
 0x67c   : > { %v9620_v0 = vsel %vm4352_vm14, %v8769_v45, %v4235_v18  ;;  %v9629_v41 = vsel %vm551_vm0, %v10129_v60, %v9276_v37  ;;  %v9635_v45 = vsel %vm551_vm0, %v5576_v33, %v9288_v31  ;;  %v5816_v5 = vrot.slane %v9598_v35, 4 }
 0x67d   : > { %v5941_v1 = vsel %vm551_vm0, %v5940_v39, %v9615_v8  ;;  %v5806_v37 = vrot.slane %v9483_v11, 4  ;;  %v5663_v55 = vperm.slane %v5655_v56, %v6976_v61  ;;  %v5953_v17 = vsel %vm551_vm0, %v5952_v34, %v9606_v48 }
 0x67e   : > { %v9649_v31 = vperm.slane %v5965_v23, %v6948_v28  ;;  %v5840_v33 = vrot.slane %v9629_v41, 4  ;;  %v5687_v15 = vperm.slane %v5679_v27, %v6976_v61  ;;  %v5809_v54 = vsel %vm551_vm0, %v5808_v51, %v5771_v4 }
 0x67f   : > { %v9644_v52 = vpop.permute.xlu2 %4236  ;;  %v5929_v14 = vsel %vm551_vm0, %v5928_v10, %v9635_v45  ;;  %v5811_v11 = vsel %vm551_vm0, %v5795_v44, %v5810_v3  ;;  %6068 = vrot.lane.b32.xlu2 %v5809_v54, %s6731_s26  ;;  %v9659_v13 = vperm.slane %v5941_v1, %v6948_v28  ;;  %v5766_v38 = vrot.slane %v9554_v30, 4  ;;  %s6215_s26 = sshll.u32 %s8029_s0, 4  ;;  %s9912_s26 = int_to_ptr.vmem [resolvable:$true] %s6215_s26 }
 0x680   : > { %v10130_v26 = vrot.slane %v9283_v7, 4  ;;  %v9670_v58 = vsel %vm551_vm0, %v5360_v29, %v9264_v62  ;;  %v5852_v39 = vrot.slane %v9407_v50, 4  ;;  %v9675_v44 = vperm.slane %v5953_v17, %v6948_v28 }
 0x681   : > { %6076 = vrot.lane.b32.xlu0 %v5811_v11, %s6749_s11  ;;  %v6000_v34 = vrot.slane %v9649_v31, 4  ;;  %v10131_v30 = vrot.slane %v9264_v62, 4  ;;  %v5702_v23 = vrot.slane %v5663_v55, 4  ;;  %v9688_v18 = vsel %vm551_vm0, %v5352_v53, %v9283_v7 }
 0x682   : > { %v9666_v43 = vsel %vm551_vm0, %v9365_v21, %v10130_v26  ;;  %v5807_v21 = vsel %vm551_vm0, %v9509_v2, %v5806_v37  ;;  %v5935_v32 = vperm.slane %v5929_v14, %v6948_v28  ;;  %v5700_v56 = vrot.slane %v5687_v15, 4 }
 0x683   : > { %v5363_v4 = vsel %vm551_vm0, %v9387_v40, %v10131_v30  ;;  %v9684_v20 = vpop.permute.xlu1 %4244  ;;  %6060 = vrot.lane.b32.xlu1 %v5807_v21, %s6748_s9  ;;  %v5790_v62 = vrot.slane %v9560_v46, 4  ;;  %v10132_v40 = vrot.slane %v9369_v59, 4  ;;  %v5976_v2 = vrot.slane %v9659_v13, 4 }
 0x684   : > { %v5767_v10 = vsel %vm551_vm0, %v9557_v25, %v5766_v38  ;;  %v5841_v60 = vsel %vm551_vm0, %v5840_v33, %v9670_v58  ;;  %v6001_v3 = vsel %vm551_vm0, %v6000_v34, %v9675_v44  ;;  %v5817_v46 = vsel %vm551_vm0, %v5816_v5, %v9688_v18 }
 0x685   : > { %v5829_v51 = vsel %vm551_vm0, %v10132_v40, %v9666_v43  ;;  %v5847_v27 = vperm.slane %v5841_v60, %v6948_v28  ;;  %v5853_v53 = vsel %vm551_vm0, %v5852_v39, %v5363_v4  ;;  %v5698_v29 = vrot.slane %v9536_v47, 4 }
 0x686   : > { %v5835_v7 = vperm.slane %v5829_v51, %v6948_v28  ;;  %v5701_v25 = vsel %vm551_vm0, %v5700_v56, %v5663_v55  ;;  %v5775_v37 = vperm.slane %v5767_v10, %v6976_v61  ;;  %v5791_v17 = vsel %vm551_vm0, %v9550_v49, %v5790_v62 }
 0x687   : > { %v9710_v1 = vpop.permute.xlu2 %4252  ;;  %v5859_v33 = vperm.slane %v5853_v53, %v6948_v28  ;;  %v5703_v54 = vsel %vm551_vm0, %v5687_v15, %v5702_v23  ;;  %v9719_v5 = vperm.slane %v6001_v3, %v6976_v61  ;;  %6082 = vrot.lane.b32.xlu2 %v5701_v25, %s6733_s7  ;;  %v5823_v47 = vperm.slane %v5817_v46, %v6948_v28 }
 0x688   : > { %v5864_v14 = vrot.slane %v5835_v7, 4  ;;  %v5977_v55 = vsel %vm551_vm0, %v5976_v2, %v5935_v32  ;;  %v5890_v11 = vrot.slane %v5847_v27, 4  ;;  %v5699_v49 = vsel %vm551_vm0, %v9523_v57, %v5698_v29 }
 0x689   : > { %6090 = vrot.lane.b32.xlu0 %v5703_v54, %s6750_s13  ;;  %v5799_v38 = vperm.slane %v5791_v17, %v6976_v61  ;;  %v5814_v15 = vrot.slane %v5775_v37, 4  ;;  %v5888_v39 = vrot.slane %v5859_v33, 4  ;;  %v9732_v34 = vperm.slane %v5977_v55, %v6976_v61 }
 0x68a   : > { %v6024_v30 = vrot.slane %v9719_v5, 4  ;;  %v5865_v23 = vsel %vm551_vm0, %v5864_v14, %v5823_v47  ;;  %v5854_v56 = vrot.slane %v5363_v4, 4  ;;  %v5866_v62 = vrot.slane %v5823_v47, 4 }
 0x68b   : > { %v9728_v26 = vpop.permute.xlu1 %4250  ;;  %6074 = vrot.lane.b32.xlu1 %v5699_v49, %s6749_s11  ;;  %v5891_v57 = vsel %vm551_vm0, %v5859_v33, %v5890_v11  ;;  %v5812_v40 = vrot.slane %v5799_v38, 4  ;;  %v5830_v51 = vrot.slane %v9666_v43, 4  ;;  %v5815_v10 = vsel %vm551_vm0, %v5799_v38, %v5814_v15  ;;  %s6614_s11 = scalar_lea.hbm %s10085_s2, 32 }
 0x68c   : > { %v5871_v60 = vperm.slane %v5865_v23, %v6976_v61  ;;  %v5889_v3 = vsel %vm551_vm0, %v5888_v39, %v5847_v27  ;;  %v5978_v46 = vrot.slane %v5935_v32, 4  ;;  %v6025_v53 = vsel %vm551_vm0, %v6024_v30, %v9732_v34 }
 0x68d   : > { %v9735_v21 = vpop.permute.xlu0 %4242  ;;  %v9748_v4 = vperm.slane %v5891_v57, %v6976_v61  ;;  %v6002_v29 = vrot.slane %v9675_v44, 4  ;;  %v5842_v43 = vrot.slane %v9670_v58, 4  ;;  %v5855_v25 = vsel %vm551_vm0, %v9407_v50, %v5854_v56 }
 0x68e   : > { %v5867_v27 = vsel %vm551_vm0, %v5835_v7, %v5866_v62  ;;  %v5813_v32 = vsel %vm551_vm0, %v5812_v40, %v5775_v37  ;;  %v5818_v17 = vrot.slane %v9688_v18, 4  ;;  %v5895_v33 = vperm.slane %v5889_v3, %v6976_v61 }
 0x68f   : > { %v9740_v2 = vpop.permute.xlu2 %4266  ;;  %6092 = vrot.lane.b32.xlu2 %v5815_v10, %s6750_s13  ;;  %v5831_v44 = vsel %vm551_vm0, %v9369_v59, %v5830_v51  ;;  %v5979_v50 = vsel %vm551_vm0, %v9659_v13, %v5978_v46  ;;  %v5914_v58 = vrot.slane %v5871_v60, 4  ;;  %v9768_v47 = vperm.slane %v5867_v27, %v6976_v61 }
 0x690   : > { %v5916_v7 = vrot.slane %v9748_v4, 4  ;;  %v6003_v18 = vsel %vm551_vm0, %v9649_v31, %v6002_v29  ;;  %v9776_v14 = vperm.slane %v5855_v25, %v6948_v28  ;;  %v9779_v59 = vperm.slane %v5831_v44, %v6948_v28 }
 0x691   : > { %6100 = vrot.lane.b32.xlu0 %v6025_v53, %s6732_s12  ;;  %v5843_v13 = vsel %vm551_vm0, %v9629_v41, %v5842_v43  ;;  %v5942_v55 = vrot.slane %v9615_v8, 4  ;;  %v5954_v11 = vrot.slane %v9606_v48, 4  ;;  %v5912_v49 = vrot.slane %v5895_v33, 4 }
 0x692   : > { %v5987_v38 = vperm.slane %v5979_v50, %v6976_v61  ;;  %v5819_v31 = vsel %vm551_vm0, %v9598_v35, %v5818_v17  ;;  %v6011_v39 = vperm.slane %v6003_v18, %v6976_v61  ;;  %v5915_v30 = vsel %vm551_vm0, %v5895_v33, %v5914_v58 }
 0x693   : > { %v9760_v54 = vpop.permute.xlu1 %4258  ;;  %6084 = vrot.lane.b32.xlu1 %v5813_v32, %s6733_s7  ;;  %v5966_v23 = vrot.slane %v9566_v9, 4  ;;  %v5917_v41 = vsel %vm551_vm0, %v5916_v7, %v9768_v47  ;;  %v9797_v48 = vperm.slane %v5843_v13, %v6948_v28  ;;  %v5900_v8 = vrot.slane %v9776_v14, 4 }
 0x694   : > { %v5930_v56 = vrot.slane %v9635_v45, 4  ;;  %v9803_v35 = vperm.slane %v5819_v31, %v6948_v28  ;;  %v5876_v62 = vrot.slane %v9779_v59, 4  ;;  %v5943_v9 = vsel %vm551_vm0, %v9452_v12, %v5942_v55 }
 0x695   : > { %v9773_v37 = vpop.permute.xlu0 %4260  ;;  %v5955_v57 = vsel %vm551_vm0, %v9572_v24, %v5954_v11  ;;  %v5913_v40 = vsel %vm551_vm0, %v5912_v49, %v5871_v60  ;;  %v6030_v51 = vrot.slane %v5987_v38, 4  ;;  %v6028_v45 = vrot.slane %v6011_v39, 4 }
 0x696   : > { %v5967_v3 = vsel %vm551_vm0, %v9431_v63, %v5966_v23  ;;  %v5901_v46 = vsel %vm551_vm0, %v5900_v8, %v9797_v48  ;;  %v5951_v12 = vperm.slane %v5943_v9, %v6948_v28  ;;  %v5877_v24 = vsel %vm551_vm0, %v5876_v62, %v9803_v35 }
 0x697   : > { %v9786_v15 = vpop.permute.xlu2 %4276  ;;  %6106 = vrot.lane.b32.xlu2 %v5915_v30, %s6751_s23  ;;  %v5931_v60 = vsel %vm551_vm0, %v9580_v19, %v5930_v56  ;;  %v5963_v29 = vperm.slane %v5955_v57, %v6948_v28  ;;  %v6031_v43 = vsel %vm551_vm0, %v6011_v39, %v6030_v51  ;;  %v6026_v25 = vrot.slane %v9732_v34, 4 }
 0x698   : > { %v5688_v27 = vrot.slane %v9455_v22, 4  ;;  %v5907_v32 = vperm.slane %v5901_v46, %v6976_v61  ;;  %v6029_v17 = vsel %vm551_vm0, %v6028_v45, %v5987_v38  ;;  %v5975_v33 = vperm.slane %v5967_v3, %v6948_v28 }
 0x699   : > { %6114 = vrot.lane.b32.xlu0 %v5917_v41, %s6734_s8  ;;  %v5800_v44 = vrot.slane %v9505_v36, 4  ;;  %v5883_v19 = vperm.slane %v5877_v24, %v6976_v61  ;;  %v5939_v50 = vperm.slane %v5931_v60, %v6948_v28  ;;  %v5988_v58 = vrot.slane %v5951_v12, 4 }
 0x69a   : > { %v9840_v34 = vsel %vm551_vm0, %v5688_v27, %v9434_v42  ;;  %v6014_v22 = vrot.slane %v5963_v29, 4  ;;  %v6027_v36 = vsel %vm551_vm0, %v9719_v5, %v6026_v25  ;;  %v5920_v28 = vrot.slane %v5907_v32, 4 }
 0x69b   : > { %v9811_v10 = vpop.permute.xlu1 %4268  ;;  %6098 = vrot.lane.b32.xlu1 %v5913_v40, %s6732_s12  ;;  %v9845_v7 = vsel %vm551_vm0, %v5800_v44, %v9486_v16  ;;  %v6012_v13 = vrot.slane %v5975_v33, 4  ;;  %v5922_v55 = vrot.slane %v5883_v19, 4  ;;  %v5989_v42 = vsel %vm551_vm0, %v5988_v58, %v5939_v50  ;;  %s9906_s12 = sshll.u32 %s6802_s19, 4 }
 0x69c   : > { %v5990_v49 = vrot.slane %v5939_v50, 4  ;;  %v6015_v38 = vsel %vm551_vm0, %v5975_v33, %v6014_v22  ;;  %v5918_v16 = vrot.slane %v9768_v47, 4  ;;  %v5921_v5 = vsel %vm551_vm0, %v5920_v28, %v5883_v19 }
 0x69d   : > { %v9818_v53 = vpop.permute.xlu0 %4274  ;;  %v5995_v39 = vperm.slane %v5989_v42, %v6976_v61  ;;  %v6013_v30 = vsel %vm551_vm0, %v6012_v13, %v5963_v29  ;;  %v5923_v23 = vsel %vm551_vm0, %v5907_v32, %v5922_v55  ;;  %v9864_v41 = vperm.slane %v6015_v38, %v6976_v61 }
 0x69e   : > { %v5878_v8 = vrot.slane %v9803_v35, 4  ;;  %v5991_v47 = vsel %vm551_vm0, %v5951_v12, %v5990_v49  ;;  %v5919_v56 = vsel %vm551_vm0, %v9748_v4, %v5918_v16  ;;  %v6019_v62 = vperm.slane %v6013_v30, %v6976_v61 }
 0x69f   : > { %v9828_v63 = vpop.permute.xlu2 %4290  ;;  %6116 = vrot.lane.b32.xlu2 %v6029_v17, %s6734_s8  ;;  %v6034_v57 = vrot.slane %v5995_v39, 4  ;;  %v5902_v40 = vrot.slane %v9797_v48, 4  ;;  %v9878_v51 = vperm.slane %v5991_v47, %v6976_v61  ;;  %v6036_v35 = vrot.slane %v9864_v41, 4 }
 0x6a0   : > { %v5879_v4 = vsel %vm551_vm0, %v9779_v59, %v5878_v8  ;;  %v6032_v3 = vrot.slane %v6019_v62, 4 }
 0x6a1   : > { %6124 = vrot.lane.b32.xlu0 %v6031_v43, %s6752_s22  ;;  %v6035_v12 = vsel %vm551_vm0, %v6019_v62, %v6034_v57  ;;  %v5887_v24 = vperm.slane %v5879_v4, %v6976_v61  ;;  %v5903_v48 = vsel %vm551_vm0, %v9776_v14, %v5902_v40  ;;  %v6037_v60 = vsel %vm551_vm0, %v6036_v35, %v9878_v51 }
 0x6a2   : > { %v6033_v59 = vsel %vm551_vm0, %v6032_v3, %v5995_v39  ;;  %v5911_v29 = vperm.slane %v5903_v48, %v6976_v61  ;;  %v4355_v14 = vsel %vm2303_vm5, %v9620_v0, %v9735_v21  ;;  %v4354_v61 = vsel %vm4352_vm14, %v8772_v6, %v9644_v52 }
 0x6a3   : > { %v9849_v18 = vpop.permute.xlu1 %4282  ;;  %6108 = vrot.lane.b32.xlu1 %v6027_v36, %s6751_s23  ;;  %v5926_v25 = vrot.slane %v5887_v24, 4  ;;  %v4356_v0 = vsel %vm2303_vm5, %v4354_v61, %v9684_v20  ;;  %v4358_v21 = vsel %vm4357_vm15, %v4355_v14, %v9728_v26 }
 0x6a4   : > { %v5924_v32 = vrot.slane %v5911_v29, 4  ;;  %v4359_v44 = vsel %vm4357_vm15, %v4356_v0, %v9710_v1  ;;  %v4360_v19 = vsel %vm2306_vm6, %v4358_v21, %v9760_v54 }
 0x6a5   : > { %v9852_v11 = vpop.permute.xlu0 %4284  ;;  %v5927_v17 = vsel %vm551_vm0, %v5911_v29, %v5926_v25  ;;  %v4361_v20 = vsel %vm2306_vm6, %v4359_v44, %v9773_v37  ;;  %v4363_v54 = vsel %vm4362_vm1, %v4360_v19, %v9740_v2 }
 0x6a6   : > { %v5925_v6 = vsel %vm551_vm0, %v5924_v32, %v5887_v24  ;;  %v4364_v1 = vsel %vm4362_vm1, %v4361_v20, %v9811_v10 }
 0x6a7   : > { %v9857_v31 = vpop.permute.xlu2 %4300  ;;  %6130 = vrot.lane.b32.xlu2 %v5921_v5, %s6735_s10 }
 0x6a9   : > { %6138 = vrot.lane.b32.xlu0 %v5923_v23, %s6753_s14 }
 0x6ab   : > { %v9873_v9 = vpop.permute.xlu1 %4292  ;;  %6122 = vrot.lane.b32.xlu1 %v5919_v56, %s6752_s22 }
 0x6ad   : > { %v9881_v45 = vpop.permute.xlu0 %4298 }
 0x6af   : > { %v9885_v46 = vpop.permute.xlu2 %4314  ;;  %6140 = vrot.lane.b32.xlu2 %v6035_v12, %s6753_s14 }
 0x6b1   : > { %6148 = vrot.lane.b32.xlu0 %v6037_v60, %s6736_s5 }
 0x6b3   : > { %v4307_v43 = vpop.permute.xlu1 %4306  ;;  %6132 = vrot.lane.b32.xlu1 %v6033_v59, %s6735_s10  ;;  %s6214_s10 = scalar_lea.hbm %s10085_s2, %s9906_s12 }
 0x6b4   : > { %s6217_s0 = sshll.u32 %s6214_s10, 4  ;;  %s6218_s0 = int_to_ptr.hbm [resolvable:$true] %s6217_s0 }
 0x6b5   : > { %v4309_v27 = vpop.permute.xlu0 %4308  ;;  %s6608_s20 = sshra.s32 %s6218_s0, 4  ;;  %s6609_s20 = int_to_ptr.hbm [resolvable:$true] %s6608_s20 }
 0x6b6   : > { %s6610_s6 = scalar_lea.hbm %s6609_s20, 16  ;;  %p6615_p10 = scmp.lt.s32.totalorder %s6609_s20, %s10085_s2 }
 0x6b7   : > { %v9903_v33 = vpop.permute.xlu2 %4324  ;;  %6154 = vrot.lane.b32.xlu2 %v5927_v17, %s6754_s25  ;;  %p6611_p6 = scmp.ne.s32.totalorder %s6609_s20, %s6610_s6  ;;  %p6616_p2 = scmp.lt.s32.totalorder %s6614_s11, %s6610_s6 }
 0x6b9   : > { %p6612_p13 = pnand %p6611_p6, %p6833_p11  ;;  %p6617_p9 = por %p6616_p2, %p6615_p10 }
 0x6bb   : > { %v4317_v52 = vpop.permute.xlu1 %4316  ;;  %6146 = vrot.lane.b32.xlu1 %v5925_v6, %s6736_s5  ;;  %p6613_p3 = pneg %p6612_p13 }
 0x6bd   : > { %v4323_v26 = vpop.permute.xlu0 %4322  ;;  %p6618_p0 = pnand %p6617_p9, %p6613_p3 }
 0x6bf   : > { %6621 = shalt.err (!%p6618_p0)
}
 0x6c0   : > { %s6755_s29 = smov 128   ;;  %v4365_v2 = vsel %vm2309_vm7, %v4363_v54, %v9818_v53  ;;  %v6038_v37 = vrot.slane %v9878_v51, 4  ;;  %v4366_v50 = vsel %vm2309_vm7, %v4364_v1, %v9786_v15  ;;  %vm4372_vm3 = vcmask 293888   ;;  %v4339_v36 = vpop.permute.xlu2 %4338  ;;  %s6197_s8 = sand.u32 1, %s6802_s19  }
 0x6c1   : > { %6446 = dma.vmem_to_hbm [thread:$0]  (%p6833_p11), %s9912_s26, 256, %s6218_s0, %s6193_s17, %s6755_s29, %s6755_s29, %s6730_s24   ;;  %v4368_v10 = vsel %vm4367_vm2, %v4365_v2, %v9849_v18  ;;  %v4369_v58 = vsel %vm4367_vm2, %v4366_v50, %v9852_v11  ;;  %vm10091_vm4 = vcmask 359424   ;;  %vm4382_vm10 = vcmask 424960  }
 0x6c2   : > { %v4371_v22 = vsel %vm2312_vm8, %v4369_v58, %v9873_v9  ;;  %v4370_v53 = vsel %vm2312_vm8, %v4368_v10, %v9828_v63  ;;  %v6039_v28 = vsel %vm551_vm0, %v9864_v41, %v6038_v37  ;;  %s6231_s26 = scalar_lea.hbm %s10086_s3, %s9906_s12  ;;  %vm4387_vm0 = vcmask 490496   ;;  %s9994_s19 = scalar_lea.sflag [#allocation9], %s6197_s8 }
 0x6c3   : > { %v4331_v18 = vpop.permute.xlu1 %4330  ;;  %v4373_v15 = vsel %vm4372_vm3, %v4370_v53, %v9881_v45  ;;  %6156 = vrot.lane.b32.xlu1 %v6039_v28, %s6754_s25  ;;  %v4374_v55 = vsel %vm4372_vm3, %v4371_v22, %v9857_v31  ;;  %s270_s25 = scalar_lea.vmem [#allocation8], %s8016_s30  ;;  %s9984_s10 = sshll.u32 %s6231_s26, 4  ;;  %vm10133_vm12 = vcmask 457728   ;;  %s6235_s10 = int_to_ptr.hbm [resolvable:$true] %s9984_s10 }
 0x6c4   : > { %v4375_v13 = vsel %vm2315_vm9, %v4373_v15, %v4307_v43  ;;  %v4376_v42 = vsel %vm2315_vm9, %v4374_v55, %v4309_v27  ;;  %s6232_s7 = sshll.u32 %s270_s25, 4  ;;  %s6636_s0 = sshra.s32 %s6235_s10, 4  ;;  %s6233_s7 = int_to_ptr.vmem [resolvable:$true] %s6232_s7  ;;  %s6637_s0 = int_to_ptr.hbm [resolvable:$true] %s6636_s0 }
 0x6c5   : > { %v4333_v11 = vpop.permute.xlu0 %4332  ;;  %v4379_v63 = vsel %vm10091_vm4, %v4376_v42, %v4317_v52  ;;  %v4378_v49 = vsel %vm10091_vm4, %v4375_v13, %v9885_v46  ;;  %vm10134_vm4 = vmmov %vm10133_vm12  ;;  %s6638_s17 = scalar_lea.hbm %s6637_s0, 16  ;;  %s6642_s9 = scalar_lea.hbm %s10086_s3, 32 }
 0x6c6   : > { %v4380_v38 = vsel %vm2318_vm11, %v4378_v49, %v4323_v26  ;;  %v4381_v31 = vsel %vm2318_vm11, %v4379_v63, %v9903_v33  ;;  %p6639_p1 = scmp.ne.s32.totalorder %s6637_s0, %s6638_s17  ;;  %p6643_p5 = scmp.lt.s32.totalorder %s6637_s0, %s10086_s3 }
 0x6c7   : > { %v4383_v16 = vsel %vm4382_vm10, %v4380_v38, %v4331_v18  ;;  %v4384_v5 = vsel %vm4382_vm10, %v4381_v31, %v4333_v11  ;;  %p6644_p8 = scmp.lt.s32.totalorder %s6642_s9, %s6638_s17 }
 0x6c8   : > { %v4349_v30 = vpop.permute.xlu2 %4348  ;;  %v4385_v8 = vsel %vm10134_vm4, %v4383_v16, %v4339_v36  ;;  %p6640_p4 = pnand %p6639_p1, %p6833_p11 }
 0x6c9   : > { %p6645_p6 = por %p6644_p8, %p6643_p5 }
 0x6ca   : > { %p6641_p7 = pneg %p6640_p4 }
 0x6cb   : > { %v4341_v39 = vpop.permute.xlu1 %4340 }
 0x6cc   : > { %v4386_v23 = vsel %vm10133_vm12, %v4384_v5, %v4341_v39  ;;  %p6646_p13 = pnand %p6645_p6, %p6641_p7 }
 0x6cd   : > { %v4389_v41 = vsel %vm4387_vm0, %v4386_v23, %v4349_v30  ;;  %v4347_v47 = vpop.permute.xlu0 %4346 }
 0x6ce   : > { %4391 = vst.msk [vmem:[%s270_s25 + $0x8] sm:$0xff] %vm2324_vm13, %v4389_v41  ;;  %v4388_v56 = vsel %vm4387_vm0, %v4385_v8, %v4347_v47 }
 0x6cf   : > { %4390 = vst.msk [vmem:[%s270_s25] sm:$0xff] %vm2324_vm13, %v4388_v56 }
 0x6d0   : > { %6649 = shalt.err (!%p6646_p13)
}
 0x6d1   : > { %6447 = dma.vmem_to_hbm [thread:$0]  (%p6833_p11), %s6233_s7, 256, %s6235_s10, %s9994_s19, %s6755_s29, %s6755_s29, %s6730_s24   ;;  %v6051_v57 = vpop.permute.xlu2 %6050 }
 0x6d2   : > { %s6248_s22 = scalar_lea.hbm %s10087_s4, %s9906_s12  ;;  %s277_s14 = scalar_lea.vmem [#allocation10], %s8016_s30 }
 0x6d3   : > { %s6249_s26 = sshll.u32 %s277_s14, 4  ;;  %s6251_s25 = sshll.u32 %s6248_s22, 4  ;;  %s6250_s26 = int_to_ptr.vmem [resolvable:$true] %s6249_s26  ;;  %s6252_s25 = int_to_ptr.hbm [resolvable:$true] %s6251_s25 }
 0x6d4   : > { %s6664_s7 = sshra.s32 %s6252_s25, 4  ;;  %s6670_s10 = scalar_lea.hbm %s10087_s4, 32  ;;  %s6665_s7 = int_to_ptr.hbm [resolvable:$true] %s6664_s7 }
 0x6d5   : > { %s6666_s30 = scalar_lea.hbm %s6665_s7, 16  ;;  %p6671_p9 = scmp.lt.s32.totalorder %s6665_s7, %s10087_s4 }
 0x6d6   : > { %p6667_p3 = scmp.ne.s32.totalorder %s6665_s7, %s6666_s30  ;;  %p6672_p0 = scmp.lt.s32.totalorder %s6670_s10, %s6666_s30 }
 0x6d8   : > { %p6668_p10 = pnand %p6667_p3, %p6833_p11  ;;  %p6673_p1 = por %p6672_p0, %p6671_p9 }
 0x6d9   : > { %v6069_v4 = vpop.permute.xlu2 %6068 }
 0x6da   : > { %p6669_p2 = pneg %p6668_p10 }
 0x6db   : > { %v6043_v62 = vpop.permute.xlu1 %6042 }
 0x6dc   : > { %v6160_v9 = vsel %vm4352_vm14, %v9840_v34, %v6043_v62  ;;  %p6674_p4 = pnand %p6673_p1, %p6669_p2 }
 0x6dd   : > { %v6162_v32 = vsel %vm2303_vm5, %v6160_v9, %v6051_v57 }
 0x6e1   : > { %v6083_v12 = vpop.permute.xlu2 %6082 }
 0x6e3   : > { %v6045_v40 = vpop.permute.xlu0 %6044  ;;  %v6053_v35 = vpop.permute.xlu1 %6052 }
 0x6e4   : > { %v6161_v51 = vsel %vm4352_vm14, %v9845_v7, %v6045_v40 }
 0x6e5   : > { %v6163_v45 = vsel %vm2303_vm5, %v6161_v51, %v6053_v35  ;;  %vm10135_vm5 = vcmask 359424  }
 0x6e9   : > { %v6093_v60 = vpop.permute.xlu2 %6092 }
 0x6eb   : > { %v6059_v3 = vpop.permute.xlu1 %6058  ;;  %v6067_v46 = vpop.permute.xlu0 %6066 }
 0x6ec   : > { %v6164_v7 = vsel %vm4357_vm15, %v6162_v32, %v6059_v3 }
 0x6ed   : > { %v6166_v61 = vsel %vm2306_vm6, %v6164_v7, %v6067_v46 }
 0x6f1   : > { %v6107_v25 = vpop.permute.xlu2 %6106 }
 0x6f3   : > { %v6077_v48 = vpop.permute.xlu0 %6076 }
 0x6f5   : > { %v6061_v24 = vpop.permute.xlu1 %6060 }
 0x6f6   : > { %v6165_v21 = vsel %vm4357_vm15, %v6163_v45, %v6061_v24 }
 0x6f7   : > { %v6167_v6 = vsel %vm2306_vm6, %v6165_v21, %v6069_v4  ;;  %vm10136_vm6 = vmmov %vm10135_vm5 }
 0x6f8   : > { %v6169_v1 = vsel %vm4362_vm1, %v6167_v6, %v6077_v48 }
 0x6f9   : > { %v6117_v14 = vpop.permute.xlu2 %6116 }
 0x6fb   : > { %v6091_v29 = vpop.permute.xlu0 %6090 }
 0x6fd   : > { %v6075_v59 = vpop.permute.xlu1 %6074 }
 0x6fe   : > { %v6168_v0 = vsel %vm4362_vm1, %v6166_v61, %v6075_v59 }
 0x6ff   : > { %v6170_v19 = vsel %vm2309_vm7, %v6168_v0, %v6083_v12 }
 0x700   : > { %v6172_v20 = vsel %vm4367_vm2, %v6170_v19, %v6091_v29 }
 0x701   : > { %v6131_v44 = vpop.permute.xlu2 %6130 }
 0x703   : > { %v6101_v34 = vpop.permute.xlu0 %6100 }
 0x705   : > { %v6085_v43 = vpop.permute.xlu1 %6084 }
 0x706   : > { %v6171_v2 = vsel %vm2309_vm7, %v6169_v1, %v6085_v43  ;;  %vm10137_vm7 = vmmov %vm10134_vm4 }
 0x707   : > { %v6173_v10 = vsel %vm4367_vm2, %v6171_v2, %v6093_v60 }
 0x708   : > { %v6175_v36 = vsel %vm2312_vm8, %v6173_v10, %v6101_v34 }
 0x709   : > { %v6141_v50 = vpop.permute.xlu2 %6140 }
 0x70b   : > { %v6115_v33 = vpop.permute.xlu0 %6114 }
 0x70d   : > { %v6099_v27 = vpop.permute.xlu1 %6098 }
 0x70e   : > { %v6174_v26 = vsel %vm2312_vm8, %v6172_v20, %v6099_v27  ;;  %vm10138_vm8 = vmmov %vm10134_vm4 }
 0x70f   : > { %v6176_v37 = vsel %vm4372_vm3, %v6174_v26, %v6107_v25 }
 0x710   : > { %v6178_v22 = vsel %vm2315_vm9, %v6176_v37, %v6115_v33 }
 0x711   : > { %v6155_v42 = vpop.permute.xlu2 %6154 }
 0x713   : > { %v6125_v54 = vpop.permute.xlu0 %6124 }
 0x715   : > { %v6109_v17 = vpop.permute.xlu1 %6108 }
 0x716   : > { %v6177_v28 = vsel %vm4372_vm3, %v6175_v36, %v6109_v17 }
 0x717   : > { %v6179_v13 = vsel %vm2315_vm9, %v6177_v28, %v6117_v14 }
 0x718   : > { %v6181_v63 = vsel %vm10136_vm6, %v6179_v13, %v6125_v54 }
 0x71b   : > { %v6139_v18 = vpop.permute.xlu0 %6138 }
 0x71d   : > { %v6123_v52 = vpop.permute.xlu1 %6122 }
 0x71e   : > { %v6180_v53 = vsel %vm10135_vm5, %v6178_v22, %v6123_v52 }
 0x71f   : > { %v6182_v15 = vsel %vm2318_vm11, %v6180_v53, %v6131_v44 }
 0x720   : > { %v6184_v11 = vsel %vm4382_vm10, %v6182_v15, %v6139_v18 }
 0x723   : > { %v6149_v5 = vpop.permute.xlu0 %6148 }
 0x725   : > { %v6133_v58 = vpop.permute.xlu1 %6132 }
 0x726   : > { %v6183_v38 = vsel %vm2318_vm11, %v6181_v63, %v6133_v58 }
 0x727   : > { %v6185_v31 = vsel %vm4382_vm10, %v6183_v38, %v6141_v50 }
 0x728   : > { %v6187_v30 = vsel %vm10138_vm8, %v6185_v31, %v6149_v5 }
 0x72d   : > { %v6147_v55 = vpop.permute.xlu1 %6146 }
 0x72e   : > { %v6186_v49 = vsel %vm10137_vm7, %v6184_v11, %v6147_v55 }
 0x72f   : > { %v6188_v16 = vsel %vm4387_vm0, %v6186_v49, %v6155_v42 }
 0x730   : > { %6190 = vst.msk [vmem:[%s277_s14] sm:$0xff] %vm2324_vm13, %v6188_v16 }
 0x735   : > { %v6157_v39 = vpop.permute.xlu1 %6156 }
 0x736   : > { %v6189_v23 = vsel %vm4387_vm0, %v6187_v30, %v6157_v39 }
 0x737   : > { %6191 = vst.msk [vmem:[%s277_s14 + $0x8] sm:$0xff] %vm2324_vm13, %v6189_v23 }
 0x738   : > { %6677 = shalt.err (!%p6674_p4)
}
 0x739   : > { %6448 = dma.vmem_to_hbm [thread:$0]  (%p6833_p11), %s6250_s26, 256, %s6252_s25, %s9994_s19, %s6755_s29, %s6755_s29, %s6730_s24  }
 0x73a PF: > { %s6266_s20 = sand.u32 1, %s6712_s15   ;;  %p10139_p7 = scmp.ge.s32.totalorder %s6724_s18, 2 }
 0x73b   : > { %s6267_s6 = scalar_lea.sflag [#allocation4], %s6266_s20 }
 0x73c   : > { %p6460_p5 = pnand %p10139_p7, %p6837_p12 }
 0x73e   : > { %p6461_p8 = pneg %p6460_p5 }
 0x740   : > { %6703 = dma.done.wait (%p6461_p8), %s6267_s6, 256  }
 0x741   : > { %6705 = vsyncadd (%p6461_p8), %s6267_s6, 4294967040  ;;  %s10140_s9 = sadd.s32 4294967294, %s6724_s18  }
 0x742   : > { %s6276_s27 = sand.u32 1, %s10140_s9  }
 0x743   : > { %s6277_s5 = scalar_lea.sflag [#allocation9], %s6276_s27 }
 0x744   : > { %6707 = dma.done.wait (%p6461_p8), %s6277_s5, 512  }
 0x745   : > { %6709 = vsyncadd (%p6461_p8), %s6277_s5, 4294966784  ;;  %s10141_s24 = sld [smem:[#allocation15_spill]]  ;;  %p24_p11 = scmp.ge.s32.totalorder %s6806_s21, 4  }
 0x746   : > { %s10142_s17 = sld [smem:[#allocation16_spill]]  ;;  %s10143_s15 = smov %s6716_s16 }
 0x747   : > { %s10145_s18 = smov %s6806_s21  ;;  %26 = sbr.rel (!%p24_p11) target bundleno = 11 (0xb), region = 118 }
 0x74b   : > { %s10144_s16 = smov %s10141_s24 }
 0x74c   :  { %6293 = vsyncpa [#allocation3], 1 }
 0x74d   :  { %6295 = vsyncpa [#allocation3 + $0x1], 1 }
 0x74e   :  { %6296 = vsyncpa [#allocation6], 1 }
 0x74f   :  { %6298 = vsyncpa [#allocation6 + $0x1], 1 }
 0x750   :  { %6299 = vsyncpa [#allocation4], 1 }
 0x751   :  { %6301 = vsyncpa [#allocation4 + $0x1], 1 }
 0x752   :  { %6302 = vsyncpa [#allocation9], 1 }
 0x753   :  { %6304 = vsyncpa [#allocation9 + $0x1], 1 }

</bundles_post_ra>
